<compile_context>
chip_gen: v5e
topology: v5e:2x2
jax: 0.10.0
libtpu: 0.0.40
codegen_flags: <defaults>
</compile_context>

<pallas_src>
import jax
import jax.numpy as jnp
from jax.experimental import pallas as pl
from jax.experimental.pallas import tpu as pltpu


def mlp_kernel(x_ref,
               w1_ref, b1_ref,
               w2_ref, b2_ref,
               w3_ref, b3_ref,
               w4_ref, b4_ref,
               w5_ref, b5_ref,
               o_ref,
               h2_ref, acc4_ref):
    j = pl.program_id(0)

    # ---- Layers 1 & 2 (tiny): run once, keep h2 resident in VMEM (bf16) ----
    # NOTE: acc4 zeroing must stay in this j==0 block, before the += below.
    @pl.when(j == 0)
    def _():
        h1 = jnp.dot(x_ref[...].astype(jnp.bfloat16), w1_ref[...],
                     preferred_element_type=jnp.float32)
        h1 = jnp.maximum(h1 + b1_ref[...], 0.0)
        h2 = jnp.dot(h1.astype(jnp.bfloat16), w2_ref[...],
                     preferred_element_type=jnp.float32)
        h2 = jnp.maximum(h2 + b2_ref[...], 0.0)
        h2_ref[...] = h2.astype(jnp.bfloat16)
        acc4_ref[...] = jnp.zeros_like(acc4_ref)

    # ---- Layer 3 column tile + layer-4 K-partial accumulation (pipelined) ----
    # w3_ref block is (1, 2048, tile_n): a contiguous slab of the re-laid-out W3.
    h3 = jnp.dot(h2_ref[...], w3_ref[0], preferred_element_type=jnp.float32)
    h3 = jnp.maximum(h3 + b3_ref[...], 0.0)
    acc4_ref[...] += jnp.dot(h3.astype(jnp.bfloat16), w4_ref[...],
                             preferred_element_type=jnp.float32)

    # ---- Layer 4 bias/ReLU + layer 5 head: only on the last grid step ----
    @pl.when(j == pl.num_programs(0) - 1)
    def _():
        h4 = jnp.maximum(acc4_ref[...] + b4_ref[...], 0.0)
        o_ref[...] = (jnp.dot(h4.astype(jnp.bfloat16), w5_ref[...],
                              preferred_element_type=jnp.float32)
                      + b5_ref[...])


def prepare_params(params, *, tile_n=512):
    """One-time weight prep (do NOT call per forward pass):
       - cast all weights to bf16 (biases stay f32),
       - re-layout W3 tile-contiguously as (n_tiles, 2048, tile_n)."""
    (w1, b1), (w2, b2), (w3, b3), (w4, b4), (w5, b5) = params
    k3, n3 = w3.shape
    assert n3 % tile_n == 0 and tile_n % 128 == 0
    n_tiles = n3 // tile_n
    w1, w2, w4, w5 = (w.astype(jnp.bfloat16) for w in (w1, w2, w4, w5))
    # Column tile j of W3 becomes the contiguous slab w3t[j].
    w3t = (w3.astype(jnp.bfloat16)
           .reshape(k3, n_tiles, tile_n)
           .transpose(1, 0, 2))                      # (n_tiles, 2048, tile_n)
    return ((w1, b1), (w2, b2), (w3t, b3), (w4, b4), (w5, b5))


def garch_parameter_nn(x, prepared):
    """x: (B, input_dim) f32; prepared: output of prepare_params."""
    B, D = x.shape
    (w1, b1), (w2, b2), (w3t, b3), (w4, b4), (w5, b5) = prepared
    n_tiles, k3, tile_n = w3t.shape
    grid = (n_tiles,)

    const = lambda j: (0, 0)
    in_specs = [
        pl.BlockSpec(x.shape, const),                               # x (resident)
        pl.BlockSpec(w1.shape, const), pl.BlockSpec(b1.shape, const),
        pl.BlockSpec(w2.shape, const), pl.BlockSpec(b2.shape, const),
        pl.BlockSpec((1, k3, tile_n), lambda j: (j, 0, 0)),         # W3 slab j
        pl.BlockSpec((1, tile_n), lambda j: (0, j)),                # b3 tile
        pl.BlockSpec((tile_n, w4.shape[1]), lambda j: (j, 0)),      # W4 row tile
        pl.BlockSpec(b4.shape, const),
        pl.BlockSpec(w5.shape, const), pl.BlockSpec(b5.shape, const),
    ]
    out_specs = pl.BlockSpec((B, 1), const)

    args = (x, w1, b1, w2, b2, w3t, b3, w4, b4, w5, b5)
    flops = 2 * B * (D * 128 + 128 * 2048 + 2048 * 2048 + 2048 * 128 + 128 * 1)
    bytes_accessed = sum(int(a.size) * a.dtype.itemsize for a in args) + B * 4

    return pl.pallas_call(
        mlp_kernel,
        out_shape=jax.ShapeDtypeStruct((B, 1), jnp.float32),
        grid_spec=pltpu.PrefetchScalarGridSpec(
            num_scalar_prefetch=0,
            grid=grid,
            in_specs=in_specs,
            out_specs=out_specs,
            scratch_shapes=[
                pltpu.VMEM((B, w2.shape[1]), jnp.bfloat16),   # h2  (B, 2048) bf16
                pltpu.VMEM((B, w4.shape[1]), jnp.float32),    # acc4 (B, 128) f32
            ],
        ),
        compiler_params=pltpu.CompilerParams(
            dimension_semantics=("arbitrary",),      # scratch carried across steps
            vmem_limit_bytes=48 << 20,               # fits v7x (64 MiB physical)
        ),
        cost_estimate=pl.CostEstimate(
            flops=flops, transcendentals=0, bytes_accessed=bytes_accessed),
    )(*args)


def init_params(key, input_dim):
    """Deterministic init mimicking nn.Linear default (U(-1/sqrt(fan_in), +))."""
    dims = [input_dim, 128, 2048, 2048, 128, 1]
    params = []
    for i in range(5):
        fan_in, fan_out = dims[i], dims[i + 1]
        key, kw, kb = jax.random.split(key, 3)
        bound = 1.0 / float(fan_in) ** 0.5
        w = jax.random.uniform(kw, (fan_in, fan_out), jnp.float32, -bound, bound)
        b = jax.random.uniform(kb, (1, fan_out), jnp.float32, -bound, bound)
        params.append((w, b))
    return params


def reference_forward(x, params):
    """Pure-JAX reference with the same bf16 weight/activation quantization
    and f32 accumulation the kernel uses."""
    h = x
    for i, (w, b) in enumerate(params):
        h = jnp.dot(h.astype(jnp.bfloat16), w.astype(jnp.bfloat16),
                    preferred_element_type=jnp.float32) + b
        if i < 4:
            h = jnp.maximum(h, 0.0)
    return h


if __name__ == "__main__":
    INPUT_DIM = 16
    BATCH = 8

    key = jax.random.PRNGKey(0)
    key, kx = jax.random.split(key)
    x = jax.random.normal(kx, (BATCH, INPUT_DIM), dtype=jnp.float32)
    params = init_params(key, INPUT_DIM)

    prepared = prepare_params(params, tile_n=512)      # one-time, out of hot path
    out = jax.block_until_ready(garch_parameter_nn(x, prepared))
    ref = reference_forward(x, params)

    assert out.shape == (BATCH, 1), out.shape
    err = float(jnp.max(jnp.abs(out - ref)))
    assert err < 1e-2, f"max abs err {err}"

    print("KERNEL_OK")
</pallas_src>

<mosaic_0001>
module attributes {stable_mosaic.version = 11 : i64} {
  func.func @mlp_kernel(%arg0: i32, %arg1: memref<8x16xf32, #tpu.memory_space<vmem>>, %arg2: memref<16x128xbf16, #tpu.memory_space<vmem>>, %arg3: memref<1x128xf32, #tpu.memory_space<vmem>>, %arg4: memref<128x2048xbf16, #tpu.memory_space<vmem>>, %arg5: memref<1x2048xf32, #tpu.memory_space<vmem>>, %arg6: memref<1x2048x512xbf16, #tpu.memory_space<vmem>>, %arg7: memref<1x512xf32, #tpu.memory_space<vmem>>, %arg8: memref<512x128xbf16, #tpu.memory_space<vmem>>, %arg9: memref<1x128xf32, #tpu.memory_space<vmem>>, %arg10: memref<128x1xbf16, #tpu.memory_space<vmem>>, %arg11: memref<1x1xf32, #tpu.memory_space<vmem>>, %arg12: memref<8x1xf32, #tpu.memory_space<vmem>>, %arg13: memref<8x2048xbf16, #tpu.memory_space<vmem>>, %arg14: memref<8x128xf32, #tpu.memory_space<vmem>>) attributes {dimension_semantics = [#tpu.dimension_semantics<arbitrary>], iteration_bounds = array<i64: 4>, scalar_prefetch = 0 : i64, scratch_operands = 2 : i64, tpu.core_type = #tpu.core_type<tc>, window_params = [{pipeline_mode = #tpu.pipeline_mode<synchronous>, transform_indices = @transform_0, window_bounds = array<i64: 8, 16>}, {pipeline_mode = #tpu.pipeline_mode<synchronous>, transform_indices = @transform_1, window_bounds = array<i64: 16, 128>}, {pipeline_mode = #tpu.pipeline_mode<synchronous>, transform_indices = @transform_2, window_bounds = array<i64: 1, 128>}, {pipeline_mode = #tpu.pipeline_mode<synchronous>, transform_indices = @transform_3, window_bounds = array<i64: 128, 2048>}, {pipeline_mode = #tpu.pipeline_mode<synchronous>, transform_indices = @transform_4, window_bounds = array<i64: 1, 2048>}, {transform_indices = @transform_5, window_bounds = array<i64: 1, 2048, 512>}, {transform_indices = @transform_6, window_bounds = array<i64: 1, 512>}, {transform_indices = @transform_7, window_bounds = array<i64: 512, 128>}, {pipeline_mode = #tpu.pipeline_mode<synchronous>, transform_indices = @transform_8, window_bounds = array<i64: 1, 128>}, {pipeline_mode = #tpu.pipeline_mode<synchronous>, transform_indices = @transform_9, window_bounds = array<i64: 128, 1>}, {pipeline_mode = #tpu.pipeline_mode<synchronous>, transform_indices = @transform_10, window_bounds = array<i64: 1, 1>}, {pipeline_mode = #tpu.pipeline_mode<synchronous>, transform_indices = @transform_11, window_bounds = array<i64: 8, 1>}]} {
    %c0_i32 = arith.constant 0 : i32
    %0 = arith.cmpi eq, %arg0, %c0_i32 : i32
    %1 = arith.extui %0 : i1 to i32
    %c0_i32_0 = arith.constant 0 : i32
    %2 = arith.cmpi ne, %1, %c0_i32_0 : i32
    scf.if %2 {
      %c0_16 = arith.constant 0 : index
      %c0_17 = arith.constant 0 : index
      %21 = vector.load %arg1[%c0_16, %c0_17] : memref<8x16xf32, #tpu.memory_space<vmem>>, vector<8x16xf32>
      %22 = arith.truncf %21 : vector<8x16xf32> to vector<8x16xbf16>
      %c0_18 = arith.constant 0 : index
      %c0_19 = arith.constant 0 : index
      %23 = vector.load %arg2[%c0_18, %c0_19] : memref<16x128xbf16, #tpu.memory_space<vmem>>, vector<16x128xbf16>
      %cst_20 = arith.constant dense<0.000000e+00> : vector<8x128xf32>
      %24 = tpu.matmul %22, %23, %cst_20 {dimension_numbers = #tpu.dot_dimension_numbers<[1], [0], [0], [1], [0, 0, 1, 1], [], []>} : vector<8x16xbf16>, vector<16x128xbf16>, vector<8x128xf32> -> vector<8x128xf32>
      %c0_21 = arith.constant 0 : index
      %c0_22 = arith.constant 0 : index
      %25 = vector.load %arg3[%c0_21, %c0_22] : memref<1x128xf32, #tpu.memory_space<vmem>>, vector<1x128xf32>
      %26 = vector.broadcast %25 : vector<1x128xf32> to vector<8x128xf32>
      %27 = arith.addf %24, %26 : vector<8x128xf32>
      %cst_23 = arith.constant 0.000000e+00 : f32
      %28 = vector.broadcast %cst_23 : f32 to vector<8x128xf32>
      %29 = arith.maximumf %27, %28 : vector<8x128xf32>
      %30 = arith.truncf %29 : vector<8x128xf32> to vector<8x128xbf16>
      %c0_24 = arith.constant 0 : index
      %c0_25 = arith.constant 0 : index
      %31 = vector.load %arg4[%c0_24, %c0_25] : memref<128x2048xbf16, #tpu.memory_space<vmem>>, vector<128x2048xbf16>
      %cst_26 = arith.constant dense<0.000000e+00> : vector<8x2048xf32>
      %32 = tpu.matmul %30, %31, %cst_26 {dimension_numbers = #tpu.dot_dimension_numbers<[1], [0], [0], [1], [0, 0, 1, 1], [], []>} : vector<8x128xbf16>, vector<128x2048xbf16>, vector<8x2048xf32> -> vector<8x2048xf32>
      %c0_27 = arith.constant 0 : index
      %c0_28 = arith.constant 0 : index
      %33 = vector.load %arg5[%c0_27, %c0_28] : memref<1x2048xf32, #tpu.memory_space<vmem>>, vector<1x2048xf32>
      %34 = vector.broadcast %33 : vector<1x2048xf32> to vector<8x2048xf32>
      %35 = arith.addf %32, %34 : vector<8x2048xf32>
      %cst_29 = arith.constant 0.000000e+00 : f32
      %36 = vector.broadcast %cst_29 : f32 to vector<8x2048xf32>
      %37 = arith.maximumf %35, %36 : vector<8x2048xf32>
      %38 = arith.truncf %37 : vector<8x2048xf32> to vector<8x2048xbf16>
      %c0_30 = arith.constant 0 : index
      %c0_31 = arith.constant 0 : index
      %39 = vector.load %arg13[%c0_30, %c0_31] : memref<8x2048xbf16, #tpu.memory_space<vmem>>, vector<8x2048xbf16>
      tpu.vector_store %arg13[%c0_30, %c0_31], %38 {strides = array<i32>} : memref<8x2048xbf16, #tpu.memory_space<vmem>>, vector<8x2048xbf16>,
      %cst_32 = arith.constant 0.000000e+00 : f32
      %40 = vector.broadcast %cst_32 : f32 to vector<8x128xf32>
      %c0_33 = arith.constant 0 : index
      %c0_34 = arith.constant 0 : index
      %41 = vector.load %arg14[%c0_33, %c0_34] : memref<8x128xf32, #tpu.memory_space<vmem>>, vector<8x128xf32>
      tpu.vector_store %arg14[%c0_33, %c0_34], %40 {strides = array<i32>} : memref<8x128xf32, #tpu.memory_space<vmem>>, vector<8x128xf32>,
    } else {
    }
    %c0 = arith.constant 0 : index
    %c0_1 = arith.constant 0 : index
    %3 = vector.load %arg13[%c0, %c0_1] : memref<8x2048xbf16, #tpu.memory_space<vmem>>, vector<8x2048xbf16>
    %c0_2 = arith.constant 0 : index
    %c0_3 = arith.constant 0 : index
    %c0_4 = arith.constant 0 : index
    %4 = vector.load %arg6[%c0_2, %c0_3, %c0_4] : memref<1x2048x512xbf16, #tpu.memory_space<vmem>>, vector<1x2048x512xbf16>
    %5 = vector.shape_cast %4 : vector<1x2048x512xbf16> to vector<2048x512xbf16>
    %cst = arith.constant dense<0.000000e+00> : vector<8x512xf32>
    %6 = tpu.matmul %3, %5, %cst {dimension_numbers = #tpu.dot_dimension_numbers<[1], [0], [0], [1], [0, 0, 1, 1], [], []>} : vector<8x2048xbf16>, vector<2048x512xbf16>, vector<8x512xf32> -> vector<8x512xf32>
    %c0_5 = arith.constant 0 : index
    %c0_6 = arith.constant 0 : index
    %7 = vector.load %arg7[%c0_5, %c0_6] : memref<1x512xf32, #tpu.memory_space<vmem>>, vector<1x512xf32>
    %8 = vector.broadcast %7 : vector<1x512xf32> to vector<8x512xf32>
    %9 = arith.addf %6, %8 : vector<8x512xf32>
    %cst_7 = arith.constant 0.000000e+00 : f32
    %10 = vector.broadcast %cst_7 : f32 to vector<8x512xf32>
    %11 = arith.maximumf %9, %10 : vector<8x512xf32>
    %c0_8 = arith.constant 0 : index
    %c0_9 = arith.constant 0 : index
    %12 = vector.load %arg14[%c0_8, %c0_9] : memref<8x128xf32, #tpu.memory_space<vmem>>, vector<8x128xf32>
    %13 = arith.truncf %11 : vector<8x512xf32> to vector<8x512xbf16>
    %c0_10 = arith.constant 0 : index
    %c0_11 = arith.constant 0 : index
    %14 = vector.load %arg8[%c0_10, %c0_11] : memref<512x128xbf16, #tpu.memory_space<vmem>>, vector<512x128xbf16>
    %cst_12 = arith.constant dense<0.000000e+00> : vector<8x128xf32>
    %15 = tpu.matmul %13, %14, %cst_12 {dimension_numbers = #tpu.dot_dimension_numbers<[1], [0], [0], [1], [0, 0, 1, 1], [], []>} : vector<8x512xbf16>, vector<512x128xbf16>, vector<8x128xf32> -> vector<8x128xf32>
    %16 = arith.addf %12, %15 : vector<8x128xf32>
    %c0_13 = arith.constant 0 : index
    %c0_14 = arith.constant 0 : index
    %17 = vector.load %arg14[%c0_13, %c0_14] : memref<8x128xf32, #tpu.memory_space<vmem>>, vector<8x128xf32>
    tpu.vector_store %arg14[%c0_13, %c0_14], %16 {strides = array<i32>} : memref<8x128xf32, #tpu.memory_space<vmem>>, vector<8x128xf32>,
    %c3_i32 = arith.constant 3 : i32
    %18 = arith.cmpi eq, %arg0, %c3_i32 : i32
    %19 = arith.extui %18 : i1 to i32
    %c0_i32_15 = arith.constant 0 : i32
    %20 = arith.cmpi ne, %19, %c0_i32_15 : i32
    scf.if %20 {
      %c0_16 = arith.constant 0 : index
      %c0_17 = arith.constant 0 : index
      %21 = vector.load %arg14[%c0_16, %c0_17] : memref<8x128xf32, #tpu.memory_space<vmem>>, vector<8x128xf32>
      %c0_18 = arith.constant 0 : index
      %c0_19 = arith.constant 0 : index
      %22 = vector.load %arg9[%c0_18, %c0_19] : memref<1x128xf32, #tpu.memory_space<vmem>>, vector<1x128xf32>
      %23 = vector.broadcast %22 : vector<1x128xf32> to vector<8x128xf32>
      %24 = arith.addf %21, %23 : vector<8x128xf32>
      %cst_20 = arith.constant 0.000000e+00 : f32
      %25 = vector.broadcast %cst_20 : f32 to vector<8x128xf32>
      %26 = arith.maximumf %24, %25 : vector<8x128xf32>
      %27 = arith.truncf %26 : vector<8x128xf32> to vector<8x128xbf16>
      %c0_21 = arith.constant 0 : index
      %c0_22 = arith.constant 0 : index
      %28 = vector.load %arg10[%c0_21, %c0_22] : memref<128x1xbf16, #tpu.memory_space<vmem>>, vector<128x1xbf16>
      %cst_23 = arith.constant dense<0.000000e+00> : vector<8x1xf32>
      %29 = tpu.matmul %27, %28, %cst_23 {dimension_numbers = #tpu.dot_dimension_numbers<[1], [0], [0], [1], [0, 0, 1, 1], [], []>} : vector<8x128xbf16>, vector<128x1xbf16>, vector<8x1xf32> -> vector<8x1xf32>
      %c0_24 = arith.constant 0 : index
      %c0_25 = arith.constant 0 : index
      %30 = vector.load %arg11[%c0_24, %c0_25] : memref<1x1xf32, #tpu.memory_space<vmem>>, vector<1x1xf32>
      %31 = vector.broadcast %30 : vector<1x1xf32> to vector<8x1xf32>
      %32 = arith.addf %29, %31 : vector<8x1xf32>
      %c0_26 = arith.constant 0 : index
      %c0_27 = arith.constant 0 : index
      %33 = vector.load %arg12[%c0_26, %c0_27] : memref<8x1xf32, #tpu.memory_space<vmem>>, vector<8x1xf32>
      tpu.vector_store %arg12[%c0_26, %c0_27], %32 {strides = array<i32>} : memref<8x1xf32, #tpu.memory_space<vmem>>, vector<8x1xf32>,
    } else {
    }
    return
  }
  func.func @transform_0(%arg0: i32) -> (i32, i32) {
    %c0_i32 = arith.constant 0 : i32
    %c0_i32_0 = arith.constant 0 : i32
    %c0_i32_1 = arith.constant 0 : i32
    return %c0_i32, %c0_i32_0 : i32, i32
  }
  func.func @transform_1(%arg0: i32) -> (i32, i32) {
    %c0_i32 = arith.constant 0 : i32
    %c0_i32_0 = arith.constant 0 : i32
    %c0_i32_1 = arith.constant 0 : i32
    return %c0_i32, %c0_i32_0 : i32, i32
  }
  func.func @transform_2(%arg0: i32) -> (i32, i32) {
    %c0_i32 = arith.constant 0 : i32
    %c0_i32_0 = arith.constant 0 : i32
    %c0_i32_1 = arith.constant 0 : i32
    return %c0_i32, %c0_i32_0 : i32, i32
  }
  func.func @transform_3(%arg0: i32) -> (i32, i32) {
    %c0_i32 = arith.constant 0 : i32
    %c0_i32_0 = arith.constant 0 : i32
    %c0_i32_1 = arith.constant 0 : i32
    return %c0_i32, %c0_i32_0 : i32, i32
  }
  func.func @transform_4(%arg0: i32) -> (i32, i32) {
    %c0_i32 = arith.constant 0 : i32
    %c0_i32_0 = arith.constant 0 : i32
    %c0_i32_1 = arith.constant 0 : i32
    return %c0_i32, %c0_i32_0 : i32, i32
  }
  func.func @transform_5(%arg0: i32) -> (i32, i32, i32) {
    %c0_i32 = arith.constant 0 : i32
    %c0_i32_0 = arith.constant 0 : i32
    %c0_i32_1 = arith.constant 0 : i32
    return %arg0, %c0_i32, %c0_i32_0 : i32, i32, i32
  }
  func.func @transform_6(%arg0: i32) -> (i32, i32) {
    %c0_i32 = arith.constant 0 : i32
    %c0_i32_0 = arith.constant 0 : i32
    return %c0_i32, %arg0 : i32, i32
  }
  func.func @transform_7(%arg0: i32) -> (i32, i32) {
    %c0_i32 = arith.constant 0 : i32
    %c0_i32_0 = arith.constant 0 : i32
    return %arg0, %c0_i32 : i32, i32
  }
  func.func @transform_8(%arg0: i32) -> (i32, i32) {
    %c0_i32 = arith.constant 0 : i32
    %c0_i32_0 = arith.constant 0 : i32
    %c0_i32_1 = arith.constant 0 : i32
    return %c0_i32, %c0_i32_0 : i32, i32
  }
  func.func @transform_9(%arg0: i32) -> (i32, i32) {
    %c0_i32 = arith.constant 0 : i32
    %c0_i32_0 = arith.constant 0 : i32
    %c0_i32_1 = arith.constant 0 : i32
    return %c0_i32, %c0_i32_0 : i32, i32
  }
  func.func @transform_10(%arg0: i32) -> (i32, i32) {
    %c0_i32 = arith.constant 0 : i32
    %c0_i32_0 = arith.constant 0 : i32
    %c0_i32_1 = arith.constant 0 : i32
    return %c0_i32, %c0_i32_0 : i32, i32
  }
  func.func @transform_11(%arg0: i32) -> (i32, i32) {
    %c0_i32 = arith.constant 0 : i32
    %c0_i32_0 = arith.constant 0 : i32
    %c0_i32_1 = arith.constant 0 : i32
    return %c0_i32, %c0_i32_0 : i32, i32
  }
}

</mosaic_0001>

<bundles_post_ra>
// kernel: tpu_custom_call.1
= control target key start
LH: loop header
LB: loop body
LE: loop exit
PB: predicated region body
PF: predicated region fallthrough
CT: control target
= control target key end

     0   :  { %s11615_s0 = inlined_call_operand.hbm [shape: f32[8,16], index: 0, kind: input, shape index: {}]   ;;  %s11616_s1 = inlined_call_operand.hbm [shape: bf16[16,128], index: 1, kind: input, shape index: {}]   ;;  %s11617_s2 = inlined_call_operand.hbm [shape: f32[1,128], index: 2, kind: input, shape index: {}]   ;;  %s11618_s3 = inlined_call_operand.hbm [shape: bf16[128,2048], index: 3, kind: input, shape index: {}]   ;;  %s11619_s4 = inlined_call_operand.hbm [shape: f32[1,2048], index: 4, kind: input, shape index: {}]   ;;  %s11620_s5 = inlined_call_operand.hbm [shape: bf16[4,2048,512], index: 5, kind: input, shape index: {}]   ;;  %s11621_s6 = inlined_call_operand.hbm [shape: f32[1,2048], index: 6, kind: input, shape index: {}]   ;;  %s11622_s7 = inlined_call_operand.hbm [shape: bf16[2048,128], index: 7, kind: input, shape index: {}]   ;;  %s11623_s8 = inlined_call_operand.hbm [shape: f32[1,128], index: 8, kind: input, shape index: {}]   ;;  %s11624_s9 = inlined_call_operand.vmem [shape: bf16[128,1], index: 9, kind: input, shape index: {}]   ;;  %s11625_s10 = inlined_call_operand.<no memory space> [shape: f32[1,1], index: 10, kind: input, shape index: {}]   ;;  %s11626_s11 = inlined_call_operand.vmem [shape: f32[8,1], index: 11, kind: output, shape index: {}]  }
   0x1   :  { %11631 = sst [smem:[#allocation27_spill]] %s11615_s0  ;;  %v16_v0 = vstv %s11625_s10 }
   0x2   :  { %11632 = sst [smem:[#allocation28_spill]] %s11616_s1  ;;  %17 = vst [vmem:[#allocation4] sm:$0x1] %v16_v0 }
   0x3   :  { %11633 = sst [smem:[#allocation29_spill]] %s11618_s3 }
   0x4   :  { %11634 = sst [smem:[#allocation30_spill]] %s11620_s5 }
   0x5   :  { %11635 = sst [smem:[#allocation31_spill]] %s11623_s8 }
   0x6   :  { %18 = vsyncpa [#allocation6], 0 }
   0x7   :  { %19 = vsyncpa [#allocation8], 0 }
   0x8   :  { %20 = vsyncpa [#allocation11], 0 }
   0x9   :  { %21 = vsyncpa [#allocation14], 0 }
   0xa   :  { %23 = vsyncpa [#allocation14 + $0x1], 0 }
   0xb   :  { %24 = vsyncpa [#allocation17], 0 }
   0xc   :  { %26 = vsyncpa [#allocation17 + $0x1], 0  ;;  %s10144_s19 = smov 0   ;;  %s10146_s20 = smov 0  }
   0xd   :  { %s10148_s21 = smov 0   ;;  %s10150_s22 = smov 0  }
   0xe LB: > { %11636 = sst [smem:[#allocation25_spill]] %s10063_s21  ;;  %s10168_s25 = sadd.s32 4294967295, %s10067_s22   ;;  %s10067_s22 = sphi %s10150_s22, %s11654_s22   ;;  %s10063_s21 = sphi %s10148_s21, %s11651_s21   ;;  %s10059_s20 = sphi %s10146_s20, %s11653_s20   ;;  %s10055_s19 = sphi %s10144_s19, %s11652_s19  }
   0xf   : > { %s11637_s1 = sld [smem:[#allocation28_spill]]  ;;  %p6184_p0 = scmp.ge.s32.totalorder %s10067_s22, 1 }
  0x10   : > { %p158_p1 = scmp.eq.s32.totalorder %s10168_s25, 0  ;;  %p304_p2 = scmp.lt.s32.totalorder %s10067_s22, 5 }
  0x11   : > { %p6185_p3 = scmp.ne.s32.totalorder %s10168_s25, 0  ;;  %s10069_s27 = smov [#allocation7]  }
  0x12   : > { %p10174_p4 = pnand %p6184_p0, %p304_p2  ;;  %s329_s28 = sshll.u32 %s10069_s27, 4  ;;  %s330_s28 = int_to_ptr.vmem [resolvable:$true] %s329_s28 }
  0x13   : > { %s11639_s3 = sld [smem:[#allocation29_spill]]  ;;  %s10070_s14 = smov [#allocation10]  }
  0x14   : > { %p9652_p5 = pneg %p10174_p4  ;;  %s355_s15 = sshll.u32 %s10070_s14, 4  ;;  %s356_s15 = int_to_ptr.vmem [resolvable:$true] %s355_s15 }
  0x15   : > { %s327_s24 = sshll.u32 %s11637_s1, 4  ;;  %s11627_s16 = smov 64   ;;  %s328_s24 = int_to_ptr.hbm [resolvable:$true] %s327_s24 }
  0x16   : > { %p10185_p6 = pnand %p9652_p5, %p158_p1  ;;  %s11628_s17 = smov 4  }
  0x17   : > { %s11641_s8 = sld [smem:[#allocation31_spill]]  ;;  %s10073_s27 = smov 1024  }
  0x18   : > { %9658 = dma.hbm_to_vmem [thread:$0]  (!%p10185_p6), %s328_s24, 128, %s330_s28, [#allocation8], %s11627_s16, %s11627_s16, %s11628_s17  }
  0x19   : > { %s353_s12 = sshll.u32 %s11639_s3, 4  ;;  %s10074_s29 = smov [#allocation18]   ;;  %s354_s12 = int_to_ptr.hbm [resolvable:$true] %s353_s12 }
  0x1a   : > { %9664 = dma.hbm_to_vmem [thread:$0]  (!%p10185_p6), %s354_s12, 16384, %s356_s15, [#allocation11], %s10073_s27, %s10073_s27, %s11627_s16  }
  0x1b   : > { %s382_s30 = sshll.u32 %s10074_s29, 4  ;;  %s10203_s24 = sadd.s32 1, %s10067_s22   ;;  %s383_s30 = int_to_ptr.vmem [resolvable:$true] %s382_s30 }
  0x1c   : > { %s144_s28 = sadd.s32 1, %s10063_s21  ;;  %s141_s14 = ssub.s32 %s10067_s22, %s10203_s24 }
  0x1d   : > { %s380_s23 = sshll.u32 %s11641_s8, 4  ;;  %p151_p7 = scmp.ne.s32.totalorder %s10063_s21, %s10059_s20  ;;  %s381_s23 = int_to_ptr.hbm [resolvable:$true] %s380_s23 }
  0x1e   : > { %9670 = dma.hbm_to_vmem [thread:$0]  (!%p10185_p6), %s381_s23, 16, %s383_s30, [#allocation17]  }
  0x1f   : > { %p142_p8 = scmp.eq.s32.totalorder %s141_s14, 0  ;;  %p152_p9 = scmp.eq.s32.totalorder %s10067_s22, 0 }
  0x20   : > { %p157_p10 = scmp.ne.s32.totalorder %s10059_s20, %s10055_s19  ;;  %p9687_p11 = scmp.lt.s32.totalorder %s10067_s22, 4 }
  0x21   : > { %s10215_s12 = scalar_select %p142_p8, %s10063_s21, %s144_s28  }
  0x22   : > { %p153_p12 = por %p152_p9, %p151_p7  ;;  %p10219_p13 = por %p158_p1, %p157_p10 }
  0x23   : > { %11642 = sst [smem:[#allocation26_spill]] %s10215_s12  ;;  %s11629_s18 = sand.u32 1, %s10067_s22  }
  0x24   : > { %s10225_s10 = sand.u32 1, %s10063_s21   ;;  %s8939_s27 = sshll.u32 %s10067_s22, 12 }
  0x25   : > { %s6192_s23 = sshll.u32 %s10225_s10, 12  ;;  %s11644_s5 = sld [smem:[#allocation30_spill]] }
  0x26   : > { %s403_s14 = scalar_lea.vmem [#allocation13], %s6192_s23  ;;  %p10234_p0 = pnand %p9687_p11, %p153_p12 }
  0x27   : > { %s411_s16 = sshll.u32 %s403_s14, 4  ;;  %s10240_s1 = scalar_lea.sflag [#allocation14], %s11629_s18  ;;  %s412_s16 = int_to_ptr.vmem [resolvable:$true] %s411_s16 }
  0x28   : > { %p9837_p5 = pneg %p10234_p0 }
  0x2b   : > { %s408_s19 = scalar_lea.hbm %s11644_s5, %s8939_s27  ;;  %s9840_s29 = scalar_lea.hbm %s11644_s5, 16384 }
  0x2c   : > { %s409_s28 = sshll.u32 %s408_s19, 4  ;;  %s410_s28 = int_to_ptr.hbm [resolvable:$true] %s409_s28 }
  0x2d   : > { %s9833_s3 = sshra.s32 %s410_s28, 4  ;;  %s9834_s3 = int_to_ptr.hbm [resolvable:$true] %s9833_s3 }
  0x2e   : > { %s9835_s8 = scalar_lea.hbm %s9834_s3, 4096  ;;  %p9841_p9 = scmp.lt.s32.totalorder %s9834_s3, %s11644_s5 }
  0x2f   : > { %p9836_p2 = scmp.ne.s32.totalorder %s9834_s3, %s9835_s8  ;;  %p9842_p10 = scmp.lt.s32.totalorder %s9840_s29, %s9835_s8 }
  0x31   : > { %p9838_p7 = pnand %p9837_p5, %p9836_p2  ;;  %p9843_p11 = por %p9842_p10, %p9841_p9 }
  0x33   : > { %p9839_p8 = pneg %p9838_p7 }
  0x35   : > { %p9844_p12 = pnand %p9843_p11, %p9839_p8 }
  0x37   : > { %9847 = shalt.err (!%p9844_p12)
}
  0x38   : > { %s10075_s14 = smov 256   ;;  %s10076_s18 = smov 16  }
  0x39   : > { %9674 = dma.hbm_to_vmem [thread:$0]  (!%p10234_p0), %s410_s28, 65536, %s412_s16, %s10240_s1, %s10075_s14, %s10075_s14, %s10076_s18  }
  0x3a   : > { %s11646_s0 = sld [smem:[#allocation27_spill]]  ;;  %s10077_s30 = smov [#allocation5]  }
  0x3b   : > { %s318_s3 = sshll.u32 %s10077_s30, 4  ;;  %s342_s19 = sshll.u32 %s11617_s2, 4  ;;  %s319_s3 = int_to_ptr.vmem [resolvable:$true] %s318_s3  ;;  %s343_s19 = int_to_ptr.hbm [resolvable:$true] %s342_s19 }
  0x3c   : > { %s10078_s5 = smov [#allocation9]   ;;  %s368_s12 = sshll.u32 %s11619_s4, 4  ;;  %s369_s12 = int_to_ptr.hbm [resolvable:$true] %s368_s12 }
  0x3d   : > { %s344_s21 = sshll.u32 %s10078_s5, 4  ;;  %s6195_s28 = sshll.u32 %s10225_s10, 2  ;;  %s345_s21 = int_to_ptr.vmem [resolvable:$true] %s344_s21 }
  0x3e   : > { %9661 = dma.hbm_to_vmem [thread:$0]  (!%p10185_p6), %s343_s19, 16, %s345_s21, [#allocation8]  }
  0x3f   : > { %s10079_s14 = smov [#allocation12]   ;;  %s6196_s30 = sshll.u32 %s10067_s22, 2 }
  0x40   : > { %s316_s27 = sshll.u32 %s11646_s0, 4  ;;  %s370_s23 = sshll.u32 %s10079_s14, 4  ;;  %s317_s27 = int_to_ptr.hbm [resolvable:$true] %s316_s27  ;;  %s371_s23 = int_to_ptr.vmem [resolvable:$true] %s370_s23 }
  0x41   : > { %9655 = dma.hbm_to_vmem [thread:$0]  (!%p10185_p6), %s317_s27, 128, %s319_s3, [#allocation6]  }
  0x42   : > { %9667 = dma.hbm_to_vmem [thread:$0]  (!%p10185_p6), %s369_s12, 256, %s371_s23, [#allocation11]  }
  0x43   : > { %s429_s5 = scalar_lea.hbm %s11621_s6, %s6196_s30  ;;  %s425_s8 = scalar_lea.vmem [#allocation15], %s6195_s28 }
  0x44   : > { %s433_s29 = sshll.u32 %s425_s8, 4  ;;  %s431_s16 = sshll.u32 %s429_s5, 4  ;;  %s434_s29 = int_to_ptr.vmem [resolvable:$true] %s433_s29  ;;  %s432_s16 = int_to_ptr.hbm [resolvable:$true] %s431_s16 }
  0x45   : > { %s6197_s18 = sshll.u32 %s10225_s10, 8  ;;  %s9953_s0 = sshra.s32 %s432_s16, 4  ;;  %s9954_s0 = int_to_ptr.hbm [resolvable:$true] %s9953_s0 }
  0x46   : > { %s9955_s21 = scalar_lea.hbm %s9954_s0, 4  ;;  %s9960_s12 = scalar_lea.hbm %s11621_s6, 16 }
  0x47   : > { %p9956_p2 = scmp.ne.s32.totalorder %s9954_s0, %s9955_s21  ;;  %p9961_p6 = scmp.lt.s32.totalorder %s9954_s0, %s11621_s6 }
  0x48   : > { %p9962_p9 = scmp.lt.s32.totalorder %s9960_s12, %s9955_s21 }
  0x49   : > { %p9958_p7 = pnand %p9956_p2, %p9837_p5 }
  0x4a   : > { %p9963_p10 = por %p9962_p9, %p9961_p6 }
  0x4b   : > { %p9959_p8 = pneg %p9958_p7 }
  0x4d   : > { %p9964_p11 = pnand %p9963_p10, %p9959_p8 }
  0x4f   : > { %9967 = shalt.err (!%p9964_p11)
}
  0x50   : > { %9677 = dma.hbm_to_vmem [thread:$0]  (!%p10234_p0), %s432_s16, 64, %s434_s29, %s10240_s1  }
  0x51   : > { %s8940_s10 = sshll.u32 %s10067_s22, 8  ;;  %s444_s3 = scalar_lea.vmem [#allocation16], %s6197_s18 }
  0x52   : > { %s449_s27 = scalar_lea.hbm %s11622_s7, %s8940_s10  ;;  %s452_s5 = sshll.u32 %s444_s3, 4  ;;  %s453_s5 = int_to_ptr.vmem [resolvable:$true] %s452_s5 }
  0x53   : > { %s450_s8 = sshll.u32 %s449_s27, 4  ;;  %s11647_s0 = sand.u32 1, %s10067_s22   ;;  %s451_s8 = int_to_ptr.hbm [resolvable:$true] %s450_s8 }
  0x54   : > { %s441_s21 = scalar_lea.sflag [#allocation17], %s11647_s0  ;;  %s9983_s13 = sshra.s32 %s451_s8, 4  ;;  %s9984_s13 = int_to_ptr.hbm [resolvable:$true] %s9983_s13 }
  0x55   : > { %s9985_s19 = scalar_lea.hbm %s9984_s13, 256  ;;  %s9990_s16 = scalar_lea.hbm %s11622_s7, 1024 }
  0x56   : > { %p9986_p12 = scmp.ne.s32.totalorder %s9984_s13, %s9985_s19  ;;  %p9991_p8 = scmp.lt.s32.totalorder %s9984_s13, %s11622_s7 }
  0x57   : > { %p9992_p6 = scmp.lt.s32.totalorder %s9990_s16, %s9985_s19 }
  0x58   : > { %p9988_p2 = pnand %p9986_p12, %p9837_p5 }
  0x59   : > { %p9993_p9 = por %p9992_p6, %p9991_p8 }
  0x5a   : > { %p9989_p7 = pneg %p9988_p2 }
  0x5c   : > { %p9994_p10 = pnand %p9993_p9, %p9989_p7 }
  0x5e   : > { %9997 = shalt.err (!%p9994_p10)
}
  0x5f   : > { %s11648_s22 = smov 4   ;;  %s11649_s14 = smov 64  }
  0x60   : > { %9680 = dma.hbm_to_vmem [thread:$0]  (!%p10234_p0), %s451_s8, 4096, %s453_s5, %s441_s21, %s11649_s14, %s11649_s14, %s11648_s22  }
  0x61   : > { %464 = sbr.rel (%p10174_p4) target bundleno = 1427 (0x593), region = 64 }
  0x66   : > { %10030 = dma.done.wait (%p158_p1), [#allocation6], 128  }
  0x67   : > { %10032 = vsyncadd (%p158_p1), [#allocation6], 4294967168 }
  0x68   : > { %10034 = dma.done.wait (%p158_p1), [#allocation8], 144  }
  0x69   : > { %10036 = vsyncadd (%p158_p1), [#allocation8], 4294967152 }
  0x6a   : > { %10038 = dma.done.wait (%p158_p1), [#allocation11], 16640  }
  0x6b   : > { %10040 = vsyncadd (%p158_p1), [#allocation11], 4294950656  ;;  %s491_s26 = sand.u32 1, %s10168_s25   ;;  %s493_s17 = sand.u32 1, %s10059_s20  }
  0x6c   : > { %s6206_s23 = sshll.u32 %s493_s17, 12  ;;  %s492_s10 = scalar_lea.sflag [#allocation14], %s491_s26 }
  0x6d   : > { %s10325_s28 = scalar_lea.vmem [#allocation13], %s6206_s23 }
  0x6e   : > { %10042 = dma.done.wait (%p10219_p13), %s492_s10, 65600  }
  0x6f   : > { %10044 = vsyncadd (%p10219_p13), %s492_s10, 4294901696  ;;  %s6207_s30 = sshll.u32 %s493_s17, 2  ;;  %s6208_s27 = sshll.u32 %s493_s17, 8 }
  0x70   : > { %s10331_s3 = scalar_lea.vmem [#allocation15], %s6207_s30  ;;  %s512_s5 = scalar_lea.sflag [#allocation17], %s491_s26 }
  0x71   : > { %s10333_s8 = scalar_lea.vmem [#allocation16], %s6208_s27 }
  0x72   : > { %10046 = dma.done.wait (%p10219_p13), %s512_s5, 4096  }
  0x73   : > { %10048 = vsyncadd (%p10219_p13), %s512_s5, 4294963200 }
  0x74   : > { %10050 = dma.done.wait (%p158_p1), [#allocation17], 16  }
  0x75   : > { %10052 = vsyncadd (%p158_p1), [#allocation17], 4294967280  ;;  %571 = sbr.rel (%p6185_p3) target bundleno = 464 (0x1d0), region = 104 }
  0x7a   : > { %v8941_v1 = vld [vmem:[#allocation7] sm:$0xff]  ;;  %v572_v2 = vld [vmem:[#allocation5] sm:$0xff]  ;;  %vm586_vm0 = vcmask 130048   ;;  %v6666_v3 = vld [vmem:[#allocation10 + $0x380] sm:$0xf] }
  0x7b   : > { %v573_v4 = vpack.c.bf16 %v572_v2, %v572_v2  ;;  %v9062_v5 = vld [vmem:[#allocation10 + $0x3bc] sm:$0xf0]  ;;  %v9054_v6 = vld [vmem:[#allocation10 + $0x384] sm:$0xf]  ;;  %597 = vmatpush.bf16.msra.mxu0 %v8941_v1  ;;  %v6674_v10 = vld [vmem:[#allocation10 + $0x388] sm:$0xf] }
  0x7c   : > { %v6668_v7 = vld [vmem:[#allocation10 + $0x3c0] sm:$0xf0]  ;;  %v6667_v8 = vor.u32 %v9062_v5, %v6666_v3  ;;  %v9063_v11 = vld [vmem:[#allocation10 + $0x3c4] sm:$0xf0]  ;;  %v9055_v12 = vld [vmem:[#allocation10 + $0x38c] sm:$0xf] }
  0x7d   : > { %v6671_v9 = vor.u32 %v9054_v6, %v6668_v7  ;;  %v6675_v13 = vor.u32 %v9063_v11, %v6674_v10  ;;  %v6676_v14 = vld [vmem:[#allocation10 + $0x3c8] sm:$0xf0]  ;;  %v6602_v15 = vld [vmem:[#allocation10 + $0x300] sm:$0xf]  ;;  %v9038_v19 = vld [vmem:[#allocation10 + $0x304] sm:$0xf] }
  0x7e   : > { %v9046_v16 = vld [vmem:[#allocation10 + $0x33c] sm:$0xf0]  ;;  %1409 = vmatpush.bf16.msra.mxu1 %v6667_v8  ;;  %v6679_v17 = vor.u32 %v9055_v12, %v6676_v14  ;;  %v6604_v20 = vld [vmem:[#allocation10 + $0x340] sm:$0xf0]  ;;  %v6610_v21 = vld [vmem:[#allocation10 + $0x308] sm:$0xf]  ;;  %6215 = vmatmul.msk.bf16.vlgmr.msra.gmra.mxu0 %vm586_vm0, %v573_v4 }
  0x7f   : > { %1422 = vmatpush.bf16.msra.mxu2 %v6671_v9  ;;  %v6603_v18 = vor.u32 %v9046_v16, %v6602_v15  ;;  %1435 = vmatpush.bf16.msra.mxu3 %v6675_v13  ;;  %v6607_v22 = vor.u32 %v9038_v19, %v6604_v20  ;;  %v9047_v23 = vld [vmem:[#allocation10 + $0x344] sm:$0xf0]  ;;  %v9039_v24 = vld [vmem:[#allocation10 + $0x30c] sm:$0xf]  ;;  %v6538_v28 = vld [vmem:[#allocation10 + $0x280] sm:$0xf] }
  0x80   : > { %v6612_v25 = vld [vmem:[#allocation10 + $0x348] sm:$0xf0]  ;;  %1448 = vmatpush.bf16.msrb.mxu0 %v6679_v17  ;;  %v6611_v26 = vor.u32 %v9047_v23, %v6610_v21  ;;  %v9030_v29 = vld [vmem:[#allocation10 + $0x2bc] sm:$0xf0]  ;;  %v9022_v30 = vld [vmem:[#allocation10 + $0x284] sm:$0xf] }
  0x81   : > { %v6615_v27 = vor.u32 %v9039_v24, %v6612_v25  ;;  %v6540_v31 = vld [vmem:[#allocation10 + $0x2c0] sm:$0xf0]  ;;  %v6546_v32 = vld [vmem:[#allocation10 + $0x288] sm:$0xf]  ;;  %v6539_v34 = vor.u32 %v9030_v29, %v6538_v28  ;;  %v9023_v36 = vld [vmem:[#allocation10 + $0x28c] sm:$0xf] }
  0x82   : > { %v9031_v33 = vld [vmem:[#allocation10 + $0x2c4] sm:$0xf0]  ;;  %1410 = vmatpush.bf16.msra.mxu1 %v6603_v18  ;;  %v6543_v35 = vor.u32 %v9022_v30, %v6540_v31  ;;  %v6548_v37 = vld [vmem:[#allocation10 + $0x2c8] sm:$0xf0]  ;;  %v6474_v38 = vld [vmem:[#allocation10 + $0x200] sm:$0xf] }
  0x83   : > { %1423 = vmatpush.bf16.msra.mxu2 %v6607_v22  ;;  %1436 = vmatpush.bf16.msra.mxu3 %v6611_v26  ;;  %v6547_v39 = vor.u32 %v9031_v33, %v6546_v32  ;;  %v9014_v40 = vld [vmem:[#allocation10 + $0x23c] sm:$0xf0]  ;;  %v9006_v41 = vld [vmem:[#allocation10 + $0x204] sm:$0xf]  ;;  %v6551_v43 = vor.u32 %v9023_v36, %v6548_v37  ;;  %v6482_v44 = vld [vmem:[#allocation10 + $0x208] sm:$0xf] }
  0x84   : > { %v6476_v42 = vld [vmem:[#allocation10 + $0x240] sm:$0xf0]  ;;  %1449 = vmatpush.bf16.msrb.mxu0 %v6615_v27  ;;  %v9015_v45 = vld [vmem:[#allocation10 + $0x244] sm:$0xf0]  ;;  %v9007_v46 = vld [vmem:[#allocation10 + $0x20c] sm:$0xf]  ;;  %v6475_v48 = vor.u32 %v9014_v40, %v6474_v38 }
  0x85   : > { %v6484_v47 = vld [vmem:[#allocation10 + $0x248] sm:$0xf0]  ;;  %v6479_v49 = vor.u32 %v9006_v41, %v6476_v42  ;;  %v6410_v50 = vld [vmem:[#allocation10 + $0x180] sm:$0xf]  ;;  %v6483_v51 = vor.u32 %v9015_v45, %v6482_v44  ;;  %v8990_v53 = vld [vmem:[#allocation10 + $0x184] sm:$0xf] }
  0x86   : > { %1411 = vmatpush.bf16.msra.mxu1 %v6539_v34  ;;  %v8998_v52 = vld [vmem:[#allocation10 + $0x1bc] sm:$0xf0]  ;;  %v6412_v54 = vld [vmem:[#allocation10 + $0x1c0] sm:$0xf0]  ;;  %v6487_v55 = vor.u32 %v9007_v46, %v6484_v47  ;;  %v6418_v56 = vld [vmem:[#allocation10 + $0x188] sm:$0xf] }
  0x87   : > { %1424 = vmatpush.bf16.msra.mxu2 %v6543_v35  ;;  %1437 = vmatpush.bf16.msra.mxu3 %v6547_v39  ;;  %v8999_v57 = vld [vmem:[#allocation10 + $0x1c4] sm:$0xf0]  ;;  %v8991_v58 = vld [vmem:[#allocation10 + $0x18c] sm:$0xf]  ;;  %v6411_v60 = vor.u32 %v8998_v52, %v6410_v50  ;;  %v6415_v61 = vor.u32 %v8990_v53, %v6412_v54  ;;  %v6346_v62 = vld [vmem:[#allocation10 + $0x100] sm:$0xf] }
  0x88   : > { %1450 = vmatpush.bf16.msrb.mxu0 %v6551_v43  ;;  %v6420_v59 = vld [vmem:[#allocation10 + $0x1c8] sm:$0xf0]  ;;  %v6419_v63 = vor.u32 %v8999_v57, %v6418_v56  ;;  %v8982_v0 = vld [vmem:[#allocation10 + $0x13c] sm:$0xf0]  ;;  %v8974_v1 = vld [vmem:[#allocation10 + $0x104] sm:$0xf] }
  0x89   : > { %v6348_v2 = vld [vmem:[#allocation10 + $0x140] sm:$0xf0]  ;;  %v6423_v3 = vor.u32 %v8991_v58, %v6420_v59  ;;  %v6354_v4 = vld [vmem:[#allocation10 + $0x108] sm:$0xf]  ;;  %v8975_v6 = vld [vmem:[#allocation10 + $0x10c] sm:$0xf]  ;;  %v6347_v8 = vor.u32 %v8982_v0, %v6346_v62 }
  0x8a   : > { %1412 = vmatpush.bf16.msra.mxu1 %v6475_v48  ;;  %v8983_v5 = vld [vmem:[#allocation10 + $0x144] sm:$0xf0]  ;;  %v6356_v7 = vld [vmem:[#allocation10 + $0x148] sm:$0xf0]  ;;  %v6351_v9 = vor.u32 %v8974_v1, %v6348_v2  ;;  %v6282_v10 = vld [vmem:[#allocation10 + $0x80] sm:$0xf] }
  0x8b   : > { %1425 = vmatpush.bf16.msra.mxu2 %v6479_v49  ;;  %1438 = vmatpush.bf16.msra.mxu3 %v6483_v51  ;;  %v6355_v11 = vor.u32 %v8983_v5, %v6354_v4  ;;  %v8966_v12 = vld [vmem:[#allocation10 + $0xbc] sm:$0xf0]  ;;  %v8958_v13 = vld [vmem:[#allocation10 + $0x84] sm:$0xf]  ;;  %v6359_v15 = vor.u32 %v8975_v6, %v6356_v7  ;;  %v6290_v16 = vld [vmem:[#allocation10 + $0x88] sm:$0xf] }
  0x8c   : > { %1451 = vmatpush.bf16.msrb.mxu0 %v6487_v55  ;;  %v6284_v14 = vld [vmem:[#allocation10 + $0xc0] sm:$0xf0]  ;;  %v8967_v17 = vld [vmem:[#allocation10 + $0xc4] sm:$0xf0]  ;;  %v8959_v18 = vld [vmem:[#allocation10 + $0x8c] sm:$0xf]  ;;  %v6283_v21 = vor.u32 %v8966_v12, %v6282_v10 }
  0x8d   : > { %v6292_v19 = vld [vmem:[#allocation10 + $0xc8] sm:$0xf0]  ;;  %v6218_v20 = vld [vmem:[#allocation10] sm:$0xf]  ;;  %v6287_v22 = vor.u32 %v8958_v13, %v6284_v14  ;;  %v8942_v24 = vld [vmem:[#allocation10 + $0x4] sm:$0xf]  ;;  %v6291_v26 = vor.u32 %v8967_v17, %v6290_v16 }
  0x8e   : > { %1413 = vmatpush.bf16.msra.mxu1 %v6411_v60  ;;  %v8950_v23 = vld [vmem:[#allocation10 + $0x3c] sm:$0xf0]  ;;  %v6220_v25 = vld [vmem:[#allocation10 + $0x40] sm:$0xf0]  ;;  %v6226_v27 = vld [vmem:[#allocation10 + $0x8] sm:$0xf]  ;;  %v6295_v30 = vor.u32 %v8959_v18, %v6292_v19 }
  0x8f   : > { %1426 = vmatpush.bf16.msra.mxu2 %v6415_v61  ;;  %1439 = vmatpush.bf16.msra.mxu3 %v6419_v63  ;;  %v8951_v28 = vld [vmem:[#allocation10 + $0x44] sm:$0xf0]  ;;  %v8943_v29 = vld [vmem:[#allocation10 + $0xc] sm:$0xf]  ;;  %v6682_v32 = vld [vmem:[#allocation10 + $0x390] sm:$0xf]  ;;  %v6219_v37 = vor.u32 %v8950_v23, %v6218_v20  ;;  %v6223_v38 = vor.u32 %v8942_v24, %v6220_v25 }
  0x90   : > { %1452 = vmatpush.bf16.msrb.mxu0 %v6423_v3  ;;  %v6228_v31 = vld [vmem:[#allocation10 + $0x48] sm:$0xf0]  ;;  %v9064_v33 = vld [vmem:[#allocation10 + $0x3cc] sm:$0xf0]  ;;  %v9056_v34 = vld [vmem:[#allocation10 + $0x394] sm:$0xf]  ;;  %v6227_v42 = vor.u32 %v8951_v28, %v6226_v27 }
  0x91   : > { %v6684_v35 = vld [vmem:[#allocation10 + $0x3d0] sm:$0xf0]  ;;  %v6690_v36 = vld [vmem:[#allocation10 + $0x398] sm:$0xf]  ;;  %v9057_v40 = vld [vmem:[#allocation10 + $0x39c] sm:$0xf]  ;;  %v6683_v43 = vor.u32 %v9064_v33, %v6682_v32  ;;  %v6231_v44 = vor.u32 %v8943_v29, %v6228_v31 }
  0x92   : > { %1414 = vmatpush.bf16.msra.mxu1 %v6347_v8  ;;  %v9065_v39 = vld [vmem:[#allocation10 + $0x3d4] sm:$0xf0]  ;;  %v6692_v41 = vld [vmem:[#allocation10 + $0x3d8] sm:$0xf0]  ;;  %v6687_v45 = vor.u32 %v9056_v34, %v6684_v35  ;;  %v6618_v46 = vld [vmem:[#allocation10 + $0x310] sm:$0xf] }
  0x93   : > { %1427 = vmatpush.bf16.msra.mxu2 %v6351_v9  ;;  %1440 = vmatpush.bf16.msra.mxu3 %v6355_v11  ;;  %v9048_v47 = vld [vmem:[#allocation10 + $0x34c] sm:$0xf0]  ;;  %v6691_v48 = vor.u32 %v9065_v39, %v6690_v36  ;;  %v6695_v49 = vor.u32 %v9057_v40, %v6692_v41  ;;  %v9040_v50 = vld [vmem:[#allocation10 + $0x314] sm:$0xf]  ;;  %v6626_v52 = vld [vmem:[#allocation10 + $0x318] sm:$0xf] }
  0x94   : > { %1453 = vmatpush.bf16.msrb.mxu0 %v6359_v15  ;;  %v6620_v51 = vld [vmem:[#allocation10 + $0x350] sm:$0xf0]  ;;  %v9049_v53 = vld [vmem:[#allocation10 + $0x354] sm:$0xf0]  ;;  %v9041_v54 = vld [vmem:[#allocation10 + $0x31c] sm:$0xf]  ;;  %v6619_v56 = vor.u32 %v9048_v47, %v6618_v46 }
  0x95   : > { %v6628_v55 = vld [vmem:[#allocation10 + $0x358] sm:$0xf0]  ;;  %v6623_v57 = vor.u32 %v9040_v50, %v6620_v51  ;;  %v6554_v58 = vld [vmem:[#allocation10 + $0x290] sm:$0xf]  ;;  %v6627_v60 = vor.u32 %v9049_v53, %v6626_v52  ;;  %v9024_v62 = vld [vmem:[#allocation10 + $0x294] sm:$0xf] }
  0x96   : > { %1415 = vmatpush.bf16.msra.mxu1 %v6283_v21  ;;  %v9032_v59 = vld [vmem:[#allocation10 + $0x2cc] sm:$0xf0]  ;;  %v6631_v61 = vor.u32 %v9041_v54, %v6628_v55  ;;  %v6556_v63 = vld [vmem:[#allocation10 + $0x2d0] sm:$0xf0]  ;;  %v6562_v0 = vld [vmem:[#allocation10 + $0x298] sm:$0xf] }
  0x97   : > { %1428 = vmatpush.bf16.msra.mxu2 %v6287_v22  ;;  %1441 = vmatpush.bf16.msra.mxu3 %v6291_v26  ;;  %v9033_v1 = vld [vmem:[#allocation10 + $0x2d4] sm:$0xf0]  ;;  %v9025_v2 = vld [vmem:[#allocation10 + $0x29c] sm:$0xf]  ;;  %v6555_v4 = vor.u32 %v9032_v59, %v6554_v58  ;;  %v6559_v5 = vor.u32 %v9024_v62, %v6556_v63  ;;  %v6490_v6 = vld [vmem:[#allocation10 + $0x210] sm:$0xf] }
  0x98   : > { %1454 = vmatpush.bf16.msrb.mxu0 %v6295_v30  ;;  %v6564_v3 = vld [vmem:[#allocation10 + $0x2d8] sm:$0xf0]  ;;  %v9016_v7 = vld [vmem:[#allocation10 + $0x24c] sm:$0xf0]  ;;  %v6563_v8 = vor.u32 %v9033_v1, %v6562_v0  ;;  %v9008_v10 = vld [vmem:[#allocation10 + $0x214] sm:$0xf] }
  0x99   : > { %v6567_v9 = vor.u32 %v9025_v2, %v6564_v3  ;;  %v6492_v11 = vld [vmem:[#allocation10 + $0x250] sm:$0xf0]  ;;  %v6498_v12 = vld [vmem:[#allocation10 + $0x218] sm:$0xf]  ;;  %v9009_v14 = vld [vmem:[#allocation10 + $0x21c] sm:$0xf]  ;;  %v6491_v16 = vor.u32 %v9016_v7, %v6490_v6 }
  0x9a   : > { %1416 = vmatpush.bf16.msra.mxu1 %v6219_v37  ;;  %v9017_v13 = vld [vmem:[#allocation10 + $0x254] sm:$0xf0]  ;;  %v6500_v15 = vld [vmem:[#allocation10 + $0x258] sm:$0xf0]  ;;  %v6495_v17 = vor.u32 %v9008_v10, %v6492_v11  ;;  %v6426_v18 = vld [vmem:[#allocation10 + $0x190] sm:$0xf] }
  0x9b   : > { %1429 = vmatpush.bf16.msra.mxu2 %v6223_v38  ;;  %1442 = vmatpush.bf16.msra.mxu3 %v6227_v42  ;;  %v9000_v19 = vld [vmem:[#allocation10 + $0x1cc] sm:$0xf0]  ;;  %v6499_v20 = vor.u32 %v9017_v13, %v6498_v12  ;;  %v6503_v21 = vor.u32 %v9009_v14, %v6500_v15  ;;  %v8992_v22 = vld [vmem:[#allocation10 + $0x194] sm:$0xf]  ;;  %v6434_v24 = vld [vmem:[#allocation10 + $0x198] sm:$0xf] }
  0x9c   : > { %1455 = vmatpush.bf16.msrb.mxu0 %v6231_v44  ;;  %v6428_v23 = vld [vmem:[#allocation10 + $0x1d0] sm:$0xf0]  ;;  %v9001_v25 = vld [vmem:[#allocation10 + $0x1d4] sm:$0xf0]  ;;  %v8993_v26 = vld [vmem:[#allocation10 + $0x19c] sm:$0xf]  ;;  %v6427_v28 = vor.u32 %v9000_v19, %v6426_v18 }
  0x9d   : > { %v6436_v27 = vld [vmem:[#allocation10 + $0x1d8] sm:$0xf0]  ;;  %v6431_v29 = vor.u32 %v8992_v22, %v6428_v23  ;;  %v6362_v30 = vld [vmem:[#allocation10 + $0x110] sm:$0xf]  ;;  %v6435_v32 = vor.u32 %v9001_v25, %v6434_v24  ;;  %v8976_v34 = vld [vmem:[#allocation10 + $0x114] sm:$0xf] }
  0x9e   : > { %1461 = vmatpush.bf16.msrb.mxu1 %v6683_v43  ;;  %v8984_v31 = vld [vmem:[#allocation10 + $0x14c] sm:$0xf0]  ;;  %v6439_v33 = vor.u32 %v8993_v26, %v6436_v27  ;;  %v6364_v35 = vld [vmem:[#allocation10 + $0x150] sm:$0xf0]  ;;  %v6370_v36 = vld [vmem:[#allocation10 + $0x118] sm:$0xf] }
  0x9f   : > { %1474 = vmatpush.bf16.msrb.mxu2 %v6687_v45  ;;  %1487 = vmatpush.bf16.msrb.mxu3 %v6691_v48  ;;  %v8985_v37 = vld [vmem:[#allocation10 + $0x154] sm:$0xf0]  ;;  %v8977_v38 = vld [vmem:[#allocation10 + $0x11c] sm:$0xf]  ;;  %v6363_v40 = vor.u32 %v8984_v31, %v6362_v30  ;;  %v6367_v41 = vor.u32 %v8976_v34, %v6364_v35  ;;  %v6298_v44 = vld [vmem:[#allocation10 + $0x90] sm:$0xf] }
  0xa0   : > { %1500 = vmatpush.bf16.msra.mxu0 %v6695_v49  ;;  %v6372_v39 = vld [vmem:[#allocation10 + $0x158] sm:$0xf0]  ;;  %v6371_v42 = vor.u32 %v8985_v37, %v6370_v36  ;;  %v8968_v45 = vld [vmem:[#allocation10 + $0xcc] sm:$0xf0]  ;;  %v8960_v46 = vld [vmem:[#allocation10 + $0x94] sm:$0xf] }
  0xa1   : > { %v6375_v43 = vor.u32 %v8977_v38, %v6372_v39  ;;  %v6299_v47 = vor.u32 %v8968_v45, %v6298_v44  ;;  %v6300_v48 = vld [vmem:[#allocation10 + $0xd0] sm:$0xf0]  ;;  %v6306_v49 = vld [vmem:[#allocation10 + $0x98] sm:$0xf]  ;;  %v8961_v53 = vld [vmem:[#allocation10 + $0x9c] sm:$0xf] }
  0xa2   : > { %1462 = vmatpush.bf16.msrb.mxu1 %v6619_v56  ;;  %v8969_v50 = vld [vmem:[#allocation10 + $0xd4] sm:$0xf0]  ;;  %v6303_v51 = vor.u32 %v8960_v46, %v6300_v48  ;;  %v6308_v54 = vld [vmem:[#allocation10 + $0xd8] sm:$0xf0]  ;;  %v6234_v56 = vld [vmem:[#allocation10 + $0x10] sm:$0xf] }
  0xa3   : > { %1475 = vmatpush.bf16.msrb.mxu2 %v6623_v57  ;;  %1488 = vmatpush.bf16.msrb.mxu3 %v6627_v60  ;;  %v6307_v52 = vor.u32 %v8969_v50, %v6306_v49  ;;  %v6311_v55 = vor.u32 %v8961_v53, %v6308_v54  ;;  %v8952_v57 = vld [vmem:[#allocation10 + $0x4c] sm:$0xf0]  ;;  %v8944_v58 = vld [vmem:[#allocation10 + $0x14] sm:$0xf]  ;;  %v8953_v62 = vld [vmem:[#allocation10 + $0x54] sm:$0xf0] }
  0xa4   : > { %1501 = vmatpush.bf16.msra.mxu0 %v6631_v61  ;;  %v6235_v59 = vor.u32 %v8952_v57, %v6234_v56  ;;  %v6236_v60 = vld [vmem:[#allocation10 + $0x50] sm:$0xf0]  ;;  %v6242_v61 = vld [vmem:[#allocation10 + $0x18] sm:$0xf]  ;;  %v8945_v1 = vld [vmem:[#allocation10 + $0x1c] sm:$0xf] }
  0xa5   : > { %v6239_v63 = vor.u32 %v8944_v58, %v6236_v60  ;;  %v6243_v0 = vor.u32 %v8953_v62, %v6242_v61  ;;  %v6244_v2 = vld [vmem:[#allocation10 + $0x58] sm:$0xf0]  ;;  %v6698_v7 = vld [vmem:[#allocation10 + $0x3a0] sm:$0xf]  ;;  %v6700_v10 = vld [vmem:[#allocation10 + $0x3e0] sm:$0xf0] }
  0xa6   : > { %1463 = vmatpush.bf16.msrb.mxu1 %v6555_v4  ;;  %v6247_v3 = vor.u32 %v8945_v1, %v6244_v2  ;;  %v9738_v4 = vld [vmem:[#allocation9] ss:$0 sm:$0xff]  ;;  %v6706_v11 = vld [vmem:[#allocation10 + $0x3a8] sm:$0xf]  ;;  %v9059_v14 = vld [vmem:[#allocation10 + $0x3ac] sm:$0xf] }
  0xa7   : > { %1476 = vmatpush.bf16.msrb.mxu2 %v6559_v5  ;;  %1489 = vmatpush.bf16.msrb.mxu3 %v6563_v8  ;;  %v9066_v8 = vld [vmem:[#allocation10 + $0x3dc] sm:$0xf0]  ;;  %v9067_v12 = vld [vmem:[#allocation10 + $0x3e4] sm:$0xf0]  ;;  %v6708_v15 = vld [vmem:[#allocation10 + $0x3e8] sm:$0xf0] }
  0xa8   : > { %1502 = vmatpush.bf16.msra.mxu0 %v6567_v9  ;;  %v9058_v9 = vld [vmem:[#allocation10 + $0x3a4] sm:$0xf]  ;;  %v6634_v19 = vld [vmem:[#allocation10 + $0x320] sm:$0xf]  ;;  %v6711_v22 = vor.u32 %v9059_v14, %v6708_v15  ;;  %v6642_v25 = vld [vmem:[#allocation10 + $0x328] sm:$0xf] }
  0xa9   : > { %v6703_v18 = vor.u32 %v9058_v9, %v6700_v10  ;;  %v9042_v23 = vld [vmem:[#allocation10 + $0x324] sm:$0xf]  ;;  %v9051_v26 = vld [vmem:[#allocation10 + $0x364] sm:$0xf0]  ;;  %v9043_v27 = vld [vmem:[#allocation10 + $0x32c] sm:$0xf] }
  0xaa   : > { %1464 = vmatpush.bf16.msrb.mxu1 %v6491_v16  ;;  %v6636_v24 = vld [vmem:[#allocation10 + $0x360] sm:$0xf0]  ;;  %v6643_v34 = vor.u32 %v9051_v26, %v6642_v25  ;;  %v6578_v38 = vld [vmem:[#allocation10 + $0x2a8] sm:$0xf]  ;;  %v6506_v44 = vld [vmem:[#allocation10 + $0x220] sm:$0xf] }
  0xab   : > { %1477 = vmatpush.bf16.msrb.mxu2 %v6495_v17  ;;  %1490 = vmatpush.bf16.msrb.mxu3 %v6499_v20  ;;  %v6699_v17 = vor.u32 %v9066_v8, %v6698_v7  ;;  %v9050_v20 = vld [vmem:[#allocation10 + $0x35c] sm:$0xf0]  ;;  %v6639_v31 = vor.u32 %v9042_v23, %v6636_v24  ;;  %v9026_v36 = vld [vmem:[#allocation10 + $0x2a4] sm:$0xf]  ;;  %v9035_v39 = vld [vmem:[#allocation10 + $0x2e4] sm:$0xf0] }
  0xac   : > { %1503 = vmatpush.bf16.msra.mxu0 %v6503_v21  ;;  %v6707_v21 = vor.u32 %v9067_v12, %v6706_v11  ;;  %v6635_v30 = vor.u32 %v9050_v20, %v6634_v19  ;;  %v6572_v37 = vld [vmem:[#allocation10 + $0x2e0] sm:$0xf0]  ;;  %v9018_v45 = vld [vmem:[#allocation10 + $0x25c] sm:$0xf0]  ;;  %v6579_v46 = vor.u32 %v9035_v39, %v6578_v38  ;;  %v6514_v50 = vld [vmem:[#allocation10 + $0x228] sm:$0xf] }
  0xad   : > { %v9010_v48 = vld [vmem:[#allocation10 + $0x224] sm:$0xf]  ;;  %v6516_v53 = vld [vmem:[#allocation10 + $0x268] sm:$0xf0]  ;;  %v6507_v54 = vor.u32 %v9018_v45, %v6506_v44  ;;  %v6442_v56 = vld [vmem:[#allocation10 + $0x1a0] sm:$0xf] }
  0xae   : > { %1465 = vmatpush.bf16.msrb.mxu1 %v6427_v28  ;;  %v6644_v28 = vld [vmem:[#allocation10 + $0x368] sm:$0xf0]  ;;  %v6508_v49 = vld [vmem:[#allocation10 + $0x260] sm:$0xf0]  ;;  %v9002_v57 = vld [vmem:[#allocation10 + $0x1dc] sm:$0xf0] }
  0xaf   : > { %1478 = vmatpush.bf16.msrb.mxu2 %v6431_v29  ;;  %1491 = vmatpush.bf16.msrb.mxu3 %v6435_v32  ;;  %v6570_v32 = vld [vmem:[#allocation10 + $0x2a0] sm:$0xf]  ;;  %v6647_v35 = vor.u32 %v9043_v27, %v6644_v28  ;;  %v8994_v60 = vld [vmem:[#allocation10 + $0x1a4] sm:$0xf]  ;;  %v6450_v62 = vld [vmem:[#allocation10 + $0x1a8] sm:$0xf]  ;;  %v6443_v2 = vor.u32 %v9002_v57, %v6442_v56 }
  0xb0   : > { %1504 = vmatpush.bf16.msra.mxu0 %v6439_v33  ;;  %v9034_v33 = vld [vmem:[#allocation10 + $0x2dc] sm:$0xf0]  ;;  %v6444_v61 = vld [vmem:[#allocation10 + $0x1e0] sm:$0xf0]  ;;  %v6452_v1 = vld [vmem:[#allocation10 + $0x1e8] sm:$0xf0] }
  0xb1   : > { %v8978_v8 = vld [vmem:[#allocation10 + $0x124] sm:$0xf]  ;;  %v6386_v10 = vld [vmem:[#allocation10 + $0x128] sm:$0xf]  ;;  %v8979_v12 = vld [vmem:[#allocation10 + $0x12c] sm:$0xf] }
  0xb2   : > { %1466 = vmatpush.bf16.msrb.mxu1 %v6363_v40  ;;  %v9027_v40 = vld [vmem:[#allocation10 + $0x2ac] sm:$0xf]  ;;  %v6380_v9 = vld [vmem:[#allocation10 + $0x160] sm:$0xf0]  ;;  %v8987_v11 = vld [vmem:[#allocation10 + $0x164] sm:$0xf0] }
  0xb3   : > { %1479 = vmatpush.bf16.msrb.mxu2 %v6367_v41  ;;  %1492 = vmatpush.bf16.msrb.mxu3 %v6371_v42  ;;  %v6580_v41 = vld [vmem:[#allocation10 + $0x2e8] sm:$0xf0]  ;;  %v6571_v42 = vor.u32 %v9034_v33, %v6570_v32  ;;  %v6383_v15 = vor.u32 %v8978_v8, %v6380_v9  ;;  %v6387_v19 = vor.u32 %v8987_v11, %v6386_v10  ;;  %v6322_v23 = vld [vmem:[#allocation10 + $0xa8] sm:$0xf]  ;;  %v6250_v27 = vld [vmem:[#allocation10 + $0x20] sm:$0xf] }
  0xb4   : > { %1505 = vmatpush.bf16.msra.mxu0 %v6375_v43  ;;  %v6575_v43 = vor.u32 %v9026_v36, %v6572_v37  ;;  %v8971_v24 = vld [vmem:[#allocation10 + $0xe4] sm:$0xf0]  ;;  %v8963_v25 = vld [vmem:[#allocation10 + $0xac] sm:$0xf]  ;;  %v6252_v32 = vld [vmem:[#allocation10 + $0x60] sm:$0xf0] }
  0xb5   : > { %v6324_v26 = vld [vmem:[#allocation10 + $0xe8] sm:$0xf0]  ;;  %v6323_v33 = vor.u32 %v8971_v24, %v6322_v23  ;;  %v8955_v36 = vld [vmem:[#allocation10 + $0x64] sm:$0xf0]  ;;  %v6714_v39 = vld [vmem:[#allocation10 + $0x3b0] sm:$0xf] }
  0xb6   : > { %1467 = vmatpush.bf16.msrb.mxu1 %v6299_v47  ;;  %v6583_v47 = vor.u32 %v9027_v40, %v6580_v41  ;;  %v8947_v37 = vld [vmem:[#allocation10 + $0x2c] sm:$0xf]  ;;  %v9068_v40 = vld [vmem:[#allocation10 + $0x3ec] sm:$0xf0]  ;;  %v9060_v41 = vld [vmem:[#allocation10 + $0x3b4] sm:$0xf] }
  0xb7   : > { %1480 = vmatpush.bf16.msrb.mxu2 %v6303_v51  ;;  %1493 = vmatpush.bf16.msrb.mxu3 %v6307_v52  ;;  %v9019_v51 = vld [vmem:[#allocation10 + $0x264] sm:$0xf0]  ;;  %v9011_v52 = vld [vmem:[#allocation10 + $0x22c] sm:$0xf]  ;;  %v9044_v57 = vld [vmem:[#allocation10 + $0x334] sm:$0xf] }
  0xb8   : > { %1506 = vmatpush.bf16.msra.mxu0 %v6311_v55  ;;  %v6511_v55 = vor.u32 %v9010_v48, %v6508_v49  ;;  %v6515_v58 = vor.u32 %v9019_v51, %v6514_v50  ;;  %v6260_v38 = vld [vmem:[#allocation10 + $0x68] sm:$0xf0]  ;;  %v6724_v48 = vld [vmem:[#allocation10 + $0x3f8] sm:$0xf0]  ;;  %v6715_v51 = vor.u32 %v9068_v40, %v6714_v39  ;;  %v9037_v8 = vld [vmem:[#allocation10 + $0x2f4] sm:$0xf0] }
  0xb9   : > { %v6263_v50 = vor.u32 %v8947_v37, %v6260_v38  ;;  %v9029_v9 = vld [vmem:[#allocation10 + $0x2bc] sm:$0xf]  ;;  %v6394_v38 = vld [vmem:[#allocation10 + $0x130] sm:$0xf] }
  0xba   : > { %1468 = vmatpush.bf16.msrb.mxu1 %v6235_v59  ;;  %v6519_v59 = vor.u32 %v9011_v52, %v6516_v53  ;;  %v6650_v53 = vld [vmem:[#allocation10 + $0x330] sm:$0xf]  ;;  %v6596_v10 = vld [vmem:[#allocation10 + $0x2f8] sm:$0xf0] }
  0xbb   : > { %1481 = vmatpush.bf16.msrb.mxu2 %v6239_v63  ;;  %1494 = vmatpush.bf16.msrb.mxu3 %v6243_v0  ;;  %v9003_v63 = vld [vmem:[#allocation10 + $0x1e4] sm:$0xf0]  ;;  %v8995_v0 = vld [vmem:[#allocation10 + $0x1ac] sm:$0xf]  ;;  %v6532_v23 = vld [vmem:[#allocation10 + $0x278] sm:$0xf0] }
  0xbc   : > { %1507 = vmatpush.bf16.msra.mxu0 %v6247_v3  ;;  %v6447_v3 = vor.u32 %v8994_v60, %v6444_v61  ;;  %v6455_v7 = vor.u32 %v8995_v0, %v6452_v1  ;;  %v9053_v60 = vld [vmem:[#allocation10 + $0x374] sm:$0xf0]  ;;  %v9045_v61 = vld [vmem:[#allocation10 + $0x33c] sm:$0xf]  ;;  %v6586_v1 = vld [vmem:[#allocation10 + $0x2b0] sm:$0xf] }
  0xbd   : > { %v8988_v39 = vld [vmem:[#allocation10 + $0x16c] sm:$0xf0] }
  0xfb   : > { %v599_v5 = vpop.f32.mrf.mxu0 }
  0xfc   : > { %v600_v6 = vadd.f32 %v9738_v4, %v599_v5  ;;  %v6378_v4 = vld [vmem:[#allocation10 + $0x120] sm:$0xf] }
  0xfd   : > { %v8986_v5 = vld [vmem:[#allocation10 + $0x15c] sm:$0xf0] }
  0xfe   : > { %v603_v13 = vmax.f32 %v600_v6, 0.0  ;;  %v6451_v6 = vor.u32 %v9003_v63, %v6450_v62  ;;  %v6379_v14 = vor.u32 %v8986_v5, %v6378_v4  ;;  %v6660_v62 = vld [vmem:[#allocation10 + $0x378] sm:$0xf0]  ;;  %v9028_v5 = vld [vmem:[#allocation10 + $0x2b4] sm:$0xf] }
  0xff   : > { %v6663_v4 = vor.u32 %v9045_v61, %v6660_v62  ;;  %v6266_v62 = vld [vmem:[#allocation10 + $0x30] sm:$0xf] }
 0x100   : > { %v10346_v16 = vpack.c.bf16 %v603_v13, %v603_v13  ;;  %v6388_v13 = vld [vmem:[#allocation10 + $0x168] sm:$0xf0] }
 0x101   : > { %v6391_v20 = vor.u32 %v8979_v12, %v6388_v13  ;;  %v6522_v13 = vld [vmem:[#allocation10 + $0x230] sm:$0xf] }
 0x102   : > { %1417 = vmatmul.bf16.vlgmr.msra.gmra.mxu1 %v10346_v16  ;;  %1430 = vmatmul.bf16.vlgmr.msra.gmra.mxu2 %v10346_v16 }
 0x103   : > { %1443 = vmatmul.bf16.vlgmr.msra.gmra.mxu3 %v10346_v16  ;;  %1456 = vmatmul.bf16.vlgmr.msrb.gmra.mxu0 %v10346_v16  ;;  %v601_v29 = vpop.f32.mrf.mxu0 }
 0x104   : > { %1513 = vmatpush.bf16.msra.mxu1 %v6699_v17  ;;  %1526 = vmatpush.bf16.msra.mxu2 %v6703_v18  ;;  %v6314_v17 = vld [vmem:[#allocation10 + $0xa0] sm:$0xf] }
 0x105   : > { %1539 = vmatpush.bf16.msra.mxu3 %v6707_v21  ;;  %1552 = vmatpush.bf16.msrb.mxu0 %v6711_v22  ;;  %v8970_v18 = vld [vmem:[#allocation10 + $0xdc] sm:$0xf0]  ;;  %v8962_v21 = vld [vmem:[#allocation10 + $0xa4] sm:$0xf] }
 0x106   : > { %v6316_v22 = vld [vmem:[#allocation10 + $0xe0] sm:$0xf0]  ;;  %v6315_v28 = vor.u32 %v8970_v18, %v6314_v17  ;;  %v6599_v17 = vor.u32 %v9029_v9, %v6596_v10  ;;  %v9012_v18 = vld [vmem:[#allocation10 + $0x234] sm:$0xf] }
 0x107   : > { %v6319_v29 = vor.u32 %v8962_v21, %v6316_v22  ;;  %v9021_v21 = vld [vmem:[#allocation10 + $0x274] sm:$0xf0]  ;;  %v9013_v22 = vld [vmem:[#allocation10 + $0x23c] sm:$0xf] }
 0x108   : > { %1514 = vmatpush.bf16.msra.mxu1 %v6635_v30  ;;  %1527 = vmatpush.bf16.msra.mxu2 %v6639_v31  ;;  %v8954_v30 = vld [vmem:[#allocation10 + $0x5c] sm:$0xf0]  ;;  %v8946_v31 = vld [vmem:[#allocation10 + $0x24] sm:$0xf] }
 0x109   : > { %1540 = vmatpush.bf16.msra.mxu3 %v6643_v34  ;;  %1553 = vmatpush.bf16.msrb.mxu0 %v6647_v35  ;;  %v6327_v34 = vor.u32 %v8963_v25, %v6324_v26  ;;  %v6258_v35 = vld [vmem:[#allocation10 + $0x28] sm:$0xf]  ;;  %v6251_v44 = vor.u32 %v8954_v30, %v6250_v27  ;;  %v6255_v45 = vor.u32 %v8946_v31, %v6252_v32  ;;  %v6458_v26 = vld [vmem:[#allocation10 + $0x1b0] sm:$0xf]  ;;  %v8996_v30 = vld [vmem:[#allocation10 + $0x1b4] sm:$0xf] }
 0x10a   : > { %v6259_v49 = vor.u32 %v8955_v36, %v6258_v35  ;;  %v9004_v27 = vld [vmem:[#allocation10 + $0x1ec] sm:$0xf0]  ;;  %v6460_v31 = vld [vmem:[#allocation10 + $0x1f0] sm:$0xf0]  ;;  %v6466_v32 = vld [vmem:[#allocation10 + $0x1b8] sm:$0xf] }
 0x10b   : > { %v6468_v35 = vld [vmem:[#allocation10 + $0x1f8] sm:$0xf0]  ;;  %v6459_v36 = vor.u32 %v9004_v27, %v6458_v26  ;;  %v6463_v37 = vor.u32 %v8996_v30, %v6460_v31 }
 0x10c   : > { %1515 = vmatpush.bf16.msra.mxu1 %v6571_v42  ;;  %1528 = vmatpush.bf16.msra.mxu2 %v6575_v43  ;;  %v6716_v42 = vld [vmem:[#allocation10 + $0x3f0] sm:$0xf0]  ;;  %v6722_v43 = vld [vmem:[#allocation10 + $0x3b8] sm:$0xf] }
 0x10d   : > { %1541 = vmatpush.bf16.msra.mxu3 %v6579_v46  ;;  %1554 = vmatpush.bf16.msrb.mxu0 %v6583_v47  ;;  %v9069_v46 = vld [vmem:[#allocation10 + $0x3f4] sm:$0xf0]  ;;  %v9061_v47 = vld [vmem:[#allocation10 + $0x3bc] sm:$0xf]  ;;  %v6719_v52 = vor.u32 %v9060_v41, %v6716_v42  ;;  %v8980_v42 = vld [vmem:[#allocation10 + $0x134] sm:$0xf] }
 0x10e   : > { %v6727_v56 = vor.u32 %v9061_v47, %v6724_v48  ;;  %v6404_v47 = vld [vmem:[#allocation10 + $0x178] sm:$0xf0]  ;;  %v6395_v48 = vor.u32 %v8988_v39, %v6394_v38 }
 0x110   : > { %1516 = vmatpush.bf16.msra.mxu1 %v6507_v54  ;;  %1529 = vmatpush.bf16.msra.mxu2 %v6511_v55  ;;  %v9052_v54 = vld [vmem:[#allocation10 + $0x36c] sm:$0xf0]  ;;  %v6723_v55 = vor.u32 %v9069_v46, %v6722_v43  ;;  %v6396_v43 = vld [vmem:[#allocation10 + $0x170] sm:$0xf0]  ;;  %v8981_v46 = vld [vmem:[#allocation10 + $0x13c] sm:$0xf] }
 0x111   : > { %1542 = vmatpush.bf16.msra.mxu3 %v6515_v58  ;;  %1555 = vmatpush.bf16.msrb.mxu0 %v6519_v59  ;;  %v6652_v58 = vld [vmem:[#allocation10 + $0x370] sm:$0xf0]  ;;  %v6658_v59 = vld [vmem:[#allocation10 + $0x338] sm:$0xf]  ;;  %v6651_v63 = vor.u32 %v9052_v54, %v6650_v53  ;;  %v6407_v53 = vor.u32 %v8981_v46, %v6404_v47 }
 0x112   : > { %1469 = vmatmul.bf16.vlgmr.msrb.gmra.mxu1 %v10346_v16  ;;  %1482 = vmatmul.bf16.vlgmr.msrb.gmra.mxu2 %v10346_v16  ;;  %v6655_v0 = vor.u32 %v9044_v57, %v6652_v58  ;;  %v8964_v54 = vld [vmem:[#allocation10 + $0xb4] sm:$0xf]  ;;  %v8973_v57 = vld [vmem:[#allocation10 + $0xf4] sm:$0xf0]  ;;  %v8965_v58 = vld [vmem:[#allocation10 + $0xbc] sm:$0xf] }
 0x113   : > { %1495 = vmatmul.bf16.vlgmr.msrb.gmra.mxu3 %v10346_v16  ;;  %1508 = vmatmul.bf16.vlgmr.msra.gmra.mxu0 %v10346_v16 }
 0x114   : > { %1517 = vmatpush.bf16.msra.mxu1 %v6443_v2  ;;  %1530 = vmatpush.bf16.msra.mxu2 %v6447_v3  ;;  %v9036_v2 = vld [vmem:[#allocation10 + $0x2ec] sm:$0xf0]  ;;  %v6659_v3 = vor.u32 %v9053_v60, %v6658_v59  ;;  %v6340_v59 = vld [vmem:[#allocation10 + $0xf8] sm:$0xf0] }
 0x115   : > { %1543 = vmatpush.bf16.msra.mxu3 %v6451_v6  ;;  %1556 = vmatpush.bf16.msrb.mxu0 %v6455_v7  ;;  %v6588_v6 = vld [vmem:[#allocation10 + $0x2f0] sm:$0xf0]  ;;  %v6594_v7 = vld [vmem:[#allocation10 + $0x2b8] sm:$0xf]  ;;  %v6587_v11 = vor.u32 %v9036_v2, %v6586_v1  ;;  %v6343_v1 = vor.u32 %v8965_v58, %v6340_v59 }
 0x116   : > { %v6591_v12 = vor.u32 %v9028_v5, %v6588_v6  ;;  %v8948_v2 = vld [vmem:[#allocation10 + $0x34] sm:$0xf]  ;;  %v8957_v5 = vld [vmem:[#allocation10 + $0x74] sm:$0xf0]  ;;  %v8949_v6 = vld [vmem:[#allocation10 + $0x3c] sm:$0xf] }
 0x118   : > { %1518 = vmatpush.bf16.msra.mxu1 %v6379_v14  ;;  %1531 = vmatpush.bf16.msra.mxu2 %v6383_v15  ;;  %v9020_v14 = vld [vmem:[#allocation10 + $0x26c] sm:$0xf0]  ;;  %v6595_v15 = vor.u32 %v9037_v8, %v6594_v7  ;;  %v6276_v7 = vld [vmem:[#allocation10 + $0x78] sm:$0xf0] }
 0x119   : > { %1544 = vmatpush.bf16.msra.mxu3 %v6387_v19  ;;  %1557 = vmatpush.bf16.msrb.mxu0 %v6391_v20  ;;  %v6524_v19 = vld [vmem:[#allocation10 + $0x270] sm:$0xf0]  ;;  %v6530_v20 = vld [vmem:[#allocation10 + $0x238] sm:$0xf]  ;;  %v6523_v24 = vor.u32 %v9020_v14, %v6522_v13 }
 0x11a   : > { %v6527_v25 = vor.u32 %v9012_v18, %v6524_v19 }
 0x11c   : > { %1519 = vmatpush.bf16.msra.mxu1 %v6315_v28  ;;  %1532 = vmatpush.bf16.msra.mxu2 %v6319_v29  ;;  %v6531_v28 = vor.u32 %v9021_v21, %v6530_v20  ;;  %v6535_v29 = vor.u32 %v9013_v22, %v6532_v23 }
 0x11d   : > { %1545 = vmatpush.bf16.msra.mxu3 %v6323_v33  ;;  %1558 = vmatpush.bf16.msrb.mxu0 %v6327_v34  ;;  %v9005_v33 = vld [vmem:[#allocation10 + $0x1f4] sm:$0xf0]  ;;  %v8997_v34 = vld [vmem:[#allocation10 + $0x1bc] sm:$0xf] }
 0x11e   : > { %v6467_v40 = vor.u32 %v9005_v33, %v6466_v32  ;;  %v6471_v41 = vor.u32 %v8997_v34, %v6468_v35 }
 0x120   : > { %1520 = vmatpush.bf16.msra.mxu1 %v6251_v44  ;;  %1533 = vmatpush.bf16.msra.mxu2 %v6255_v45  ;;  %v6402_v44 = vld [vmem:[#allocation10 + $0x138] sm:$0xf] }
 0x121   : > { %1546 = vmatpush.bf16.msra.mxu3 %v6259_v49  ;;  %1559 = vmatpush.bf16.msrb.mxu0 %v6263_v50  ;;  %v8989_v45 = vld [vmem:[#allocation10 + $0x174] sm:$0xf0]  ;;  %v6399_v49 = vor.u32 %v8980_v42, %v6396_v43  ;;  %v6330_v50 = vld [vmem:[#allocation10 + $0xb0] sm:$0xf] }
 0x123   : > { %1521 = vmatmul.bf16.vlgmr.msra.gmra.mxu1 %v10346_v16  ;;  %1534 = vmatmul.bf16.vlgmr.msra.gmra.mxu2 %v10346_v16 }
 0x124   : > { %1565 = vmatpush.bf16.msrb.mxu1 %v6715_v51  ;;  %1578 = vmatpush.bf16.msrb.mxu2 %v6719_v52  ;;  %v8972_v51 = vld [vmem:[#allocation10 + $0xec] sm:$0xf0]  ;;  %v6403_v52 = vor.u32 %v8989_v45, %v6402_v44 }
 0x125   : > { %1591 = vmatpush.bf16.msrb.mxu3 %v6723_v55  ;;  %1604 = vmatpush.bf16.msra.mxu0 %v6727_v56  ;;  %v6332_v55 = vld [vmem:[#allocation10 + $0xf0] sm:$0xf0]  ;;  %v6338_v56 = vld [vmem:[#allocation10 + $0xb8] sm:$0xf]  ;;  %v6331_v60 = vor.u32 %v8972_v51, %v6330_v50 }
 0x126   : > { %1547 = vmatmul.bf16.vlgmr.msra.gmra.mxu3 %v10346_v16  ;;  %1560 = vmatmul.bf16.vlgmr.msrb.gmra.mxu0 %v10346_v16  ;;  %v6335_v61 = vor.u32 %v8964_v54, %v6332_v55 }
 0x128   : > { %1566 = vmatpush.bf16.msrb.mxu1 %v6651_v63  ;;  %1579 = vmatpush.bf16.msrb.mxu2 %v6655_v0  ;;  %v8956_v63 = vld [vmem:[#allocation10 + $0x6c] sm:$0xf0]  ;;  %v6339_v0 = vor.u32 %v8973_v57, %v6338_v56  ;;  %v734_v57 = vld [vmem:[#allocation12 + $0x8] sm:$0xff] }
 0x129   : > { %1592 = vmatpush.bf16.msrb.mxu3 %v6659_v3  ;;  %1605 = vmatpush.bf16.msra.mxu0 %v6663_v4  ;;  %v6268_v3 = vld [vmem:[#allocation10 + $0x70] sm:$0xf0]  ;;  %v6274_v4 = vld [vmem:[#allocation10 + $0x38] sm:$0xf]  ;;  %v6267_v8 = vor.u32 %v8956_v63, %v6266_v62  ;;  %v745_v59 = vperm.slane %v734_v57, 0  ;;  %v746_v62 = vperm.slane %v734_v57, 1 }
 0x12a   : > { %v6271_v9 = vor.u32 %v8948_v2, %v6268_v3  ;;  %v6275_v10 = vor.u32 %v8957_v5, %v6274_v4  ;;  %v747_v63 = vperm.slane %v734_v57, 2 }
 0x12c   : > { %1567 = vmatpush.bf16.msrb.mxu1 %v6587_v11  ;;  %1580 = vmatpush.bf16.msrb.mxu2 %v6591_v12  ;;  %v6279_v11 = vor.u32 %v8949_v6, %v6276_v7  ;;  %v733_v12 = vld [vmem:[#allocation12] sm:$0xff] }
 0x12d   : > { %1593 = vmatpush.bf16.msrb.mxu3 %v6595_v15  ;;  %1606 = vmatpush.bf16.msra.mxu0 %v6599_v17  ;;  %v737_v14 = vperm.slane %v733_v12, 0  ;;  %v740_v17 = vperm.slane %v733_v12, 3  ;;  %v738_v18 = vperm.slane %v733_v12, 1  ;;  %v739_v19 = vperm.slane %v733_v12, 2 }
 0x12e   : > { %v744_v38 = vperm.slane %v733_v12, 7  ;;  %v742_v39 = vperm.slane %v733_v12, 5 }
 0x130   : > { %1568 = vmatpush.bf16.msrb.mxu1 %v6523_v24  ;;  %1581 = vmatpush.bf16.msrb.mxu2 %v6527_v25 }
 0x131   : > { %1594 = vmatpush.bf16.msrb.mxu3 %v6531_v28  ;;  %1607 = vmatpush.bf16.msra.mxu0 %v6535_v29 }
 0x134   : > { %1569 = vmatpush.bf16.msrb.mxu1 %v6459_v36  ;;  %1582 = vmatpush.bf16.msrb.mxu2 %v6463_v37  ;;  %v741_v36 = vperm.slane %v733_v12, 4 }
 0x135   : > { %1595 = vmatpush.bf16.msrb.mxu3 %v6467_v40  ;;  %1608 = vmatpush.bf16.msra.mxu0 %v6471_v41  ;;  %v743_v40 = vperm.slane %v733_v12, 6 }
 0x138   : > { %1570 = vmatpush.bf16.msrb.mxu1 %v6395_v48  ;;  %1583 = vmatpush.bf16.msrb.mxu2 %v6399_v49 }
 0x139   : > { %1596 = vmatpush.bf16.msrb.mxu3 %v6403_v52  ;;  %1609 = vmatpush.bf16.msra.mxu0 %v6407_v53 }
 0x13c   : > { %1571 = vmatpush.bf16.msrb.mxu1 %v6331_v60  ;;  %1584 = vmatpush.bf16.msrb.mxu2 %v6335_v61  ;;  %v748_v61 = vperm.slane %v734_v57, 3 }
 0x13d   : > { %1597 = vmatpush.bf16.msrb.mxu3 %v6339_v0  ;;  %1610 = vmatpush.bf16.msra.mxu0 %v6343_v1 }
 0x140   : > { %1572 = vmatpush.bf16.msrb.mxu1 %v6267_v8  ;;  %1585 = vmatpush.bf16.msrb.mxu2 %v6271_v9 }
 0x141   : > { %1598 = vmatpush.bf16.msrb.mxu3 %v6275_v10  ;;  %1611 = vmatpush.bf16.msra.mxu0 %v6279_v11 }
 0x143   : > { %1573 = vmatmul.bf16.vlgmr.msrb.gmra.mxu1 %v10346_v16  ;;  %1586 = vmatmul.bf16.vlgmr.msrb.gmra.mxu2 %v10346_v16 }
 0x144   : > { %1599 = vmatmul.bf16.vlgmr.msrb.gmra.mxu3 %v10346_v16  ;;  %1612 = vmatmul.bf16.vlgmr.msra.gmra.mxu0 %v10346_v16 }
 0x17f   : > { %v1418_v13 = vpop.f32.mrf.mxu1 }
 0x180   : > { %v1457_v15 = vpop.f32.mrf.mxu0  ;;  %v1419_v20 = vadd.f32 %v1418_v13, %v737_v14  ;;  %v10080_v14 = vmov 0.0  }
 0x181   : > { %v1458_v21 = vadd.f32 %v1457_v15, %v740_v17  ;;  %1649 = vst [vmem:[#allocation3] sm:$0xff] %v10080_v14 }
 0x182   : > { %v1617_v27 = vmax.f32 %v1419_v20, 0.0 }
 0x183   : > { %v1620_v30 = vmax.f32 %v1458_v21, 0.0  ;;  %v752_v21 = vperm.slane %v734_v57, 7 }
 0x185   : > { %v1431_v22 = vpop.f32.mrf.mxu2 }
 0x186   : > { %v1432_v23 = vadd.f32 %v1431_v22, %v738_v18  ;;  %v1444_v24 = vpop.f32.mrf.mxu3  ;;  %v750_v22 = vperm.slane %v734_v57, 5 }
 0x187   : > { %v1445_v25 = vadd.f32 %v1444_v24, %v739_v19  ;;  %v1420_v26 = vpop.f32.mrf.mxu1  ;;  %v749_v19 = vperm.slane %v734_v57, 4 }
 0x188   : > { %v1618_v28 = vmax.f32 %v1432_v23, 0.0  ;;  %v1459_v29 = vpop.f32.mrf.mxu0  ;;  %v751_v23 = vperm.slane %v734_v57, 6 }
 0x189   : > { %v1619_v31 = vmax.f32 %v1445_v25, 0.0 }
 0x18a   : > { %v1633_v16 = vpack.c.bf16 %v1618_v28, %v1617_v27 }
 0x18b   : > { %v1634_v32 = vpack.c.bf16 %v1620_v30, %v1619_v31 }
 0x18c   : > { %1641 = vst [vmem:[#allocation2 + $0x30] sm:$0xff] %v1633_v16 }
 0x18d   : > { %1642 = vst [vmem:[#allocation2] sm:$0xff] %v1634_v32  ;;  %v1433_v33 = vpop.f32.mrf.mxu2 }
 0x18e   : > { %v1446_v34 = vpop.f32.mrf.mxu3 }
 0x18f   : > { %v1470_v35 = vpop.f32.mrf.mxu1 }
 0x190   : > { %v1509_v37 = vpop.f32.mrf.mxu0  ;;  %v1471_v41 = vadd.f32 %v1470_v35, %v741_v36 }
 0x191   : > { %v1510_v42 = vadd.f32 %v1509_v37, %v744_v38 }
 0x192   : > { %v1621_v48 = vmax.f32 %v1471_v41, 0.0 }
 0x193   : > { %v1624_v51 = vmax.f32 %v1510_v42, 0.0 }
 0x195   : > { %v1483_v43 = vpop.f32.mrf.mxu2 }
 0x196   : > { %v1484_v44 = vadd.f32 %v1483_v43, %v742_v39  ;;  %v1496_v45 = vpop.f32.mrf.mxu3 }
 0x197   : > { %v1497_v46 = vadd.f32 %v1496_v45, %v743_v40  ;;  %v1472_v47 = vpop.f32.mrf.mxu1 }
 0x198   : > { %v1622_v49 = vmax.f32 %v1484_v44, 0.0  ;;  %v1511_v50 = vpop.f32.mrf.mxu0 }
 0x199   : > { %v1623_v52 = vmax.f32 %v1497_v46, 0.0 }
 0x19a   : > { %v1635_v53 = vpack.c.bf16 %v1622_v49, %v1621_v48 }
 0x19b   : > { %v1636_v54 = vpack.c.bf16 %v1624_v51, %v1623_v52 }
 0x19c   : > { %1643 = vst [vmem:[#allocation2 + $0x18] sm:$0xff] %v1635_v53 }
 0x19d   : > { %1644 = vst [vmem:[#allocation2 + $0x10] sm:$0xff] %v1636_v54  ;;  %v1485_v55 = vpop.f32.mrf.mxu2 }
 0x19e   : > { %v1498_v56 = vpop.f32.mrf.mxu3 }
 0x1a0   : > { %v1522_v58 = vpop.f32.mrf.mxu1 }
 0x1a1   : > { %v1523_v0 = vadd.f32 %v1522_v58, %v745_v59 }
 0x1a3   : > { %v1561_v60 = vpop.f32.mrf.mxu0  ;;  %v1625_v7 = vmax.f32 %v1523_v0, 0.0 }
 0x1a4   : > { %v1562_v1 = vadd.f32 %v1561_v60, %v748_v61 }
 0x1a6   : > { %v1535_v2 = vpop.f32.mrf.mxu2  ;;  %v1628_v10 = vmax.f32 %v1562_v1, 0.0 }
 0x1a7   : > { %v1536_v3 = vadd.f32 %v1535_v2, %v746_v62 }
 0x1a8   : > { %v1524_v6 = vpop.f32.mrf.mxu1 }
 0x1a9   : > { %v1548_v4 = vpop.f32.mrf.mxu3  ;;  %v1626_v8 = vmax.f32 %v1536_v3, 0.0 }
 0x1aa   : > { %v1549_v5 = vadd.f32 %v1548_v4, %v747_v63 }
 0x1ab   : > { %v1563_v9 = vpop.f32.mrf.mxu0  ;;  %v1637_v12 = vpack.c.bf16 %v1626_v8, %v1625_v7 }
 0x1ac   : > { %v1627_v11 = vmax.f32 %v1549_v5, 0.0 }
 0x1ad   : > { %1645 = vst [vmem:[#allocation2 + $0x8] sm:$0xff] %v1637_v12 }
 0x1ae   : > { %v1638_v13 = vpack.c.bf16 %v1628_v10, %v1627_v11  ;;  %v1537_v15 = vpop.f32.mrf.mxu2 }
 0x1b0   : > { %1646 = vst [vmem:[#allocation2 + $0x20] sm:$0xff] %v1638_v13 }
 0x1b1   : > { %v1550_v17 = vpop.f32.mrf.mxu3 }
 0x1c0   : > { %v1574_v18 = vpop.f32.mrf.mxu1 }
 0x1c1   : > { %v1613_v20 = vpop.f32.mrf.mxu0  ;;  %v1575_v24 = vadd.f32 %v1574_v18, %v749_v19 }
 0x1c2   : > { %v1614_v25 = vadd.f32 %v1613_v20, %v752_v21 }
 0x1c3   : > { %v1629_v31 = vmax.f32 %v1575_v24, 0.0 }
 0x1c4   : > { %v1632_v33 = vmax.f32 %v1614_v25, 0.0 }
 0x1c6   : > { %v1587_v26 = vpop.f32.mrf.mxu2 }
 0x1c7   : > { %v1588_v27 = vadd.f32 %v1587_v26, %v750_v22  ;;  %v1600_v28 = vpop.f32.mrf.mxu3 }
 0x1c8   : > { %v1601_v29 = vadd.f32 %v1600_v28, %v751_v23  ;;  %v1576_v30 = vpop.f32.mrf.mxu1 }
 0x1c9   : > { %v1630_v16 = vmax.f32 %v1588_v27, 0.0  ;;  %v1615_v32 = vpop.f32.mrf.mxu0 }
 0x1ca   : > { %v1631_v34 = vmax.f32 %v1601_v29, 0.0 }
 0x1cb   : > { %v1639_v35 = vpack.c.bf16 %v1630_v16, %v1629_v31 }
 0x1cc   : > { %v1640_v36 = vpack.c.bf16 %v1632_v33, %v1631_v34 }
 0x1cd   : > { %1647 = vst [vmem:[#allocation2 + $0x28] sm:$0xff] %v1639_v35 }
 0x1ce   : > { %1648 = vst [vmem:[#allocation2 + $0x38] sm:$0xff] %v1640_v36  ;;  %v1589_v37 = vpop.f32.mrf.mxu2 }
 0x1cf   : > { %v1602_v38 = vpop.f32.mrf.mxu3 }
 0x1d0 PF: > { %v6842_v39 = vld [vmem:[%s10325_s28 + $0xe0] sm:$0xf]  ;;  %v9100_v40 = vld [vmem:[%s10325_s28 + $0xec] sm:$0xf0]  ;;  %p8904_p1 = scmp.ne.s32.totalorder %s10168_s25, 3 }
 0x1d1   : > { %v6970_v41 = vld [vmem:[%s10325_s28 + $0x1e0] sm:$0xf]  ;;  %v6843_v42 = vor.u32 %v9100_v40, %v6842_v39  ;;  %v9132_v43 = vld [vmem:[%s10325_s28 + $0x1ec] sm:$0xf0] }
 0x1d2   : > { %v7098_v44 = vld [vmem:[%s10325_s28 + $0x2e0] sm:$0xf]  ;;  %v9164_v45 = vld [vmem:[%s10325_s28 + $0x2ec] sm:$0xf0]  ;;  %v6971_v46 = vor.u32 %v9132_v43, %v6970_v41 }
 0x1d3   : > { %v7099_v47 = vor.u32 %v9164_v45, %v7098_v44  ;;  %v7226_v48 = vld [vmem:[%s10325_s28 + $0x3e0] sm:$0xf]  ;;  %v9196_v49 = vld [vmem:[%s10325_s28 + $0x3ec] sm:$0xf0]  ;;  %4796 = vmatpush.bf16.msra.mxu0 %v6843_v42 }
 0x1d4   : > { %v6826_v50 = vld [vmem:[%s10325_s28 + $0xc0] sm:$0xf]  ;;  %v7227_v51 = vor.u32 %v9196_v49, %v7226_v48  ;;  %v9096_v52 = vld [vmem:[%s10325_s28 + $0xcc] sm:$0xf0]  ;;  %4809 = vmatpush.bf16.msra.mxu1 %v6971_v46 }
 0x1d5   : > { %v6954_v53 = vld [vmem:[%s10325_s28 + $0x1c0] sm:$0xf]  ;;  %v9128_v54 = vld [vmem:[%s10325_s28 + $0x1cc] sm:$0xf0]  ;;  %4822 = vmatpush.bf16.msra.mxu2 %v7099_v47  ;;  %v6827_v55 = vor.u32 %v9096_v52, %v6826_v50 }
 0x1d6   : > { %v6955_v56 = vor.u32 %v9128_v54, %v6954_v53  ;;  %v7082_v57 = vld [vmem:[%s10325_s28 + $0x2c0] sm:$0xf]  ;;  %v9160_v58 = vld [vmem:[%s10325_s28 + $0x2cc] sm:$0xf0]  ;;  %4835 = vmatpush.bf16.msra.mxu3 %v7227_v51 }
 0x1d7   : > { %v7210_v59 = vld [vmem:[%s10325_s28 + $0x3c0] sm:$0xf]  ;;  %v7083_v60 = vor.u32 %v9160_v58, %v7082_v57  ;;  %v9192_v61 = vld [vmem:[%s10325_s28 + $0x3cc] sm:$0xf0]  ;;  %4797 = vmatpush.bf16.msra.mxu0 %v6827_v55 }
 0x1d8   : > { %v6810_v62 = vld [vmem:[%s10325_s28 + $0xa0] sm:$0xf]  ;;  %v9092_v63 = vld [vmem:[%s10325_s28 + $0xac] sm:$0xf0]  ;;  %v7211_v0 = vor.u32 %v9192_v61, %v7210_v59  ;;  %4810 = vmatpush.bf16.msra.mxu1 %v6955_v56 }
 0x1d9   : > { %v6938_v1 = vld [vmem:[%s10325_s28 + $0x1a0] sm:$0xf]  ;;  %v9124_v2 = vld [vmem:[%s10325_s28 + $0x1ac] sm:$0xf0]  ;;  %v6811_v4 = vor.u32 %v9092_v63, %v6810_v62  ;;  %4823 = vmatpush.bf16.msra.mxu2 %v7083_v60 }
 0x1da   : > { %v7066_v3 = vld [vmem:[%s10325_s28 + $0x2a0] sm:$0xf]  ;;  %v9156_v5 = vld [vmem:[%s10325_s28 + $0x2ac] sm:$0xf0]  ;;  %v6939_v8 = vor.u32 %v9124_v2, %v6938_v1  ;;  %4836 = vmatpush.bf16.msra.mxu3 %v7211_v0 }
 0x1db   : > { %v7194_v6 = vld [vmem:[%s10325_s28 + $0x3a0] sm:$0xf]  ;;  %v9188_v7 = vld [vmem:[%s10325_s28 + $0x3ac] sm:$0xf0]  ;;  %v7067_v9 = vor.u32 %v9156_v5, %v7066_v3  ;;  %4798 = vmatpush.bf16.msra.mxu0 %v6811_v4 }
 0x1dc   : > { %v6794_v10 = vld [vmem:[%s10325_s28 + $0x80] sm:$0xf]  ;;  %v9088_v11 = vld [vmem:[%s10325_s28 + $0x8c] sm:$0xf0]  ;;  %v7195_v13 = vor.u32 %v9188_v7, %v7194_v6  ;;  %4811 = vmatpush.bf16.msra.mxu1 %v6939_v8 }
 0x1dd   : > { %v6922_v12 = vld [vmem:[%s10325_s28 + $0x180] sm:$0xf]  ;;  %v9120_v14 = vld [vmem:[%s10325_s28 + $0x18c] sm:$0xf0]  ;;  %v6795_v20 = vor.u32 %v9088_v11, %v6794_v10  ;;  %4824 = vmatpush.bf16.msra.mxu2 %v7067_v9 }
 0x1de   : > { %v7050_v15 = vld [vmem:[%s10325_s28 + $0x280] sm:$0xf]  ;;  %v9152_v17 = vld [vmem:[%s10325_s28 + $0x28c] sm:$0xf0]  ;;  %v6923_v21 = vor.u32 %v9120_v14, %v6922_v12  ;;  %4837 = vmatpush.bf16.msra.mxu3 %v7195_v13 }
 0x1df   : > { %v7178_v18 = vld [vmem:[%s10325_s28 + $0x380] sm:$0xf]  ;;  %v9184_v19 = vld [vmem:[%s10325_s28 + $0x38c] sm:$0xf0]  ;;  %v7051_v22 = vor.u32 %v9152_v17, %v7050_v15  ;;  %4799 = vmatpush.bf16.msra.mxu0 %v6795_v20 }
 0x1e0   : > { %v6778_v23 = vld [vmem:[%s10325_s28 + $0x60] sm:$0xf]  ;;  %v9084_v24 = vld [vmem:[%s10325_s28 + $0x6c] sm:$0xf0]  ;;  %v7179_v26 = vor.u32 %v9184_v19, %v7178_v18  ;;  %4812 = vmatpush.bf16.msra.mxu1 %v6923_v21 }
 0x1e1   : > { %v6906_v25 = vld [vmem:[%s10325_s28 + $0x160] sm:$0xf]  ;;  %v9116_v27 = vld [vmem:[%s10325_s28 + $0x16c] sm:$0xf0]  ;;  %v6779_v16 = vor.u32 %v9084_v24, %v6778_v23  ;;  %4825 = vmatpush.bf16.msra.mxu2 %v7051_v22 }
 0x1e2   : > { %v7034_v28 = vld [vmem:[%s10325_s28 + $0x260] sm:$0xf]  ;;  %v9148_v29 = vld [vmem:[%s10325_s28 + $0x26c] sm:$0xf0]  ;;  %v6907_v32 = vor.u32 %v9116_v27, %v6906_v25  ;;  %4838 = vmatpush.bf16.msra.mxu3 %v7179_v26 }
 0x1e3   : > { %v7162_v30 = vld [vmem:[%s10325_s28 + $0x360] sm:$0xf]  ;;  %v9180_v31 = vld [vmem:[%s10325_s28 + $0x36c] sm:$0xf0]  ;;  %v7035_v33 = vor.u32 %v9148_v29, %v7034_v28  ;;  %4800 = vmatpush.bf16.msra.mxu0 %v6779_v16 }
 0x1e4   : > { %v6762_v34 = vld [vmem:[%s10325_s28 + $0x40] sm:$0xf]  ;;  %v9080_v35 = vld [vmem:[%s10325_s28 + $0x4c] sm:$0xf0]  ;;  %v7163_v37 = vor.u32 %v9180_v31, %v7162_v30  ;;  %4813 = vmatpush.bf16.msra.mxu1 %v6907_v32 }
 0x1e5   : > { %v6890_v36 = vld [vmem:[%s10325_s28 + $0x140] sm:$0xf]  ;;  %v9112_v38 = vld [vmem:[%s10325_s28 + $0x14c] sm:$0xf0]  ;;  %v6763_v43 = vor.u32 %v9080_v35, %v6762_v34  ;;  %4826 = vmatpush.bf16.msra.mxu2 %v7035_v33 }
 0x1e6   : > { %v7018_v39 = vld [vmem:[%s10325_s28 + $0x240] sm:$0xf]  ;;  %v9144_v40 = vld [vmem:[%s10325_s28 + $0x24c] sm:$0xf0]  ;;  %v6891_v44 = vor.u32 %v9112_v38, %v6890_v36  ;;  %4839 = vmatpush.bf16.msra.mxu3 %v7163_v37 }
 0x1e7   : > { %v7146_v41 = vld [vmem:[%s10325_s28 + $0x340] sm:$0xf]  ;;  %v9176_v42 = vld [vmem:[%s10325_s28 + $0x34c] sm:$0xf0]  ;;  %v7019_v45 = vor.u32 %v9144_v40, %v7018_v39  ;;  %4801 = vmatpush.bf16.msra.mxu0 %v6763_v43 }
 0x1e8   : > { %v6746_v46 = vld [vmem:[%s10325_s28 + $0x20] sm:$0xf]  ;;  %v9076_v47 = vld [vmem:[%s10325_s28 + $0x2c] sm:$0xf0]  ;;  %v7147_v49 = vor.u32 %v9176_v42, %v7146_v41  ;;  %4814 = vmatpush.bf16.msra.mxu1 %v6891_v44  ;;  %v1651_v41 = vld [vmem:[#allocation2] sm:$0xff] }
 0x1e9   : > { %v6874_v48 = vld [vmem:[%s10325_s28 + $0x120] sm:$0xf]  ;;  %v9108_v50 = vld [vmem:[%s10325_s28 + $0x12c] sm:$0xf0]  ;;  %v6747_v55 = vor.u32 %v9076_v47, %v6746_v46  ;;  %4827 = vmatpush.bf16.msra.mxu2 %v7019_v45  ;;  %v1650_v42 = vld [vmem:[#allocation2 + $0x30] sm:$0xff]  ;;  %v2190_v47 = vunpack.c.l.b16 %v1651_v41 }
 0x1ea   : > { %v7002_v51 = vld [vmem:[%s10325_s28 + $0x220] sm:$0xf]  ;;  %v9140_v52 = vld [vmem:[%s10325_s28 + $0x22c] sm:$0xf0]  ;;  %v6875_v58 = vor.u32 %v9108_v50, %v6874_v48  ;;  %4840 = vmatpush.bf16.msra.mxu3 %v7147_v49  ;;  %v2188_v48 = vunpack.c.l.b16 %v1650_v42  ;;  %v2191_v49 = vunpack.c.h.b16 %v1651_v41 }
 0x1eb   : > { %v7130_v53 = vld [vmem:[%s10325_s28 + $0x320] sm:$0xf]  ;;  %v9172_v54 = vld [vmem:[%s10325_s28 + $0x32c] sm:$0xf0]  ;;  %v7003_v59 = vor.u32 %v9140_v52, %v7002_v51  ;;  %4802 = vmatpush.bf16.msra.mxu0 %v6747_v55 }
 0x1ec   : > { %v6730_v56 = vld [vmem:[%s10325_s28] sm:$0xf]  ;;  %v9072_v57 = vld [vmem:[%s10325_s28 + $0xc] sm:$0xf0]  ;;  %v7131_v63 = vor.u32 %v9172_v54, %v7130_v53  ;;  %4815 = vmatpush.bf16.msra.mxu1 %v6875_v58  ;;  %v2189_v54 = vunpack.c.h.b16 %v1650_v42  ;;  %v10462_v58 = vpack.c.b16 %v2188_v48, %v2188_v48  ;;  %v1653_v42 = vld [vmem:[#allocation2 + $0x10] sm:$0xff] }
 0x1ed   : > { %v6858_v60 = vld [vmem:[%s10325_s28 + $0x100] sm:$0xf]  ;;  %v9104_v61 = vld [vmem:[%s10325_s28 + $0x10c] sm:$0xf0]  ;;  %v6731_v6 = vor.u32 %v9072_v57, %v6730_v56  ;;  %4828 = vmatpush.bf16.msra.mxu2 %v7003_v59  ;;  %v10460_v57 = vpack.c.b16 %v2190_v47, %v2190_v47  ;;  %v10464_v59 = vpack.c.b16 %v2191_v49, %v2191_v49 }
 0x1ee   : > { %v6986_v62 = vld [vmem:[%s10325_s28 + $0x200] sm:$0xf]  ;;  %v9136_v0 = vld [vmem:[%s10325_s28 + $0x20c] sm:$0xf0]  ;;  %v6859_v10 = vor.u32 %v9104_v61, %v6858_v60  ;;  %4841 = vmatpush.bf16.msra.mxu3 %v7131_v63  ;;  %v10466_v61 = vpack.c.b16 %v2189_v54, %v2189_v54  ;;  %v2194_v54 = vunpack.c.l.b16 %v1653_v42 }
 0x1ef   : > { %v7114_v1 = vld [vmem:[%s10325_s28 + $0x300] sm:$0xf]  ;;  %v9168_v2 = vld [vmem:[%s10325_s28 + $0x30c] sm:$0xf0]  ;;  %v6987_v11 = vor.u32 %v9136_v0, %v6986_v62  ;;  %4803 = vmatpush.bf16.msra.mxu0 %v6731_v6 }
 0x1f0   : > { %v7354_v3 = vld [vmem:[%s10325_s28 + $0x4e0] sm:$0xf]  ;;  %v9228_v4 = vld [vmem:[%s10325_s28 + $0x4ec] sm:$0xf0]  ;;  %v7115_v14 = vor.u32 %v9168_v2, %v7114_v1  ;;  %4816 = vmatpush.bf16.msra.mxu1 %v6859_v10 }
 0x1f1   : > { %v7482_v5 = vld [vmem:[%s10325_s28 + $0x5e0] sm:$0xf]  ;;  %v9260_v7 = vld [vmem:[%s10325_s28 + $0x5ec] sm:$0xf0]  ;;  %v7355_v15 = vor.u32 %v9228_v4, %v7354_v3  ;;  %4829 = vmatpush.bf16.msra.mxu2 %v6987_v11 }
 0x1f2   : > { %v7610_v8 = vld [vmem:[%s10325_s28 + $0x6e0] sm:$0xf]  ;;  %v9292_v9 = vld [vmem:[%s10325_s28 + $0x6ec] sm:$0xf0]  ;;  %v7483_v17 = vor.u32 %v9260_v7, %v7482_v5  ;;  %4842 = vmatpush.bf16.msra.mxu3 %v7115_v14  ;;  %4804 = vmatmul.bf16.vlgmr.msra.gmra.mxu0 %v10462_v58 }
 0x1f3   : > { %v7738_v12 = vld [vmem:[%s10325_s28 + $0x7e0] sm:$0xf]  ;;  %v9324_v13 = vld [vmem:[%s10325_s28 + $0x7ec] sm:$0xf0]  ;;  %v7611_v18 = vor.u32 %v9292_v9, %v7610_v8  ;;  %4848 = vmatpush.bf16.msrb.mxu0 %v7355_v15  ;;  %4817 = vmatmul.bf16.vlgmr.msra.gmra.mxu1 %v10466_v61 }
 0x1f4   : > { %v7338_v19 = vld [vmem:[%s10325_s28 + $0x4c0] sm:$0xf]  ;;  %v9224_v20 = vld [vmem:[%s10325_s28 + $0x4cc] sm:$0xf0]  ;;  %v7739_v22 = vor.u32 %v9324_v13, %v7738_v12  ;;  %4861 = vmatpush.bf16.msrb.mxu1 %v7483_v17  ;;  %4830 = vmatmul.bf16.vlgmr.msra.gmra.mxu2 %v10460_v57 }
 0x1f5   : > { %v7466_v21 = vld [vmem:[%s10325_s28 + $0x5c0] sm:$0xf]  ;;  %v9256_v23 = vld [vmem:[%s10325_s28 + $0x5cc] sm:$0xf0]  ;;  %v7339_v28 = vor.u32 %v9224_v20, %v7338_v19  ;;  %4874 = vmatpush.bf16.msrb.mxu2 %v7611_v18  ;;  %4843 = vmatmul.bf16.vlgmr.msra.gmra.mxu3 %v10464_v59 }
 0x1f6   : > { %v7594_v24 = vld [vmem:[%s10325_s28 + $0x6c0] sm:$0xf]  ;;  %v9288_v25 = vld [vmem:[%s10325_s28 + $0x6cc] sm:$0xf0]  ;;  %v7467_v30 = vor.u32 %v9256_v23, %v7466_v21  ;;  %4887 = vmatpush.bf16.msrb.mxu3 %v7739_v22 }
 0x1f7   : > { %v7722_v26 = vld [vmem:[%s10325_s28 + $0x7c0] sm:$0xf]  ;;  %v9320_v27 = vld [vmem:[%s10325_s28 + $0x7cc] sm:$0xf0]  ;;  %v7595_v31 = vor.u32 %v9288_v25, %v7594_v24  ;;  %4849 = vmatpush.bf16.msrb.mxu0 %v7339_v28 }
 0x1f8   : > { %v7322_v29 = vld [vmem:[%s10325_s28 + $0x4a0] sm:$0xf]  ;;  %v9220_v16 = vld [vmem:[%s10325_s28 + $0x4ac] sm:$0xf0]  ;;  %v7723_v34 = vor.u32 %v9320_v27, %v7722_v26  ;;  %4862 = vmatpush.bf16.msrb.mxu1 %v7467_v30 }
 0x1f9   : > { %v7450_v32 = vld [vmem:[%s10325_s28 + $0x5a0] sm:$0xf]  ;;  %v9252_v33 = vld [vmem:[%s10325_s28 + $0x5ac] sm:$0xf0]  ;;  %v7323_v39 = vor.u32 %v9220_v16, %v7322_v29  ;;  %4875 = vmatpush.bf16.msrb.mxu2 %v7595_v31 }
 0x1fa   : > { %v7578_v35 = vld [vmem:[%s10325_s28 + $0x6a0] sm:$0xf]  ;;  %v9284_v36 = vld [vmem:[%s10325_s28 + $0x6ac] sm:$0xf0]  ;;  %v7451_v40 = vor.u32 %v9252_v33, %v7450_v32  ;;  %4888 = vmatpush.bf16.msrb.mxu3 %v7723_v34 }
 0x1fb   : > { %v7706_v37 = vld [vmem:[%s10325_s28 + $0x7a0] sm:$0xf]  ;;  %v9316_v38 = vld [vmem:[%s10325_s28 + $0x7ac] sm:$0xf0]  ;;  %v7579_v43 = vor.u32 %v9284_v36, %v7578_v35  ;;  %4850 = vmatpush.bf16.msrb.mxu0 %v7323_v39 }
 0x1fc   : > { %v7306_v44 = vld [vmem:[%s10325_s28 + $0x480] sm:$0xf]  ;;  %v9216_v45 = vld [vmem:[%s10325_s28 + $0x48c] sm:$0xf0]  ;;  %v7707_v50 = vor.u32 %v9316_v38, %v7706_v37  ;;  %4863 = vmatpush.bf16.msrb.mxu1 %v7451_v40 }
 0x1fd   : > { %v7434_v46 = vld [vmem:[%s10325_s28 + $0x580] sm:$0xf]  ;;  %v9248_v51 = vld [vmem:[%s10325_s28 + $0x58c] sm:$0xf0]  ;;  %v7307_v60 = vor.u32 %v9216_v45, %v7306_v44  ;;  %4876 = vmatpush.bf16.msrb.mxu2 %v7579_v43 }
 0x1fe   : > { %v7562_v52 = vld [vmem:[%s10325_s28 + $0x680] sm:$0xf]  ;;  %v9280_v53 = vld [vmem:[%s10325_s28 + $0x68c] sm:$0xf0]  ;;  %v7435_v62 = vor.u32 %v9248_v51, %v7434_v46  ;;  %4889 = vmatpush.bf16.msrb.mxu3 %v7707_v50 }
 0x1ff   : > { %v7690_v55 = vld [vmem:[%s10325_s28 + $0x780] sm:$0xf]  ;;  %v9312_v56 = vld [vmem:[%s10325_s28 + $0x78c] sm:$0xf0]  ;;  %v7563_v63 = vor.u32 %v9280_v53, %v7562_v52  ;;  %4851 = vmatpush.bf16.msrb.mxu0 %v7307_v60 }
 0x200   : > { %v7290_v0 = vld [vmem:[%s10325_s28 + $0x460] sm:$0xf]  ;;  %v9212_v1 = vld [vmem:[%s10325_s28 + $0x46c] sm:$0xf0]  ;;  %v7691_v3 = vor.u32 %v9312_v56, %v7690_v55  ;;  %4864 = vmatpush.bf16.msrb.mxu1 %v7435_v62 }
 0x201   : > { %v7418_v2 = vld [vmem:[%s10325_s28 + $0x560] sm:$0xf]  ;;  %v9244_v4 = vld [vmem:[%s10325_s28 + $0x56c] sm:$0xf0]  ;;  %v7291_v9 = vor.u32 %v9212_v1, %v7290_v0  ;;  %4877 = vmatpush.bf16.msrb.mxu2 %v7563_v63  ;;  %v2195_v0 = vunpack.c.h.b16 %v1653_v42 }
 0x202   : > { %v7546_v5 = vld [vmem:[%s10325_s28 + $0x660] sm:$0xf]  ;;  %v9276_v6 = vld [vmem:[%s10325_s28 + $0x66c] sm:$0xf0]  ;;  %v7419_v10 = vor.u32 %v9244_v4, %v7418_v2  ;;  %4890 = vmatpush.bf16.msrb.mxu3 %v7691_v3 }
 0x203   : > { %v7674_v7 = vld [vmem:[%s10325_s28 + $0x760] sm:$0xf]  ;;  %v9308_v8 = vld [vmem:[%s10325_s28 + $0x76c] sm:$0xf0]  ;;  %v7547_v11 = vor.u32 %v9276_v6, %v7546_v5  ;;  %4852 = vmatpush.bf16.msrb.mxu0 %v7291_v9 }
 0x204   : > { %v7274_v12 = vld [vmem:[%s10325_s28 + $0x440] sm:$0xf]  ;;  %v9208_v13 = vld [vmem:[%s10325_s28 + $0x44c] sm:$0xf0]  ;;  %v7675_v15 = vor.u32 %v9308_v8, %v7674_v7  ;;  %4865 = vmatpush.bf16.msrb.mxu1 %v7419_v10 }
 0x205   : > { %v7402_v14 = vld [vmem:[%s10325_s28 + $0x540] sm:$0xf]  ;;  %v9240_v17 = vld [vmem:[%s10325_s28 + $0x54c] sm:$0xf0]  ;;  %v7275_v22 = vor.u32 %v9208_v13, %v7274_v12  ;;  %4878 = vmatpush.bf16.msrb.mxu2 %v7547_v11  ;;  %v10518_v13 = vpack.c.b16 %v2194_v54, %v2194_v54 }
 0x206   : > { %v7530_v18 = vld [vmem:[%s10325_s28 + $0x640] sm:$0xf]  ;;  %v9272_v19 = vld [vmem:[%s10325_s28 + $0x64c] sm:$0xf0]  ;;  %v7403_v23 = vor.u32 %v9240_v17, %v7402_v14  ;;  %4891 = vmatpush.bf16.msrb.mxu3 %v7675_v15 }
 0x207   : > { %v7658_v20 = vld [vmem:[%s10325_s28 + $0x740] sm:$0xf]  ;;  %v9304_v21 = vld [vmem:[%s10325_s28 + $0x74c] sm:$0xf0]  ;;  %v7531_v24 = vor.u32 %v9272_v19, %v7530_v18  ;;  %4853 = vmatpush.bf16.msrb.mxu0 %v7275_v22  ;;  %v10524_v18 = vpack.c.b16 %v2195_v0, %v2195_v0 }
 0x208   : > { %v7258_v25 = vld [vmem:[%s10325_s28 + $0x420] sm:$0xf]  ;;  %v9204_v26 = vld [vmem:[%s10325_s28 + $0x42c] sm:$0xf0]  ;;  %v7659_v28 = vor.u32 %v9304_v21, %v7658_v20  ;;  %4866 = vmatpush.bf16.msrb.mxu1 %v7403_v23 }
 0x209   : > { %v7386_v27 = vld [vmem:[%s10325_s28 + $0x520] sm:$0xf]  ;;  %v9236_v29 = vld [vmem:[%s10325_s28 + $0x52c] sm:$0xf0]  ;;  %v7259_v34 = vor.u32 %v9204_v26, %v7258_v25  ;;  %4879 = vmatpush.bf16.msrb.mxu2 %v7531_v24 }
 0x20a   : > { %v7514_v30 = vld [vmem:[%s10325_s28 + $0x620] sm:$0xf]  ;;  %v9268_v31 = vld [vmem:[%s10325_s28 + $0x62c] sm:$0xf0]  ;;  %v7387_v38 = vor.u32 %v9236_v29, %v7386_v27  ;;  %4892 = vmatpush.bf16.msrb.mxu3 %v7659_v28 }
 0x20b   : > { %v7642_v16 = vld [vmem:[%s10325_s28 + $0x720] sm:$0xf]  ;;  %v9300_v32 = vld [vmem:[%s10325_s28 + $0x72c] sm:$0xf0]  ;;  %v7515_v39 = vor.u32 %v9268_v31, %v7514_v30  ;;  %4854 = vmatpush.bf16.msrb.mxu0 %v7259_v34 }
 0x20c   : > { %v7242_v33 = vld [vmem:[%s10325_s28 + $0x400] sm:$0xf]  ;;  %v9200_v35 = vld [vmem:[%s10325_s28 + $0x40c] sm:$0xf0]  ;;  %v7643_v43 = vor.u32 %v9300_v32, %v7642_v16  ;;  %4867 = vmatpush.bf16.msrb.mxu1 %v7387_v38 }
 0x20d   : > { %v7370_v36 = vld [vmem:[%s10325_s28 + $0x500] sm:$0xf]  ;;  %v9232_v37 = vld [vmem:[%s10325_s28 + $0x50c] sm:$0xf0]  ;;  %v7243_v50 = vor.u32 %v9200_v35, %v7242_v33  ;;  %4880 = vmatpush.bf16.msrb.mxu2 %v7515_v39 }
 0x20e   : > { %v7498_v40 = vld [vmem:[%s10325_s28 + $0x600] sm:$0xf]  ;;  %v9264_v41 = vld [vmem:[%s10325_s28 + $0x60c] sm:$0xf0]  ;;  %v7371_v55 = vor.u32 %v9232_v37, %v7370_v36  ;;  %4893 = vmatpush.bf16.msrb.mxu3 %v7643_v43 }
 0x20f   : > { %v7626_v44 = vld [vmem:[%s10325_s28 + $0x700] sm:$0xf]  ;;  %v9296_v45 = vld [vmem:[%s10325_s28 + $0x70c] sm:$0xf0]  ;;  %v7499_v56 = vor.u32 %v9264_v41, %v7498_v40  ;;  %4855 = vmatpush.bf16.msrb.mxu0 %v7243_v50 }
 0x210   : > { %v1652_v46 = vld [vmem:[#allocation2 + $0x18] sm:$0xff]  ;;  %v7866_v47 = vld [vmem:[%s10325_s28 + $0x8e0] sm:$0xf]  ;;  %v7627_v1 = vor.u32 %v9296_v45, %v7626_v44  ;;  %4868 = vmatpush.bf16.msrb.mxu1 %v7371_v55 }
 0x211   : > { %v9356_v48 = vld [vmem:[%s10325_s28 + $0x8ec] sm:$0xf0]  ;;  %v7994_v49 = vld [vmem:[%s10325_s28 + $0x9e0] sm:$0xf]  ;;  %v2192_v63 = vunpack.c.l.b16 %v1652_v46  ;;  %v2193_v3 = vunpack.c.h.b16 %v1652_v46  ;;  %4881 = vmatpush.bf16.msrb.mxu2 %v7499_v56 }
 0x212   : > { %v9388_v51 = vld [vmem:[%s10325_s28 + $0x9ec] sm:$0xf0]  ;;  %v8122_v52 = vld [vmem:[%s10325_s28 + $0xae0] sm:$0xf]  ;;  %v7867_v2 = vor.u32 %v9356_v48, %v7866_v47  ;;  %4894 = vmatpush.bf16.msrb.mxu3 %v7627_v1 }
 0x213   : > { %v9420_v53 = vld [vmem:[%s10325_s28 + $0xaec] sm:$0xf0]  ;;  %v8250_v60 = vld [vmem:[%s10325_s28 + $0xbe0] sm:$0xf]  ;;  %v7995_v4 = vor.u32 %v9388_v51, %v7994_v49  ;;  %v10522_v17 = vpack.c.b16 %v2192_v63, %v2192_v63  ;;  %v10526_v20 = vpack.c.b16 %v2193_v3, %v2193_v3 }
 0x214   : > { %v9452_v62 = vld [vmem:[%s10325_s28 + $0xbec] sm:$0xf0]  ;;  %v8123_v5 = vor.u32 %v9420_v53, %v8122_v52  ;;  %v7850_v6 = vld [vmem:[%s10325_s28 + $0x8c0] sm:$0xf]  ;;  %4900 = vmatpush.bf16.msra.mxu0 %v7867_v2  ;;  %4882 = vmatmul.bf16.vlgmr.msrb.gmra.mxu2 %v10518_v13 }
 0x215   : > { %v9352_v7 = vld [vmem:[%s10325_s28 + $0x8cc] sm:$0xf0]  ;;  %v7978_v8 = vld [vmem:[%s10325_s28 + $0x9c0] sm:$0xf]  ;;  %v8251_v9 = vor.u32 %v9452_v62, %v8250_v60  ;;  %4913 = vmatpush.bf16.msra.mxu1 %v7995_v4  ;;  %4856 = vmatmul.bf16.vlgmr.msrb.gmra.mxu0 %v10522_v17 }
 0x216   : > { %v9384_v10 = vld [vmem:[%s10325_s28 + $0x9cc] sm:$0xf0]  ;;  %v8106_v11 = vld [vmem:[%s10325_s28 + $0xac0] sm:$0xf]  ;;  %v7851_v19 = vor.u32 %v9352_v7, %v7850_v6  ;;  %4926 = vmatpush.bf16.msra.mxu2 %v8123_v5  ;;  %4895 = vmatmul.bf16.vlgmr.msrb.gmra.mxu3 %v10524_v18 }
 0x217   : > { %v9416_v12 = vld [vmem:[%s10325_s28 + $0xacc] sm:$0xf0]  ;;  %v8234_v14 = vld [vmem:[%s10325_s28 + $0xbc0] sm:$0xf]  ;;  %v7979_v21 = vor.u32 %v9384_v10, %v7978_v8  ;;  %4939 = vmatpush.bf16.msra.mxu3 %v8251_v9  ;;  %4869 = vmatmul.bf16.vlgmr.msrb.gmra.mxu1 %v10526_v20 }
 0x218   : > { %v9448_v15 = vld [vmem:[%s10325_s28 + $0xbcc] sm:$0xf0]  ;;  %v8107_v22 = vor.u32 %v9416_v12, %v8106_v11  ;;  %v7834_v23 = vld [vmem:[%s10325_s28 + $0x8a0] sm:$0xf]  ;;  %4901 = vmatpush.bf16.msra.mxu0 %v7851_v19 }
 0x219   : > { %v9348_v24 = vld [vmem:[%s10325_s28 + $0x8ac] sm:$0xf0]  ;;  %v7962_v25 = vld [vmem:[%s10325_s28 + $0x9a0] sm:$0xf]  ;;  %v8235_v26 = vor.u32 %v9448_v15, %v8234_v14  ;;  %4914 = vmatpush.bf16.msra.mxu1 %v7979_v21 }
 0x21a   : > { %v9380_v27 = vld [vmem:[%s10325_s28 + $0x9ac] sm:$0xf0]  ;;  %v8090_v28 = vld [vmem:[%s10325_s28 + $0xaa0] sm:$0xf]  ;;  %v7835_v16 = vor.u32 %v9348_v24, %v7834_v23  ;;  %4927 = vmatpush.bf16.msra.mxu2 %v8107_v22 }
 0x21b   : > { %v9412_v29 = vld [vmem:[%s10325_s28 + $0xaac] sm:$0xf0]  ;;  %v8218_v30 = vld [vmem:[%s10325_s28 + $0xba0] sm:$0xf]  ;;  %v7963_v32 = vor.u32 %v9380_v27, %v7962_v25  ;;  %4940 = vmatpush.bf16.msra.mxu3 %v8235_v26 }
 0x21c   : > { %v9444_v31 = vld [vmem:[%s10325_s28 + $0xbac] sm:$0xf0]  ;;  %v8091_v33 = vor.u32 %v9412_v29, %v8090_v28  ;;  %v7818_v34 = vld [vmem:[%s10325_s28 + $0x880] sm:$0xf]  ;;  %4902 = vmatpush.bf16.msra.mxu0 %v7835_v16 }
 0x21d   : > { %v9344_v35 = vld [vmem:[%s10325_s28 + $0x88c] sm:$0xf0]  ;;  %v7946_v36 = vld [vmem:[%s10325_s28 + $0x980] sm:$0xf]  ;;  %v8219_v37 = vor.u32 %v9444_v31, %v8218_v30  ;;  %4915 = vmatpush.bf16.msra.mxu1 %v7963_v32 }
 0x21e   : > { %v9376_v38 = vld [vmem:[%s10325_s28 + $0x98c] sm:$0xf0]  ;;  %v8074_v39 = vld [vmem:[%s10325_s28 + $0xa80] sm:$0xf]  ;;  %v7819_v43 = vor.u32 %v9344_v35, %v7818_v34  ;;  %4928 = vmatpush.bf16.msra.mxu2 %v8091_v33 }
 0x21f   : > { %v9408_v40 = vld [vmem:[%s10325_s28 + $0xa8c] sm:$0xf0]  ;;  %v8202_v41 = vld [vmem:[%s10325_s28 + $0xb80] sm:$0xf]  ;;  %v7947_v44 = vor.u32 %v9376_v38, %v7946_v36  ;;  %4941 = vmatpush.bf16.msra.mxu3 %v8219_v37  ;;  %v1655_v36 = vld [vmem:[#allocation2 + $0x20] sm:$0xff] }
 0x220   : > { %v9440_v42 = vld [vmem:[%s10325_s28 + $0xb8c] sm:$0xf0]  ;;  %v8075_v45 = vor.u32 %v9408_v40, %v8074_v39  ;;  %v7802_v46 = vld [vmem:[%s10325_s28 + $0x860] sm:$0xf]  ;;  %4903 = vmatpush.bf16.msra.mxu0 %v7819_v43 }
 0x221   : > { %v9340_v47 = vld [vmem:[%s10325_s28 + $0x86c] sm:$0xf0]  ;;  %v7930_v48 = vld [vmem:[%s10325_s28 + $0x960] sm:$0xf]  ;;  %v8203_v49 = vor.u32 %v9440_v42, %v8202_v41  ;;  %4916 = vmatpush.bf16.msra.mxu1 %v7947_v44 }
 0x222   : > { %v9372_v50 = vld [vmem:[%s10325_s28 + $0x96c] sm:$0xf0]  ;;  %v8058_v51 = vld [vmem:[%s10325_s28 + $0xa60] sm:$0xf]  ;;  %v7803_v55 = vor.u32 %v9340_v47, %v7802_v46  ;;  %4929 = vmatpush.bf16.msra.mxu2 %v8075_v45 }
 0x223   : > { %v9404_v52 = vld [vmem:[%s10325_s28 + $0xa6c] sm:$0xf0]  ;;  %v8186_v53 = vld [vmem:[%s10325_s28 + $0xb60] sm:$0xf]  ;;  %v7931_v56 = vor.u32 %v9372_v50, %v7930_v48  ;;  %4942 = vmatpush.bf16.msra.mxu3 %v8203_v49  ;;  %v2198_v49 = vunpack.c.l.b16 %v1655_v36 }
 0x224   : > { %v9436_v54 = vld [vmem:[%s10325_s28 + $0xb6c] sm:$0xf0]  ;;  %v8059_v60 = vor.u32 %v9404_v52, %v8058_v51  ;;  %v7786_v62 = vld [vmem:[%s10325_s28 + $0x840] sm:$0xf]  ;;  %4904 = vmatpush.bf16.msra.mxu0 %v7803_v55 }
 0x225   : > { %v9336_v63 = vld [vmem:[%s10325_s28 + $0x84c] sm:$0xf0]  ;;  %v7914_v0 = vld [vmem:[%s10325_s28 + $0x940] sm:$0xf]  ;;  %v8187_v1 = vor.u32 %v9436_v54, %v8186_v53  ;;  %4917 = vmatpush.bf16.msra.mxu1 %v7931_v56  ;;  %v2199_v53 = vunpack.c.h.b16 %v1655_v36 }
 0x226   : > { %v9368_v2 = vld [vmem:[%s10325_s28 + $0x94c] sm:$0xf0]  ;;  %v8042_v3 = vld [vmem:[%s10325_s28 + $0xa40] sm:$0xf]  ;;  %v7787_v7 = vor.u32 %v9336_v63, %v7786_v62  ;;  %4930 = vmatpush.bf16.msra.mxu2 %v8059_v60 }
 0x227   : > { %v9400_v4 = vld [vmem:[%s10325_s28 + $0xa4c] sm:$0xf0]  ;;  %v8170_v5 = vld [vmem:[%s10325_s28 + $0xb40] sm:$0xf]  ;;  %v7915_v8 = vor.u32 %v9368_v2, %v7914_v0  ;;  %4943 = vmatpush.bf16.msra.mxu3 %v8187_v1 }
 0x228   : > { %v9432_v6 = vld [vmem:[%s10325_s28 + $0xb4c] sm:$0xf0]  ;;  %v8043_v9 = vor.u32 %v9400_v4, %v8042_v3  ;;  %v7770_v10 = vld [vmem:[%s10325_s28 + $0x820] sm:$0xf]  ;;  %4905 = vmatpush.bf16.msra.mxu0 %v7787_v7  ;;  %v10596_v4 = vpack.c.b16 %v2198_v49, %v2198_v49 }
 0x229   : > { %v9332_v11 = vld [vmem:[%s10325_s28 + $0x82c] sm:$0xf0]  ;;  %v7898_v12 = vld [vmem:[%s10325_s28 + $0x920] sm:$0xf]  ;;  %v8171_v14 = vor.u32 %v9432_v6, %v8170_v5  ;;  %4918 = vmatpush.bf16.msra.mxu1 %v7915_v8  ;;  %v10602_v8 = vpack.c.b16 %v2199_v53, %v2199_v53 }
 0x22a   : > { %v9364_v15 = vld [vmem:[%s10325_s28 + $0x92c] sm:$0xf0]  ;;  %v8026_v19 = vld [vmem:[%s10325_s28 + $0xa20] sm:$0xf]  ;;  %v7771_v25 = vor.u32 %v9332_v11, %v7770_v10  ;;  %4931 = vmatpush.bf16.msra.mxu2 %v8043_v9 }
 0x22b   : > { %v9396_v21 = vld [vmem:[%s10325_s28 + $0xa2c] sm:$0xf0]  ;;  %v8154_v22 = vld [vmem:[%s10325_s28 + $0xb20] sm:$0xf]  ;;  %v7899_v29 = vor.u32 %v9364_v15, %v7898_v12  ;;  %4944 = vmatpush.bf16.msra.mxu3 %v8171_v14 }
 0x22c   : > { %v9428_v23 = vld [vmem:[%s10325_s28 + $0xb2c] sm:$0xf0]  ;;  %v7754_v24 = vld [vmem:[%s10325_s28 + $0x800] sm:$0xf]  ;;  %v8027_v30 = vor.u32 %v9396_v21, %v8026_v19  ;;  %4906 = vmatpush.bf16.msra.mxu0 %v7771_v25 }
 0x22d   : > { %v9328_v26 = vld [vmem:[%s10325_s28 + $0x80c] sm:$0xf0]  ;;  %v7882_v27 = vld [vmem:[%s10325_s28 + $0x900] sm:$0xf]  ;;  %v8155_v33 = vor.u32 %v9428_v23, %v8154_v22  ;;  %4919 = vmatpush.bf16.msra.mxu1 %v7899_v29 }
 0x22e   : > { %v9360_v28 = vld [vmem:[%s10325_s28 + $0x90c] sm:$0xf0]  ;;  %v8010_v31 = vld [vmem:[%s10325_s28 + $0xa00] sm:$0xf]  ;;  %v7755_v40 = vor.u32 %v9328_v26, %v7754_v24  ;;  %4932 = vmatpush.bf16.msra.mxu2 %v8027_v30 }
 0x22f   : > { %v9392_v16 = vld [vmem:[%s10325_s28 + $0xa0c] sm:$0xf0]  ;;  %v1654_v32 = vld [vmem:[#allocation2 + $0x8] sm:$0xff]  ;;  %v7883_v45 = vor.u32 %v9360_v28, %v7882_v27  ;;  %4945 = vmatpush.bf16.msra.mxu3 %v8155_v33 }
 0x230   : > { %v8138_v34 = vld [vmem:[%s10325_s28 + $0xb00] sm:$0xf]  ;;  %v9424_v35 = vld [vmem:[%s10325_s28 + $0xb0c] sm:$0xf0]  ;;  %v2196_v44 = vunpack.c.l.b16 %v1654_v32  ;;  %v8011_v46 = vor.u32 %v9392_v16, %v8010_v31  ;;  %v2197_v50 = vunpack.c.h.b16 %v1654_v32  ;;  %4907 = vmatpush.bf16.msra.mxu0 %v7755_v40 }
 0x231   : > { %v8378_v37 = vld [vmem:[%s10325_s28 + $0xce0] sm:$0xf]  ;;  %v9484_v38 = vld [vmem:[%s10325_s28 + $0xcec] sm:$0xf0]  ;;  %v8139_v51 = vor.u32 %v9424_v35, %v8138_v34  ;;  %4920 = vmatpush.bf16.msra.mxu1 %v7883_v45 }
 0x232   : > { %v8506_v39 = vld [vmem:[%s10325_s28 + $0xde0] sm:$0xf]  ;;  %v9516_v41 = vld [vmem:[%s10325_s28 + $0xdec] sm:$0xf0]  ;;  %v8379_v52 = vor.u32 %v9484_v38, %v8378_v37  ;;  %v10591_v0 = vpack.c.b16 %v2196_v44, %v2196_v44  ;;  %4933 = vmatpush.bf16.msra.mxu2 %v8011_v46  ;;  %v10598_v5 = vpack.c.b16 %v2197_v50, %v2197_v50 }
 0x233   : > { %v8634_v42 = vld [vmem:[%s10325_s28 + $0xee0] sm:$0xf]  ;;  %v9548_v43 = vld [vmem:[%s10325_s28 + $0xeec] sm:$0xf0]  ;;  %v8507_v54 = vor.u32 %v9516_v41, %v8506_v39  ;;  %4946 = vmatpush.bf16.msra.mxu3 %v8139_v51 }
 0x234   : > { %v8762_v47 = vld [vmem:[%s10325_s28 + $0xfe0] sm:$0xf]  ;;  %v9580_v48 = vld [vmem:[%s10325_s28 + $0xfec] sm:$0xf0]  ;;  %v8635_v55 = vor.u32 %v9548_v43, %v8634_v42  ;;  %4952 = vmatpush.bf16.msrb.mxu0 %v8379_v52  ;;  %4921 = vmatmul.bf16.vlgmr.msra.gmra.mxu1 %v10598_v5 }
 0x235   : > { %v8362_v56 = vld [vmem:[%s10325_s28 + $0xcc0] sm:$0xf]  ;;  %v9480_v60 = vld [vmem:[%s10325_s28 + $0xccc] sm:$0xf0]  ;;  %v8763_v63 = vor.u32 %v9580_v48, %v8762_v47  ;;  %4965 = vmatpush.bf16.msrb.mxu1 %v8507_v54  ;;  %4908 = vmatmul.bf16.vlgmr.msra.gmra.mxu0 %v10591_v0 }
 0x236   : > { %v8490_v62 = vld [vmem:[%s10325_s28 + $0xdc0] sm:$0xf]  ;;  %v9512_v1 = vld [vmem:[%s10325_s28 + $0xdcc] sm:$0xf0]  ;;  %v8363_v9 = vor.u32 %v9480_v60, %v8362_v56  ;;  %4978 = vmatpush.bf16.msrb.mxu2 %v8635_v55  ;;  %4947 = vmatmul.bf16.vlgmr.msra.gmra.mxu3 %v10602_v8 }
 0x237   : > { %v8618_v2 = vld [vmem:[%s10325_s28 + $0xec0] sm:$0xf]  ;;  %v9544_v3 = vld [vmem:[%s10325_s28 + $0xecc] sm:$0xf0]  ;;  %v8491_v10 = vor.u32 %v9512_v1, %v8490_v62  ;;  %4991 = vmatpush.bf16.msrb.mxu3 %v8763_v63  ;;  %4934 = vmatmul.bf16.vlgmr.msra.gmra.mxu2 %v10596_v4 }
 0x238   : > { %v8746_v6 = vld [vmem:[%s10325_s28 + $0xfc0] sm:$0xf]  ;;  %v9576_v7 = vld [vmem:[%s10325_s28 + $0xfcc] sm:$0xf0]  ;;  %v8619_v11 = vor.u32 %v9544_v3, %v8618_v2  ;;  %4953 = vmatpush.bf16.msrb.mxu0 %v8363_v9 }
 0x239   : > { %v8346_v12 = vld [vmem:[%s10325_s28 + $0xca0] sm:$0xf]  ;;  %v9476_v14 = vld [vmem:[%s10325_s28 + $0xcac] sm:$0xf0]  ;;  %v8747_v19 = vor.u32 %v9576_v7, %v8746_v6  ;;  %4966 = vmatpush.bf16.msrb.mxu1 %v8491_v10 }
 0x23a   : > { %v8474_v15 = vld [vmem:[%s10325_s28 + $0xda0] sm:$0xf]  ;;  %v9508_v21 = vld [vmem:[%s10325_s28 + $0xdac] sm:$0xf0]  ;;  %v8347_v26 = vor.u32 %v9476_v14, %v8346_v12  ;;  %4979 = vmatpush.bf16.msrb.mxu2 %v8619_v11 }
 0x23b   : > { %v8602_v22 = vld [vmem:[%s10325_s28 + $0xea0] sm:$0xf]  ;;  %v9540_v23 = vld [vmem:[%s10325_s28 + $0xeac] sm:$0xf0]  ;;  %v8475_v27 = vor.u32 %v9508_v21, %v8474_v15  ;;  %4992 = vmatpush.bf16.msrb.mxu3 %v8747_v19 }
 0x23c   : > { %v8730_v24 = vld [vmem:[%s10325_s28 + $0xfa0] sm:$0xf]  ;;  %v9572_v25 = vld [vmem:[%s10325_s28 + $0xfac] sm:$0xf0]  ;;  %v8603_v28 = vor.u32 %v9540_v23, %v8602_v22  ;;  %4954 = vmatpush.bf16.msrb.mxu0 %v8347_v26 }
 0x23d   : > { %v8330_v29 = vld [vmem:[%s10325_s28 + $0xc80] sm:$0xf]  ;;  %v9472_v30 = vld [vmem:[%s10325_s28 + $0xc8c] sm:$0xf0]  ;;  %v8731_v16 = vor.u32 %v9572_v25, %v8730_v24  ;;  %4967 = vmatpush.bf16.msrb.mxu1 %v8475_v27 }
 0x23e   : > { %v8458_v31 = vld [vmem:[%s10325_s28 + $0xd80] sm:$0xf]  ;;  %v9504_v32 = vld [vmem:[%s10325_s28 + $0xd8c] sm:$0xf0]  ;;  %v8331_v37 = vor.u32 %v9472_v30, %v8330_v29  ;;  %4980 = vmatpush.bf16.msrb.mxu2 %v8603_v28 }
 0x23f   : > { %v8586_v33 = vld [vmem:[%s10325_s28 + $0xe80] sm:$0xf]  ;;  %v9536_v34 = vld [vmem:[%s10325_s28 + $0xe8c] sm:$0xf0]  ;;  %v8459_v38 = vor.u32 %v9504_v32, %v8458_v31  ;;  %4993 = vmatpush.bf16.msrb.mxu3 %v8731_v16 }
 0x240   : > { %v8714_v35 = vld [vmem:[%s10325_s28 + $0xf80] sm:$0xf]  ;;  %v9568_v36 = vld [vmem:[%s10325_s28 + $0xf8c] sm:$0xf0]  ;;  %v8587_v39 = vor.u32 %v9536_v34, %v8586_v33  ;;  %4955 = vmatpush.bf16.msrb.mxu0 %v8331_v37  ;;  %v9130_v37 = vld [vmem:[%s10325_s28 + $0x1e4] sm:$0xf] }
 0x241   : > { %v8314_v40 = vld [vmem:[%s10325_s28 + $0xc60] sm:$0xf]  ;;  %v9468_v41 = vld [vmem:[%s10325_s28 + $0xc6c] sm:$0xf0]  ;;  %v8715_v43 = vor.u32 %v9568_v36, %v8714_v35  ;;  %4968 = vmatpush.bf16.msrb.mxu1 %v8459_v38  ;;  %v9098_v35 = vld [vmem:[%s10325_s28 + $0xe4] sm:$0xf] }
 0x242   : > { %v8442_v42 = vld [vmem:[%s10325_s28 + $0xd60] sm:$0xf]  ;;  %v9500_v44 = vld [vmem:[%s10325_s28 + $0xd6c] sm:$0xf0]  ;;  %v8315_v49 = vor.u32 %v9468_v41, %v8314_v40  ;;  %4981 = vmatpush.bf16.msrb.mxu2 %v8587_v39  ;;  %v6844_v36 = vld [vmem:[%s10325_s28 + $0xf0] sm:$0xf0] }
 0x243   : > { %v8570_v45 = vld [vmem:[%s10325_s28 + $0xe60] sm:$0xf]  ;;  %v9532_v46 = vld [vmem:[%s10325_s28 + $0xe6c] sm:$0xf0]  ;;  %v8443_v50 = vor.u32 %v9500_v44, %v8442_v42  ;;  %4994 = vmatpush.bf16.msrb.mxu3 %v8715_v43  ;;  %v6972_v39 = vld [vmem:[%s10325_s28 + $0x1f0] sm:$0xf0] }
 0x244   : > { %v8698_v47 = vld [vmem:[%s10325_s28 + $0xf60] sm:$0xf]  ;;  %v9564_v48 = vld [vmem:[%s10325_s28 + $0xf6c] sm:$0xf0]  ;;  %v8571_v51 = vor.u32 %v9532_v46, %v8570_v45  ;;  %4956 = vmatpush.bf16.msrb.mxu0 %v8315_v49  ;;  %v9162_v40 = vld [vmem:[%s10325_s28 + $0x2e4] sm:$0xf] }
 0x245   : > { %v8298_v52 = vld [vmem:[%s10325_s28 + $0xc40] sm:$0xf]  ;;  %v9464_v53 = vld [vmem:[%s10325_s28 + $0xc4c] sm:$0xf0]  ;;  %v8699_v55 = vor.u32 %v9564_v48, %v8698_v47  ;;  %4969 = vmatpush.bf16.msrb.mxu1 %v8443_v50  ;;  %v7100_v41 = vld [vmem:[%s10325_s28 + $0x2f0] sm:$0xf0]  ;;  %v6847_v50 = vor.u32 %v9098_v35, %v6844_v36 }
 0x246   : > { %v8426_v54 = vld [vmem:[%s10325_s28 + $0xd40] sm:$0xf]  ;;  %v9496_v56 = vld [vmem:[%s10325_s28 + $0xd4c] sm:$0xf0]  ;;  %v8299_v2 = vor.u32 %v9464_v53, %v8298_v52  ;;  %4982 = vmatpush.bf16.msrb.mxu2 %v8571_v51  ;;  %v9194_v45 = vld [vmem:[%s10325_s28 + $0x3e4] sm:$0xf]  ;;  %v6975_v52 = vor.u32 %v9130_v37, %v6972_v39  ;;  %v7103_v53 = vor.u32 %v9162_v40, %v7100_v41 }
 0x247   : > { %v8554_v60 = vld [vmem:[%s10325_s28 + $0xe40] sm:$0xf]  ;;  %v9528_v62 = vld [vmem:[%s10325_s28 + $0xe4c] sm:$0xf0]  ;;  %v8427_v3 = vor.u32 %v9496_v56, %v8426_v54  ;;  %4995 = vmatpush.bf16.msrb.mxu3 %v8699_v55  ;;  %v7228_v46 = vld [vmem:[%s10325_s28 + $0x3f0] sm:$0xf0] }
 0x248   : > { %v8682_v63 = vld [vmem:[%s10325_s28 + $0xf40] sm:$0xf]  ;;  %v9560_v1 = vld [vmem:[%s10325_s28 + $0xf4c] sm:$0xf0]  ;;  %v8555_v6 = vor.u32 %v9528_v62, %v8554_v60  ;;  %4957 = vmatpush.bf16.msrb.mxu0 %v8299_v2  ;;  %v9094_v54 = vld [vmem:[%s10325_s28 + $0xc4] sm:$0xf]  ;;  %v7231_v60 = vor.u32 %v9194_v45, %v7228_v46 }
 0x249   : > { %v8282_v7 = vld [vmem:[%s10325_s28 + $0xc20] sm:$0xf]  ;;  %v9460_v9 = vld [vmem:[%s10325_s28 + $0xc2c] sm:$0xf0]  ;;  %v8683_v11 = vor.u32 %v9560_v1, %v8682_v63  ;;  %4970 = vmatpush.bf16.msrb.mxu1 %v8427_v3  ;;  %v6828_v55 = vld [vmem:[%s10325_s28 + $0xd0] sm:$0xf0] }
 0x24a   : > { %v8410_v10 = vld [vmem:[%s10325_s28 + $0xd20] sm:$0xf]  ;;  %v9492_v12 = vld [vmem:[%s10325_s28 + $0xd2c] sm:$0xf0]  ;;  %v8283_v23 = vor.u32 %v9460_v9, %v8282_v7  ;;  %4983 = vmatpush.bf16.msrb.mxu2 %v8555_v6  ;;  %v9126_v56 = vld [vmem:[%s10325_s28 + $0x1c4] sm:$0xf] }
 0x24b   : > { %v8538_v14 = vld [vmem:[%s10325_s28 + $0xe20] sm:$0xf]  ;;  %v9524_v15 = vld [vmem:[%s10325_s28 + $0xe2c] sm:$0xf0]  ;;  %v8411_v27 = vor.u32 %v9492_v12, %v8410_v10  ;;  %4996 = vmatpush.bf16.msrb.mxu3 %v8683_v11  ;;  %v6956_v63 = vld [vmem:[%s10325_s28 + $0x1d0] sm:$0xf0]  ;;  %v6831_v11 = vor.u32 %v9094_v54, %v6828_v55 }
 0x24c   : > { %v8666_v19 = vld [vmem:[%s10325_s28 + $0xf20] sm:$0xf]  ;;  %v9556_v21 = vld [vmem:[%s10325_s28 + $0xf2c] sm:$0xf0]  ;;  %v8539_v28 = vor.u32 %v9524_v15, %v8538_v14  ;;  %4958 = vmatpush.bf16.msrb.mxu0 %v8283_v23  ;;  %v9158_v1 = vld [vmem:[%s10325_s28 + $0x2c4] sm:$0xf]  ;;  %v6959_v12 = vor.u32 %v9126_v56, %v6956_v63 }
 0x24d   : > { %v8266_v22 = vld [vmem:[%s10325_s28 + $0xc00] sm:$0xf]  ;;  %v9456_v24 = vld [vmem:[%s10325_s28 + $0xc0c] sm:$0xf0]  ;;  %v8667_v16 = vor.u32 %v9556_v21, %v8666_v19  ;;  %4971 = vmatpush.bf16.msrb.mxu1 %v8411_v27  ;;  %v7084_v2 = vld [vmem:[%s10325_s28 + $0x2d0] sm:$0xf0] }
 0x24e   : > { %v8394_v25 = vld [vmem:[%s10325_s28 + $0xd00] sm:$0xf]  ;;  %v9488_v26 = vld [vmem:[%s10325_s28 + $0xd0c] sm:$0xf0]  ;;  %v8267_v38 = vor.u32 %v9456_v24, %v8266_v22  ;;  %4984 = vmatpush.bf16.msrb.mxu2 %v8539_v28  ;;  %v9190_v7 = vld [vmem:[%s10325_s28 + $0x3c4] sm:$0xf]  ;;  %v7087_v14 = vor.u32 %v9158_v1, %v7084_v2 }
 0x24f   : > { %v8522_v29 = vld [vmem:[%s10325_s28 + $0xe00] sm:$0xf]  ;;  %v9520_v30 = vld [vmem:[%s10325_s28 + $0xe0c] sm:$0xf0]  ;;  %v8395_v43 = vor.u32 %v9488_v26, %v8394_v25  ;;  %4997 = vmatpush.bf16.msrb.mxu3 %v8667_v16  ;;  %v7212_v9 = vld [vmem:[%s10325_s28 + $0x3d0] sm:$0xf0] }
 0x250   : > { %v1656_v31 = vld [vmem:[#allocation2 + $0x28] sm:$0xff]  ;;  %v9552_v33 = vld [vmem:[%s10325_s28 + $0xf0c] sm:$0xf0]  ;;  %v8523_v44 = vor.u32 %v9520_v30, %v8522_v29  ;;  %4959 = vmatpush.bf16.msrb.mxu0 %v8267_v38  ;;  %v6812_v19 = vld [vmem:[%s10325_s28 + $0xb0] sm:$0xf0]  ;;  %v7215_v22 = vor.u32 %v9190_v7, %v7212_v9 }
 0x251   : > { %v8650_v32 = vld [vmem:[%s10325_s28 + $0xf00] sm:$0xf]  ;;  %v1657_v34 = vld [vmem:[#allocation2 + $0x38] sm:$0xff]  ;;  %v2200_v42 = vunpack.c.l.b16 %v1656_v31  ;;  %v2201_v48 = vunpack.c.h.b16 %v1656_v31  ;;  %4972 = vmatpush.bf16.msrb.mxu1 %v8395_v43  ;;  %v9090_v15 = vld [vmem:[%s10325_s28 + $0xa4] sm:$0xf] }
 0x252   : > { %v2202_v47 = vunpack.c.l.b16 %v1657_v34  ;;  %v8651_v49 = vor.u32 %v9552_v33, %v8650_v32  ;;  %v2203_v51 = vunpack.c.h.b16 %v1657_v34  ;;  %4985 = vmatpush.bf16.msrb.mxu2 %v8523_v44  ;;  %v9122_v21 = vld [vmem:[%s10325_s28 + $0x1a4] sm:$0xf]  ;;  %v6940_v23 = vld [vmem:[%s10325_s28 + $0x1b0] sm:$0xf0]  ;;  %v6815_v28 = vor.u32 %v9090_v15, %v6812_v19 }
 0x253   : > { %v10667_v62 = vpack.c.b16 %v2200_v42, %v2200_v42  ;;  %v10674_v6 = vpack.c.b16 %v2201_v48, %v2201_v48  ;;  %v9154_v24 = vld [vmem:[%s10325_s28 + $0x2a4] sm:$0xf]  ;;  %v7068_v25 = vld [vmem:[%s10325_s28 + $0x2b0] sm:$0xf0]  ;;  %v6943_v29 = vor.u32 %v9122_v21, %v6940_v23 }
 0x254   : > { %v10672_v3 = vpack.c.b16 %v2202_v47, %v2202_v47  ;;  %4998 = vmatpush.bf16.msrb.mxu3 %v8651_v49  ;;  %5004 = vmatpush.bf16.msra.mxu0 %v6847_v50  ;;  %v10678_v10 = vpack.c.b16 %v2203_v51, %v2203_v51  ;;  %v9186_v26 = vld [vmem:[%s10325_s28 + $0x3a4] sm:$0xf]  ;;  %v7196_v27 = vld [vmem:[%s10325_s28 + $0x3b0] sm:$0xf0]  ;;  %v7071_v30 = vor.u32 %v9154_v24, %v7068_v25 }
 0x255   : > { %5017 = vmatpush.bf16.msra.mxu1 %v6975_v52  ;;  %4960 = vmatmul.bf16.vlgmr.msrb.gmra.mxu0 %v10667_v62  ;;  %v9086_v31 = vld [vmem:[%s10325_s28 + $0x84] sm:$0xf]  ;;  %v6796_v16 = vld [vmem:[%s10325_s28 + $0x90] sm:$0xf0]  ;;  %v7199_v33 = vor.u32 %v9186_v26, %v7196_v27 }
 0x256   : > { %5030 = vmatpush.bf16.msra.mxu2 %v7103_v53  ;;  %4973 = vmatmul.bf16.vlgmr.msrb.gmra.mxu1 %v10674_v6  ;;  %v9118_v32 = vld [vmem:[%s10325_s28 + $0x184] sm:$0xf]  ;;  %v6924_v34 = vld [vmem:[%s10325_s28 + $0x190] sm:$0xf0]  ;;  %v6799_v39 = vor.u32 %v9086_v31, %v6796_v16 }
 0x257   : > { %4986 = vmatmul.bf16.vlgmr.msrb.gmra.mxu2 %v10672_v3  ;;  %4999 = vmatmul.bf16.vlgmr.msrb.gmra.mxu3 %v10678_v10  ;;  %v9150_v35 = vld [vmem:[%s10325_s28 + $0x284] sm:$0xf]  ;;  %v7052_v36 = vld [vmem:[%s10325_s28 + $0x290] sm:$0xf0]  ;;  %v6927_v40 = vor.u32 %v9118_v32, %v6924_v34 }
 0x258   : > { %5043 = vmatpush.bf16.msra.mxu3 %v7231_v60  ;;  %5005 = vmatpush.bf16.msra.mxu0 %v6831_v11  ;;  %v9182_v37 = vld [vmem:[%s10325_s28 + $0x384] sm:$0xf]  ;;  %v7180_v38 = vld [vmem:[%s10325_s28 + $0x390] sm:$0xf0]  ;;  %v7055_v41 = vor.u32 %v9150_v35, %v7052_v36 }
 0x259   : > { %5018 = vmatpush.bf16.msra.mxu1 %v6959_v12  ;;  %v9082_v42 = vld [vmem:[%s10325_s28 + $0x64] sm:$0xf]  ;;  %v6780_v43 = vld [vmem:[%s10325_s28 + $0x70] sm:$0xf0]  ;;  %v7183_v45 = vor.u32 %v9182_v37, %v7180_v38 }
 0x25a   : > { %5031 = vmatpush.bf16.msra.mxu2 %v7087_v14  ;;  %v9114_v44 = vld [vmem:[%s10325_s28 + $0x164] sm:$0xf]  ;;  %v6908_v46 = vld [vmem:[%s10325_s28 + $0x170] sm:$0xf0]  ;;  %v6783_v51 = vor.u32 %v9082_v42, %v6780_v43 }
 0x25b   : > { %v9146_v47 = vld [vmem:[%s10325_s28 + $0x264] sm:$0xf]  ;;  %v7036_v48 = vld [vmem:[%s10325_s28 + $0x270] sm:$0xf0]  ;;  %v6911_v52 = vor.u32 %v9114_v44, %v6908_v46 }
 0x25c   : > { %5044 = vmatpush.bf16.msra.mxu3 %v7215_v22  ;;  %5006 = vmatpush.bf16.msra.mxu0 %v6815_v28  ;;  %v9178_v49 = vld [vmem:[%s10325_s28 + $0x364] sm:$0xf]  ;;  %v7164_v50 = vld [vmem:[%s10325_s28 + $0x370] sm:$0xf0]  ;;  %v7039_v53 = vor.u32 %v9146_v47, %v7036_v48 }
 0x25d   : > { %5019 = vmatpush.bf16.msra.mxu1 %v6943_v29  ;;  %v9078_v54 = vld [vmem:[%s10325_s28 + $0x44] sm:$0xf]  ;;  %v6764_v55 = vld [vmem:[%s10325_s28 + $0x50] sm:$0xf0]  ;;  %v7167_v60 = vor.u32 %v9178_v49, %v7164_v50 }
 0x25e   : > { %5032 = vmatpush.bf16.msra.mxu2 %v7071_v30  ;;  %v9110_v56 = vld [vmem:[%s10325_s28 + $0x144] sm:$0xf]  ;;  %v6892_v63 = vld [vmem:[%s10325_s28 + $0x150] sm:$0xf0]  ;;  %v6767_v11 = vor.u32 %v9078_v54, %v6764_v55 }
 0x25f   : > { %v9142_v1 = vld [vmem:[%s10325_s28 + $0x244] sm:$0xf]  ;;  %v7020_v2 = vld [vmem:[%s10325_s28 + $0x250] sm:$0xf0]  ;;  %v6895_v12 = vor.u32 %v9110_v56, %v6892_v63 }
 0x260   : > { %5045 = vmatpush.bf16.msra.mxu3 %v7199_v33  ;;  %5007 = vmatpush.bf16.msra.mxu0 %v6799_v39  ;;  %v9174_v7 = vld [vmem:[%s10325_s28 + $0x344] sm:$0xf]  ;;  %v7148_v9 = vld [vmem:[%s10325_s28 + $0x350] sm:$0xf0]  ;;  %v7023_v14 = vor.u32 %v9142_v1, %v7020_v2 }
 0x261   : > { %5020 = vmatpush.bf16.msra.mxu1 %v6927_v40  ;;  %v9074_v15 = vld [vmem:[%s10325_s28 + $0x24] sm:$0xf]  ;;  %v6748_v19 = vld [vmem:[%s10325_s28 + $0x30] sm:$0xf0]  ;;  %v7151_v22 = vor.u32 %v9174_v7, %v7148_v9 }
 0x262   : > { %5033 = vmatpush.bf16.msra.mxu2 %v7055_v41  ;;  %v9106_v21 = vld [vmem:[%s10325_s28 + $0x124] sm:$0xf]  ;;  %v6876_v23 = vld [vmem:[%s10325_s28 + $0x130] sm:$0xf0]  ;;  %v6751_v28 = vor.u32 %v9074_v15, %v6748_v19 }
 0x263   : > { %v9138_v24 = vld [vmem:[%s10325_s28 + $0x224] sm:$0xf]  ;;  %v7004_v25 = vld [vmem:[%s10325_s28 + $0x230] sm:$0xf0]  ;;  %v6879_v31 = vor.u32 %v9106_v21, %v6876_v23 }
 0x264   : > { %5046 = vmatpush.bf16.msra.mxu3 %v7183_v45  ;;  %5008 = vmatpush.bf16.msra.mxu0 %v6783_v51  ;;  %v9170_v26 = vld [vmem:[%s10325_s28 + $0x324] sm:$0xf]  ;;  %v7132_v27 = vld [vmem:[%s10325_s28 + $0x330] sm:$0xf0]  ;;  %v7007_v16 = vor.u32 %v9138_v24, %v7004_v25 }
 0x265   : > { %5021 = vmatpush.bf16.msra.mxu1 %v6911_v52  ;;  %v9070_v29 = vld [vmem:[%s10325_s28 + $0x4] sm:$0xf]  ;;  %v6732_v30 = vld [vmem:[%s10325_s28 + $0x10] sm:$0xf0]  ;;  %v7135_v35 = vor.u32 %v9170_v26, %v7132_v27 }
 0x266   : > { %5034 = vmatpush.bf16.msra.mxu2 %v7039_v53  ;;  %v9102_v32 = vld [vmem:[%s10325_s28 + $0x104] sm:$0xf]  ;;  %v6860_v33 = vld [vmem:[%s10325_s28 + $0x110] sm:$0xf0]  ;;  %v6735_v42 = vor.u32 %v9070_v29, %v6732_v30 }
 0x267   : > { %v9134_v34 = vld [vmem:[%s10325_s28 + $0x204] sm:$0xf]  ;;  %v6988_v36 = vld [vmem:[%s10325_s28 + $0x210] sm:$0xf0]  ;;  %v6863_v46 = vor.u32 %v9102_v32, %v6860_v33 }
 0x268   : > { %5047 = vmatpush.bf16.msra.mxu3 %v7167_v60  ;;  %5009 = vmatpush.bf16.msra.mxu0 %v6767_v11  ;;  %v9166_v37 = vld [vmem:[%s10325_s28 + $0x304] sm:$0xf]  ;;  %v7116_v38 = vld [vmem:[%s10325_s28 + $0x310] sm:$0xf0]  ;;  %v6991_v47 = vor.u32 %v9134_v34, %v6988_v36 }
 0x269   : > { %5022 = vmatpush.bf16.msra.mxu1 %v6895_v12  ;;  %v9226_v39 = vld [vmem:[%s10325_s28 + $0x4e4] sm:$0xf]  ;;  %v7356_v40 = vld [vmem:[%s10325_s28 + $0x4f0] sm:$0xf0]  ;;  %v7119_v50 = vor.u32 %v9166_v37, %v7116_v38 }
 0x26a   : > { %5035 = vmatpush.bf16.msra.mxu2 %v7023_v14  ;;  %v9258_v41 = vld [vmem:[%s10325_s28 + $0x5e4] sm:$0xf]  ;;  %v7484_v43 = vld [vmem:[%s10325_s28 + $0x5f0] sm:$0xf0]  ;;  %v7359_v51 = vor.u32 %v9226_v39, %v7356_v40 }
 0x26b   : > { %v9290_v44 = vld [vmem:[%s10325_s28 + $0x6e4] sm:$0xf]  ;;  %v7612_v45 = vld [vmem:[%s10325_s28 + $0x6f0] sm:$0xf0]  ;;  %v7487_v52 = vor.u32 %v9258_v41, %v7484_v43 }
 0x26c   : > { %5048 = vmatpush.bf16.msra.mxu3 %v7151_v22  ;;  %5010 = vmatpush.bf16.msra.mxu0 %v6751_v28  ;;  %v9322_v48 = vld [vmem:[%s10325_s28 + $0x7e4] sm:$0xf]  ;;  %v7740_v49 = vld [vmem:[%s10325_s28 + $0x7f0] sm:$0xf0]  ;;  %v7615_v53 = vor.u32 %v9290_v44, %v7612_v45 }
 0x26d   : > { %5023 = vmatpush.bf16.msra.mxu1 %v6879_v31  ;;  %v9222_v54 = vld [vmem:[%s10325_s28 + $0x4c4] sm:$0xf]  ;;  %v7340_v55 = vld [vmem:[%s10325_s28 + $0x4d0] sm:$0xf0]  ;;  %v7743_v60 = vor.u32 %v9322_v48, %v7740_v49 }
 0x26e   : > { %5036 = vmatpush.bf16.msra.mxu2 %v7007_v16  ;;  %v9254_v56 = vld [vmem:[%s10325_s28 + $0x5c4] sm:$0xf]  ;;  %v7468_v63 = vld [vmem:[%s10325_s28 + $0x5d0] sm:$0xf0]  ;;  %v7343_v11 = vor.u32 %v9222_v54, %v7340_v55 }
 0x26f   : > { %v9286_v1 = vld [vmem:[%s10325_s28 + $0x6c4] sm:$0xf]  ;;  %v7596_v2 = vld [vmem:[%s10325_s28 + $0x6d0] sm:$0xf0]  ;;  %v7471_v12 = vor.u32 %v9254_v56, %v7468_v63 }
 0x270   : > { %5049 = vmatpush.bf16.msra.mxu3 %v7135_v35  ;;  %5011 = vmatpush.bf16.msra.mxu0 %v6735_v42  ;;  %v9318_v7 = vld [vmem:[%s10325_s28 + $0x7c4] sm:$0xf]  ;;  %v7724_v9 = vld [vmem:[%s10325_s28 + $0x7d0] sm:$0xf0]  ;;  %v7599_v14 = vor.u32 %v9286_v1, %v7596_v2 }
 0x271   : > { %5024 = vmatpush.bf16.msra.mxu1 %v6863_v46  ;;  %v9218_v15 = vld [vmem:[%s10325_s28 + $0x4a4] sm:$0xf]  ;;  %v7324_v19 = vld [vmem:[%s10325_s28 + $0x4b0] sm:$0xf0]  ;;  %v7727_v22 = vor.u32 %v9318_v7, %v7724_v9 }
 0x272   : > { %5037 = vmatpush.bf16.msra.mxu2 %v6991_v47  ;;  %v9250_v21 = vld [vmem:[%s10325_s28 + $0x5a4] sm:$0xf]  ;;  %v7452_v23 = vld [vmem:[%s10325_s28 + $0x5b0] sm:$0xf0]  ;;  %v7327_v28 = vor.u32 %v9218_v15, %v7324_v19  ;;  %v4805_v15 = vpop.f32.mrf.mxu0 }
 0x273   : > { %v9282_v24 = vld [vmem:[%s10325_s28 + $0x6a4] sm:$0xf]  ;;  %v7580_v25 = vld [vmem:[%s10325_s28 + $0x6b0] sm:$0xf0]  ;;  %5012 = vmatmul.bf16.vlgmr.msra.gmra.mxu0 %v10462_v58  ;;  %v7455_v29 = vor.u32 %v9250_v21, %v7452_v23 }
 0x274   : > { %5050 = vmatpush.bf16.msra.mxu3 %v7119_v50  ;;  %5056 = vmatpush.bf16.msrb.mxu0 %v7359_v51  ;;  %v9314_v26 = vld [vmem:[%s10325_s28 + $0x7a4] sm:$0xf]  ;;  %v7708_v27 = vld [vmem:[%s10325_s28 + $0x7b0] sm:$0xf0]  ;;  %v7583_v30 = vor.u32 %v9282_v24, %v7580_v25 }
 0x275   : > { %5069 = vmatpush.bf16.msrb.mxu1 %v7487_v52  ;;  %5038 = vmatmul.bf16.vlgmr.msra.gmra.mxu2 %v10460_v57  ;;  %v9214_v31 = vld [vmem:[%s10325_s28 + $0x484] sm:$0xf]  ;;  %v7308_v16 = vld [vmem:[%s10325_s28 + $0x490] sm:$0xf0]  ;;  %v7711_v33 = vor.u32 %v9314_v26, %v7708_v27  ;;  %v4818_v26 = vpop.f32.mrf.mxu1 }
 0x276   : > { %5082 = vmatpush.bf16.msrb.mxu2 %v7615_v53  ;;  %5025 = vmatmul.bf16.vlgmr.msra.gmra.mxu1 %v10466_v61  ;;  %v9246_v32 = vld [vmem:[%s10325_s28 + $0x584] sm:$0xf]  ;;  %v7436_v34 = vld [vmem:[%s10325_s28 + $0x590] sm:$0xf0]  ;;  %v7311_v39 = vor.u32 %v9214_v31, %v7308_v16 }
 0x277   : > { %5051 = vmatmul.bf16.vlgmr.msra.gmra.mxu3 %v10464_v59  ;;  %v9278_v35 = vld [vmem:[%s10325_s28 + $0x684] sm:$0xf]  ;;  %v7564_v36 = vld [vmem:[%s10325_s28 + $0x690] sm:$0xf0]  ;;  %v7439_v41 = vor.u32 %v9246_v32, %v7436_v34 }
 0x278   : > { %5095 = vmatpush.bf16.msrb.mxu3 %v7743_v60  ;;  %5057 = vmatpush.bf16.msrb.mxu0 %v7343_v11  ;;  %v9310_v37 = vld [vmem:[%s10325_s28 + $0x784] sm:$0xf]  ;;  %v7692_v38 = vld [vmem:[%s10325_s28 + $0x790] sm:$0xf0]  ;;  %v7567_v42 = vor.u32 %v9278_v35, %v7564_v36 }
 0x279   : > { %5070 = vmatpush.bf16.msrb.mxu1 %v7471_v12  ;;  %v9210_v40 = vld [vmem:[%s10325_s28 + $0x464] sm:$0xf]  ;;  %v7292_v43 = vld [vmem:[%s10325_s28 + $0x470] sm:$0xf0]  ;;  %v7695_v46 = vor.u32 %v9310_v37, %v7692_v38 }
 0x27a   : > { %5083 = vmatpush.bf16.msrb.mxu2 %v7599_v14  ;;  %v9242_v44 = vld [vmem:[%s10325_s28 + $0x564] sm:$0xf]  ;;  %v7420_v45 = vld [vmem:[%s10325_s28 + $0x570] sm:$0xf0]  ;;  %v7295_v52 = vor.u32 %v9210_v40, %v7292_v43 }
 0x27b   : > { %v9274_v47 = vld [vmem:[%s10325_s28 + $0x664] sm:$0xf]  ;;  %v7548_v48 = vld [vmem:[%s10325_s28 + $0x670] sm:$0xf0]  ;;  %v7423_v54 = vor.u32 %v9242_v44, %v7420_v45 }
 0x27c   : > { %5096 = vmatpush.bf16.msrb.mxu3 %v7727_v22  ;;  %5058 = vmatpush.bf16.msrb.mxu0 %v7327_v28  ;;  %v2170_v49 = vld [vmem:[%s10331_s3] sm:$0xf]  ;;  %v7676_v51 = vld [vmem:[%s10325_s28 + $0x770] sm:$0xf0]  ;;  %v7551_v55 = vor.u32 %v9274_v47, %v7548_v48  ;;  %v4844_v47 = vpop.f32.mrf.mxu3 }
 0x27d   : > { %5071 = vmatpush.bf16.msrb.mxu1 %v7455_v29  ;;  %v9306_v50 = vld [vmem:[%s10325_s28 + $0x764] sm:$0xf]  ;;  %v7276_v56 = vld [vmem:[%s10325_s28 + $0x450] sm:$0xf0]  ;;  %v2172_v63 = vperm.slane %v2170_v49, 0 }
 0x27e   : > { %5084 = vmatpush.bf16.msrb.mxu2 %v7583_v30  ;;  %v9206_v53 = vld [vmem:[%s10325_s28 + $0x444] sm:$0xf]  ;;  %v7679_v1 = vor.u32 %v9306_v50, %v7676_v51  ;;  %v7404_v2 = vld [vmem:[%s10325_s28 + $0x550] sm:$0xf0] }
 0x27f   : > { %v9238_v60 = vld [vmem:[%s10325_s28 + $0x544] sm:$0xf]  ;;  %v7532_v9 = vld [vmem:[%s10325_s28 + $0x650] sm:$0xf0]  ;;  %v7279_v14 = vor.u32 %v9206_v53, %v7276_v56  ;;  %v4806_v25 = vadd.f32 %v4805_v15, %v2172_v63  ;;  %v4807_v56 = vpop.f32.mrf.mxu0 }
 0x280   : > { %5097 = vmatpush.bf16.msrb.mxu3 %v7711_v33  ;;  %5059 = vmatpush.bf16.msrb.mxu0 %v7311_v39  ;;  %v9270_v7 = vld [vmem:[%s10325_s28 + $0x644] sm:$0xf]  ;;  %v7660_v12 = vld [vmem:[%s10325_s28 + $0x750] sm:$0xf0]  ;;  %v7407_v19 = vor.u32 %v9238_v60, %v7404_v2 }
 0x281   : > { %5072 = vmatpush.bf16.msrb.mxu1 %v7439_v41  ;;  %v9302_v11 = vld [vmem:[%s10325_s28 + $0x744] sm:$0xf]  ;;  %v7535_v21 = vor.u32 %v9270_v7, %v7532_v9  ;;  %v7260_v23 = vld [vmem:[%s10325_s28 + $0x430] sm:$0xf0]  ;;  %v4819_v32 = vadd.f32 %v4818_v26, %v4806_v25  ;;  %v4831_v41 = vpop.f32.mrf.mxu2  ;;  %v4820_v7 = vpop.f32.mrf.mxu1 }
 0x282   : > { %5085 = vmatpush.bf16.msrb.mxu2 %v7567_v42  ;;  %v9202_v22 = vld [vmem:[%s10325_s28 + $0x424] sm:$0xf]  ;;  %v7663_v27 = vor.u32 %v9302_v11, %v7660_v12  ;;  %v7388_v28 = vld [vmem:[%s10325_s28 + $0x530] sm:$0xf0] }
 0x283   : > { %v9234_v24 = vld [vmem:[%s10325_s28 + $0x524] sm:$0xf]  ;;  %v7516_v30 = vld [vmem:[%s10325_s28 + $0x630] sm:$0xf0]  ;;  %v7263_v33 = vor.u32 %v9202_v22, %v7260_v23 }
 0x284   : > { %5098 = vmatpush.bf16.msrb.mxu3 %v7695_v46  ;;  %5060 = vmatpush.bf16.msrb.mxu0 %v7295_v52  ;;  %v9266_v29 = vld [vmem:[%s10325_s28 + $0x624] sm:$0xf]  ;;  %v7644_v16 = vld [vmem:[%s10325_s28 + $0x730] sm:$0xf0]  ;;  %v7391_v36 = vor.u32 %v9234_v24, %v7388_v28  ;;  %v4832_v46 = vadd.f32 %v4831_v41, %v4819_v32 }
 0x285   : > { %5073 = vmatpush.bf16.msrb.mxu1 %v7423_v54  ;;  %v9298_v31 = vld [vmem:[%s10325_s28 + $0x724] sm:$0xf]  ;;  %v7244_v35 = vld [vmem:[%s10325_s28 + $0x410] sm:$0xf0]  ;;  %v7519_v37 = vor.u32 %v9266_v29, %v7516_v30  ;;  %v4846_v30 = vpop.f32.mrf.mxu3 }
 0x286   : > { %5086 = vmatpush.bf16.msrb.mxu2 %v7551_v55  ;;  %v9198_v34 = vld [vmem:[%s10325_s28 + $0x404] sm:$0xf]  ;;  %v7372_v39 = vld [vmem:[%s10325_s28 + $0x510] sm:$0xf0]  ;;  %v7647_v42 = vor.u32 %v9298_v31, %v7644_v16  ;;  %v10807_v55 = vadd.f32 %v4844_v47, %v4832_v46 }
 0x287   : > { %v9230_v38 = vld [vmem:[%s10325_s28 + $0x504] sm:$0xf]  ;;  %v7500_v43 = vld [vmem:[%s10325_s28 + $0x610] sm:$0xf0]  ;;  %v7247_v51 = vor.u32 %v9198_v34, %v7244_v35 }
 0x288   : > { %5099 = vmatpush.bf16.msrb.mxu3 %v7679_v1  ;;  %5061 = vmatpush.bf16.msrb.mxu0 %v7279_v14  ;;  %v9262_v40 = vld [vmem:[%s10325_s28 + $0x604] sm:$0xf]  ;;  %v7628_v45 = vld [vmem:[%s10325_s28 + $0x710] sm:$0xf0]  ;;  %v7375_v60 = vor.u32 %v9230_v38, %v7372_v39 }
 0x289   : > { %5074 = vmatpush.bf16.msrb.mxu1 %v7407_v19  ;;  %v9294_v44 = vld [vmem:[%s10325_s28 + $0x704] sm:$0xf]  ;;  %v7868_v49 = vld [vmem:[%s10325_s28 + $0x8f0] sm:$0xf0]  ;;  %v7503_v63 = vor.u32 %v9262_v40, %v7500_v43  ;;  %v4833_v28 = vpop.f32.mrf.mxu2 }
 0x28a   : > { %5087 = vmatpush.bf16.msrb.mxu2 %v7535_v21  ;;  %v9354_v48 = vld [vmem:[%s10325_s28 + $0x8e4] sm:$0xf]  ;;  %v7996_v52 = vld [vmem:[%s10325_s28 + $0x9f0] sm:$0xf0]  ;;  %v7631_v9 = vor.u32 %v9294_v44, %v7628_v45 }
 0x28b   : > { %v9386_v50 = vld [vmem:[%s10325_s28 + $0x9e4] sm:$0xf]  ;;  %v8124_v54 = vld [vmem:[%s10325_s28 + $0xaf0] sm:$0xf0]  ;;  %v7871_v11 = vor.u32 %v9354_v48, %v7868_v49 }
 0x28c   : > { %5100 = vmatpush.bf16.msrb.mxu3 %v7663_v27  ;;  %5062 = vmatpush.bf16.msrb.mxu0 %v7263_v33  ;;  %v9418_v53 = vld [vmem:[%s10325_s28 + $0xae4] sm:$0xf]  ;;  %v8252_v2 = vld [vmem:[%s10325_s28 + $0xbf0] sm:$0xf0]  ;;  %v7999_v12 = vor.u32 %v9386_v50, %v7996_v52 }
 0x28d   : > { %5075 = vmatpush.bf16.msrb.mxu1 %v7391_v36  ;;  %v9450_v1 = vld [vmem:[%s10325_s28 + $0xbe4] sm:$0xf]  ;;  %v8127_v14 = vor.u32 %v9418_v53, %v8124_v54  ;;  %v7852_v19 = vld [vmem:[%s10325_s28 + $0x8d0] sm:$0xf0] }
 0x28e   : > { %5088 = vmatpush.bf16.msrb.mxu2 %v7519_v37  ;;  %v9350_v15 = vld [vmem:[%s10325_s28 + $0x8c4] sm:$0xf]  ;;  %v8255_v22 = vor.u32 %v9450_v1, %v8252_v2  ;;  %v7980_v23 = vld [vmem:[%s10325_s28 + $0x9d0] sm:$0xf0] }
 0x28f   : > { %v9382_v21 = vld [vmem:[%s10325_s28 + $0x9c4] sm:$0xf]  ;;  %v8108_v25 = vld [vmem:[%s10325_s28 + $0xad0] sm:$0xf0]  ;;  %v7855_v29 = vor.u32 %v9350_v15, %v7852_v19 }
 0x290   : > { %5101 = vmatpush.bf16.msrb.mxu3 %v7647_v42  ;;  %5063 = vmatpush.bf16.msrb.mxu0 %v7247_v51  ;;  %v9414_v24 = vld [vmem:[%s10325_s28 + $0xac4] sm:$0xf]  ;;  %v8236_v27 = vld [vmem:[%s10325_s28 + $0xbd0] sm:$0xf0]  ;;  %v7983_v31 = vor.u32 %v9382_v21, %v7980_v23 }
 0x291   : > { %5076 = vmatpush.bf16.msrb.mxu1 %v7375_v60  ;;  %v9446_v26 = vld [vmem:[%s10325_s28 + $0xbc4] sm:$0xf]  ;;  %v8111_v16 = vor.u32 %v9414_v24, %v8108_v25  ;;  %v7836_v33 = vld [vmem:[%s10325_s28 + $0x8b0] sm:$0xf0] }
 0x292   : > { %5089 = vmatpush.bf16.msrb.mxu2 %v7503_v63  ;;  %v9346_v32 = vld [vmem:[%s10325_s28 + $0x8a4] sm:$0xf]  ;;  %v8239_v35 = vor.u32 %v9446_v26, %v8236_v27  ;;  %v7964_v36 = vld [vmem:[%s10325_s28 + $0x9b0] sm:$0xf0]  ;;  %v4857_v54 = vpop.f32.mrf.mxu0 }
 0x293   : > { %v9378_v34 = vld [vmem:[%s10325_s28 + $0x9a4] sm:$0xf]  ;;  %v8092_v38 = vld [vmem:[%s10325_s28 + $0xab0] sm:$0xf0]  ;;  %5064 = vmatmul.bf16.vlgmr.msrb.gmra.mxu0 %v10522_v17  ;;  %v7839_v41 = vor.u32 %v9346_v32, %v7836_v33  ;;  %v4858_v7 = vadd.f32 %v4857_v54, %v10807_v55 }
 0x294   : > { %5102 = vmatpush.bf16.msrb.mxu3 %v7631_v9  ;;  %5108 = vmatpush.bf16.msra.mxu0 %v7871_v11  ;;  %v9410_v37 = vld [vmem:[%s10325_s28 + $0xaa4] sm:$0xf]  ;;  %v8220_v40 = vld [vmem:[%s10325_s28 + $0xbb0] sm:$0xf0]  ;;  %v7967_v42 = vor.u32 %v9378_v34, %v7964_v36  ;;  %v4870_v9 = vpop.f32.mrf.mxu1 }
 0x295   : > { %5121 = vmatpush.bf16.msra.mxu1 %v7999_v12  ;;  %5090 = vmatmul.bf16.vlgmr.msrb.gmra.mxu2 %v10518_v13  ;;  %v9442_v39 = vld [vmem:[%s10325_s28 + $0xba4] sm:$0xf]  ;;  %v8095_v43 = vor.u32 %v9410_v37, %v8092_v38  ;;  %v7820_v45 = vld [vmem:[%s10325_s28 + $0x890] sm:$0xf0] }
 0x296   : > { %5134 = vmatpush.bf16.msra.mxu2 %v8127_v14  ;;  %5077 = vmatmul.bf16.vlgmr.msrb.gmra.mxu1 %v10526_v20  ;;  %v9342_v44 = vld [vmem:[%s10325_s28 + $0x884] sm:$0xf]  ;;  %v8223_v47 = vor.u32 %v9442_v39, %v8220_v40  ;;  %v7948_v48 = vld [vmem:[%s10325_s28 + $0x990] sm:$0xf0] }
 0x297   : > { %5103 = vmatmul.bf16.vlgmr.msrb.gmra.mxu3 %v10524_v18  ;;  %v9374_v46 = vld [vmem:[%s10325_s28 + $0x984] sm:$0xf]  ;;  %v8076_v50 = vld [vmem:[%s10325_s28 + $0xa90] sm:$0xf0]  ;;  %v7823_v53 = vor.u32 %v9342_v44, %v7820_v45  ;;  %v4883_v28 = vpop.f32.mrf.mxu2 }
 0x298   : > { %5147 = vmatpush.bf16.msra.mxu3 %v8255_v22  ;;  %5109 = vmatpush.bf16.msra.mxu0 %v7855_v29  ;;  %v9406_v49 = vld [vmem:[%s10325_s28 + $0xa84] sm:$0xf]  ;;  %v8204_v52 = vld [vmem:[%s10325_s28 + $0xb90] sm:$0xf0]  ;;  %v7951_v56 = vor.u32 %v9374_v46, %v7948_v48  ;;  %v4871_v22 = vadd.f32 %v4870_v9, %v4858_v7 }
 0x299   : > { %5122 = vmatpush.bf16.msra.mxu1 %v7983_v31  ;;  %v9438_v51 = vld [vmem:[%s10325_s28 + $0xb84] sm:$0xf]  ;;  %v8079_v60 = vor.u32 %v9406_v49, %v8076_v50  ;;  %v7804_v1 = vld [vmem:[%s10325_s28 + $0x870] sm:$0xf0]  ;;  %v4896_v33 = vpop.f32.mrf.mxu3 }
 0x29a   : > { %5135 = vmatpush.bf16.msra.mxu2 %v8111_v16  ;;  %v9338_v63 = vld [vmem:[%s10325_s28 + $0x864] sm:$0xf]  ;;  %v8207_v11 = vor.u32 %v9438_v51, %v8204_v52  ;;  %v7932_v12 = vld [vmem:[%s10325_s28 + $0x970] sm:$0xf0]  ;;  %v4884_v32 = vadd.f32 %v4883_v28, %v4871_v22  ;;  %v4859_v38 = vpop.f32.mrf.mxu0 }
 0x29b   : > { %v9370_v2 = vld [vmem:[%s10325_s28 + $0x964] sm:$0xf]  ;;  %v8060_v15 = vld [vmem:[%s10325_s28 + $0xa70] sm:$0xf0]  ;;  %v7807_v23 = vor.u32 %v9338_v63, %v7804_v1 }
 0x29c   : > { %5148 = vmatpush.bf16.msra.mxu3 %v8239_v35  ;;  %5110 = vmatpush.bf16.msra.mxu0 %v7839_v41  ;;  %v9402_v14 = vld [vmem:[%s10325_s28 + $0xa64] sm:$0xf]  ;;  %v8188_v21 = vld [vmem:[%s10325_s28 + $0xb70] sm:$0xf0]  ;;  %v7935_v55 = vor.u32 %v9370_v2, %v7932_v12  ;;  %v10856_v37 = vadd.f32 %v4896_v33, %v4884_v32  ;;  %v4872_v44 = vpop.f32.mrf.mxu1 }
 0x29d   : > { %5123 = vmatpush.bf16.msra.mxu1 %v7967_v42  ;;  %v9434_v19 = vld [vmem:[%s10325_s28 + $0xb64] sm:$0xf]  ;;  %v8063_v24 = vor.u32 %v9402_v14, %v8060_v15  ;;  %v7788_v26 = vld [vmem:[%s10325_s28 + $0x850] sm:$0xf0] }
 0x29e   : > { %5136 = vmatpush.bf16.msra.mxu2 %v8095_v43  ;;  %v9334_v25 = vld [vmem:[%s10325_s28 + $0x844] sm:$0xf]  ;;  %v8191_v29 = vor.u32 %v9434_v19, %v8188_v21  ;;  %v7916_v30 = vld [vmem:[%s10325_s28 + $0x950] sm:$0xf0] }
 0x29f   : > { %v9366_v27 = vld [vmem:[%s10325_s28 + $0x944] sm:$0xf]  ;;  %v8044_v16 = vld [vmem:[%s10325_s28 + $0xa50] sm:$0xf0]  ;;  %v7791_v36 = vor.u32 %v9334_v25, %v7788_v26  ;;  %v4885_v2 = vpop.f32.mrf.mxu2 }
 0x2a0   : > { %5149 = vmatpush.bf16.msra.mxu3 %v8223_v47  ;;  %5111 = vmatpush.bf16.msra.mxu0 %v7823_v53  ;;  %v9398_v31 = vld [vmem:[%s10325_s28 + $0xa44] sm:$0xf]  ;;  %v8172_v35 = vld [vmem:[%s10325_s28 + $0xb50] sm:$0xf0]  ;;  %v7919_v39 = vor.u32 %v9366_v27, %v7916_v30 }
 0x2a1   : > { %5124 = vmatpush.bf16.msra.mxu1 %v7951_v56  ;;  %v9430_v34 = vld [vmem:[%s10325_s28 + $0xb44] sm:$0xf]  ;;  %v8047_v40 = vor.u32 %v9398_v31, %v8044_v16  ;;  %v7772_v42 = vld [vmem:[%s10325_s28 + $0x830] sm:$0xf0]  ;;  %v4898_v14 = vpop.f32.mrf.mxu3 }
 0x2a2   : > { %5137 = vmatpush.bf16.msra.mxu2 %v8079_v60  ;;  %v9330_v41 = vld [vmem:[%s10325_s28 + $0x824] sm:$0xf]  ;;  %v8175_v45 = vor.u32 %v9430_v34, %v8172_v35  ;;  %v7900_v46 = vld [vmem:[%s10325_s28 + $0x930] sm:$0xf0] }
 0x2a3   : > { %v9362_v43 = vld [vmem:[%s10325_s28 + $0x924] sm:$0xf]  ;;  %v8028_v48 = vld [vmem:[%s10325_s28 + $0xa30] sm:$0xf0]  ;;  %v7775_v51 = vor.u32 %v9330_v41, %v7772_v42 }
 0x2a4   : > { %5150 = vmatpush.bf16.msra.mxu3 %v8207_v11  ;;  %5112 = vmatpush.bf16.msra.mxu0 %v7807_v23  ;;  %v9394_v47 = vld [vmem:[%s10325_s28 + $0xa24] sm:$0xf]  ;;  %v8156_v50 = vld [vmem:[%s10325_s28 + $0xb30] sm:$0xf0]  ;;  %v7903_v54 = vor.u32 %v9362_v43, %v7900_v46 }
 0x2a5   : > { %5125 = vmatpush.bf16.msra.mxu1 %v7935_v55  ;;  %v9426_v49 = vld [vmem:[%s10325_s28 + $0xb24] sm:$0xf]  ;;  %v7756_v53 = vld [vmem:[%s10325_s28 + $0x810] sm:$0xf0]  ;;  %v8031_v56 = vor.u32 %v9394_v47, %v8028_v48 }
 0x2a6   : > { %5138 = vmatpush.bf16.msra.mxu2 %v8063_v24  ;;  %v9326_v52 = vld [vmem:[%s10325_s28 + $0x804] sm:$0xf]  ;;  %v7884_v63 = vld [vmem:[%s10325_s28 + $0x910] sm:$0xf0]  ;;  %v8159_v7 = vor.u32 %v9426_v49, %v8156_v50 }
 0x2a7   : > { %v9358_v60 = vld [vmem:[%s10325_s28 + $0x904] sm:$0xf]  ;;  %v8012_v9 = vld [vmem:[%s10325_s28 + $0xa10] sm:$0xf0]  ;;  %v7759_v22 = vor.u32 %v9326_v52, %v7756_v53 }
 0x2a8   : > { %5151 = vmatpush.bf16.msra.mxu3 %v8191_v29  ;;  %5113 = vmatpush.bf16.msra.mxu0 %v7791_v36  ;;  %v9390_v1 = vld [vmem:[%s10325_s28 + $0xa04] sm:$0xf]  ;;  %v8140_v12 = vld [vmem:[%s10325_s28 + $0xb10] sm:$0xf0]  ;;  %v7887_v25 = vor.u32 %v9358_v60, %v7884_v63 }
 0x2a9   : > { %5126 = vmatpush.bf16.msra.mxu1 %v7919_v39  ;;  %v9422_v11 = vld [vmem:[%s10325_s28 + $0xb04] sm:$0xf]  ;;  %v8380_v19 = vld [vmem:[%s10325_s28 + $0xcf0] sm:$0xf0]  ;;  %v8015_v26 = vor.u32 %v9390_v1, %v8012_v9 }
 0x2aa   : > { %5139 = vmatpush.bf16.msra.mxu2 %v8047_v40  ;;  %v9482_v15 = vld [vmem:[%s10325_s28 + $0xce4] sm:$0xf]  ;;  %v8508_v23 = vld [vmem:[%s10325_s28 + $0xdf0] sm:$0xf0]  ;;  %v8143_v29 = vor.u32 %v9422_v11, %v8140_v12 }
 0x2ab   : > { %v9514_v21 = vld [vmem:[%s10325_s28 + $0xde4] sm:$0xf]  ;;  %v8636_v24 = vld [vmem:[%s10325_s28 + $0xef0] sm:$0xf0]  ;;  %v8383_v30 = vor.u32 %v9482_v15, %v8380_v19 }
 0x2ac   : > { %5152 = vmatpush.bf16.msra.mxu3 %v8175_v45  ;;  %5114 = vmatpush.bf16.msra.mxu0 %v7775_v51  ;;  %v9546_v55 = vld [vmem:[%s10325_s28 + $0xee4] sm:$0xf]  ;;  %v8764_v28 = vld [vmem:[%s10325_s28 + $0xff0] sm:$0xf0]  ;;  %v8511_v31 = vor.u32 %v9514_v21, %v8508_v23 }
 0x2ad   : > { %5127 = vmatpush.bf16.msra.mxu1 %v7903_v54  ;;  %v9578_v27 = vld [vmem:[%s10325_s28 + $0xfe4] sm:$0xf]  ;;  %v8639_v16 = vor.u32 %v9546_v55, %v8636_v24  ;;  %v8364_v33 = vld [vmem:[%s10325_s28 + $0xcd0] sm:$0xf0] }
 0x2ae   : > { %5140 = vmatpush.bf16.msra.mxu2 %v8031_v56  ;;  %v9478_v32 = vld [vmem:[%s10325_s28 + $0xcc4] sm:$0xf]  ;;  %v8767_v35 = vor.u32 %v9578_v27, %v8764_v28  ;;  %v8492_v36 = vld [vmem:[%s10325_s28 + $0xdd0] sm:$0xf0] }
 0x2af   : > { %v9510_v34 = vld [vmem:[%s10325_s28 + $0xdc4] sm:$0xf]  ;;  %v8620_v39 = vld [vmem:[%s10325_s28 + $0xed0] sm:$0xf0]  ;;  %v8367_v42 = vor.u32 %v9478_v32, %v8364_v33 }
 0x2b0   : > { %5153 = vmatpush.bf16.msra.mxu3 %v8159_v7  ;;  %5115 = vmatpush.bf16.msra.mxu0 %v7759_v22  ;;  %v9542_v38 = vld [vmem:[%s10325_s28 + $0xec4] sm:$0xf]  ;;  %v8748_v41 = vld [vmem:[%s10325_s28 + $0xfd0] sm:$0xf0]  ;;  %v8495_v43 = vor.u32 %v9510_v34, %v8492_v36 }
 0x2b1   : > { %5128 = vmatpush.bf16.msra.mxu1 %v7887_v25  ;;  %v9574_v40 = vld [vmem:[%s10325_s28 + $0xfc4] sm:$0xf]  ;;  %v8623_v44 = vor.u32 %v9542_v38, %v8620_v39  ;;  %v8348_v46 = vld [vmem:[%s10325_s28 + $0xcb0] sm:$0xf0]  ;;  %v4922_v23 = vpop.f32.mrf.mxu1 }
 0x2b2   : > { %5141 = vmatpush.bf16.msra.mxu2 %v8015_v26  ;;  %v9474_v45 = vld [vmem:[%s10325_s28 + $0xca4] sm:$0xf]  ;;  %v8751_v48 = vor.u32 %v9574_v40, %v8748_v41  ;;  %v8476_v49 = vld [vmem:[%s10325_s28 + $0xdb0] sm:$0xf0]  ;;  %v4909_v14 = vpop.f32.mrf.mxu0 }
 0x2b3   : > { %v9506_v47 = vld [vmem:[%s10325_s28 + $0xda4] sm:$0xf]  ;;  %5116 = vmatmul.bf16.vlgmr.msra.gmra.mxu0 %v10591_v0  ;;  %v8604_v51 = vld [vmem:[%s10325_s28 + $0xeb0] sm:$0xf0]  ;;  %v8351_v54 = vor.u32 %v9474_v45, %v8348_v46  ;;  %v4910_v21 = vadd.f32 %v4909_v14, %v10856_v37 }
 0x2b4   : > { %5154 = vmatpush.bf16.msra.mxu3 %v8143_v29  ;;  %5160 = vmatpush.bf16.msrb.mxu0 %v8383_v30  ;;  %v9538_v50 = vld [vmem:[%s10325_s28 + $0xea4] sm:$0xf]  ;;  %v8732_v53 = vld [vmem:[%s10325_s28 + $0xfb0] sm:$0xf0]  ;;  %v8479_v56 = vor.u32 %v9506_v47, %v8476_v49 }
 0x2b5   : > { %5173 = vmatpush.bf16.msrb.mxu1 %v8511_v31  ;;  %5142 = vmatmul.bf16.vlgmr.msra.gmra.mxu2 %v10596_v4  ;;  %v9570_v52 = vld [vmem:[%s10325_s28 + $0xfa4] sm:$0xf]  ;;  %v8607_v60 = vor.u32 %v9538_v50, %v8604_v51  ;;  %v8332_v1 = vld [vmem:[%s10325_s28 + $0xc90] sm:$0xf0]  ;;  %v4923_v29 = vadd.f32 %v4922_v23, %v4910_v21 }
 0x2b6   : > { %5186 = vmatpush.bf16.msrb.mxu2 %v8639_v16  ;;  %5129 = vmatmul.bf16.vlgmr.msra.gmra.mxu1 %v10598_v5  ;;  %v9470_v63 = vld [vmem:[%s10325_s28 + $0xc84] sm:$0xf]  ;;  %v8735_v7 = vor.u32 %v9570_v52, %v8732_v53  ;;  %v8460_v9 = vld [vmem:[%s10325_s28 + $0xd90] sm:$0xf0] }
 0x2b7   : > { %5155 = vmatmul.bf16.vlgmr.msra.gmra.mxu3 %v10602_v8  ;;  %v9502_v2 = vld [vmem:[%s10325_s28 + $0xd84] sm:$0xf]  ;;  %v8588_v12 = vld [vmem:[%s10325_s28 + $0xe90] sm:$0xf0]  ;;  %v8335_v22 = vor.u32 %v9470_v63, %v8332_v1 }
 0x2b8   : > { %5199 = vmatpush.bf16.msrb.mxu3 %v8767_v35  ;;  %5161 = vmatpush.bf16.msrb.mxu0 %v8367_v42  ;;  %v9534_v11 = vld [vmem:[%s10325_s28 + $0xe84] sm:$0xf]  ;;  %v8716_v19 = vld [vmem:[%s10325_s28 + $0xf90] sm:$0xf0]  ;;  %v8463_v55 = vor.u32 %v9502_v2, %v8460_v9 }
 0x2b9   : > { %5174 = vmatpush.bf16.msrb.mxu1 %v8495_v43  ;;  %v9566_v15 = vld [vmem:[%s10325_s28 + $0xf84] sm:$0xf]  ;;  %v8591_v24 = vor.u32 %v9534_v11, %v8588_v12  ;;  %v8316_v26 = vld [vmem:[%s10325_s28 + $0xc70] sm:$0xf0]  ;;  %v4948_v46 = vpop.f32.mrf.mxu3  ;;  %v4924_v51 = vpop.f32.mrf.mxu1 }
 0x2ba   : > { %5187 = vmatpush.bf16.msrb.mxu2 %v8623_v44  ;;  %v9466_v25 = vld [vmem:[%s10325_s28 + $0xc64] sm:$0xf]  ;;  %v8719_v28 = vor.u32 %v9566_v15, %v8716_v19  ;;  %v8444_v30 = vld [vmem:[%s10325_s28 + $0xd70] sm:$0xf0]  ;;  %v4935_v41 = vpop.f32.mrf.mxu2  ;;  %v4911_v49 = vpop.f32.mrf.mxu0  ;;  %v9161_v51 = vld [vmem:[%s10325_s28 + $0x2d4] sm:$0xf0] }
 0x2bb   : > { %v9498_v27 = vld [vmem:[%s10325_s28 + $0xd64] sm:$0xf]  ;;  %v8572_v37 = vld [vmem:[%s10325_s28 + $0xe70] sm:$0xf0]  ;;  %v8319_v33 = vor.u32 %v9466_v25, %v8316_v26  ;;  %v4936_v45 = vadd.f32 %v4935_v41, %v4923_v29  ;;  %v9129_v49 = vld [vmem:[%s10325_s28 + $0x1d4] sm:$0xf0] }
 0x2bc   : > { %5200 = vmatpush.bf16.msrb.mxu3 %v8751_v48  ;;  %5162 = vmatpush.bf16.msrb.mxu0 %v8351_v54  ;;  %v9530_v31 = vld [vmem:[%s10325_s28 + $0xe64] sm:$0xf]  ;;  %v8700_v32 = vld [vmem:[%s10325_s28 + $0xf70] sm:$0xf0]  ;;  %v8447_v34 = vor.u32 %v9498_v27, %v8444_v30  ;;  %v6850_v30 = vld [vmem:[%s10325_s28 + $0xe8] sm:$0xf] }
 0x2bd   : > { %5175 = vmatpush.bf16.msrb.mxu1 %v8479_v56  ;;  %v9562_v16 = vld [vmem:[%s10325_s28 + $0xf64] sm:$0xf]  ;;  %v8575_v35 = vor.u32 %v9530_v31, %v8572_v37  ;;  %v8300_v38 = vld [vmem:[%s10325_s28 + $0xc50] sm:$0xf0]  ;;  %v10927_v52 = vadd.f32 %v4948_v46, %v4936_v45  ;;  %v9101_v31 = vld [vmem:[%s10325_s28 + $0xf4] sm:$0xf0] }
 0x2be   : > { %5188 = vmatpush.bf16.msrb.mxu2 %v8607_v60  ;;  %v9462_v36 = vld [vmem:[%s10325_s28 + $0xc44] sm:$0xf]  ;;  %v8703_v40 = vor.u32 %v9562_v16, %v8700_v32  ;;  %v8428_v42 = vld [vmem:[%s10325_s28 + $0xd50] sm:$0xf0]  ;;  %v6978_v37 = vld [vmem:[%s10325_s28 + $0x1e8] sm:$0xf] }
 0x2bf   : > { %v9494_v39 = vld [vmem:[%s10325_s28 + $0xd44] sm:$0xf]  ;;  %v8556_v44 = vld [vmem:[%s10325_s28 + $0xe50] sm:$0xf0]  ;;  %v8303_v50 = vor.u32 %v9462_v36, %v8300_v38  ;;  %v6834_v45 = vld [vmem:[%s10325_s28 + $0xc8] sm:$0xf] }
 0x2c0   : > { %5201 = vmatpush.bf16.msrb.mxu3 %v8735_v7  ;;  %5163 = vmatpush.bf16.msrb.mxu0 %v8335_v22  ;;  %v9526_v43 = vld [vmem:[%s10325_s28 + $0xe44] sm:$0xf]  ;;  %v8684_v48 = vld [vmem:[%s10325_s28 + $0xf50] sm:$0xf0]  ;;  %v8431_v53 = vor.u32 %v9494_v39, %v8428_v42  ;;  %v7234_v39 = vld [vmem:[%s10325_s28 + $0x3e8] sm:$0xf]  ;;  %v6851_v42 = vor.u32 %v9101_v31, %v6850_v30 }
 0x2c1   : > { %5176 = vmatpush.bf16.msrb.mxu1 %v8463_v55  ;;  %v9558_v47 = vld [vmem:[%s10325_s28 + $0xf44] sm:$0xf]  ;;  %v8559_v54 = vor.u32 %v9526_v43, %v8556_v44  ;;  %v8284_v60 = vld [vmem:[%s10325_s28 + $0xc30] sm:$0xf0]  ;;  %v4950_v16 = vpop.f32.mrf.mxu3  ;;  %v9097_v46 = vld [vmem:[%s10325_s28 + $0xd4] sm:$0xf0] }
 0x2c2   : > { %5189 = vmatpush.bf16.msrb.mxu2 %v8591_v24  ;;  %v9458_v56 = vld [vmem:[%s10325_s28 + $0xc24] sm:$0xf]  ;;  %v8687_v1 = vor.u32 %v9558_v47, %v8684_v48  ;;  %v8412_v2 = vld [vmem:[%s10325_s28 + $0xd30] sm:$0xf0]  ;;  %v4937_v29 = vpop.f32.mrf.mxu2  ;;  %v6962_v47 = vld [vmem:[%s10325_s28 + $0x1c8] sm:$0xf] }
 0x2c3   : > { %v9490_v63 = vld [vmem:[%s10325_s28 + $0xd24] sm:$0xf]  ;;  %v8540_v9 = vld [vmem:[%s10325_s28 + $0xe30] sm:$0xf0]  ;;  %v8287_v14 = vor.u32 %v9458_v56, %v8284_v60  ;;  %v6835_v56 = vor.u32 %v9097_v46, %v6834_v45  ;;  %v6963_v60 = vor.u32 %v9129_v49, %v6962_v47  ;;  %v9153_v29 = vld [vmem:[%s10325_s28 + $0x294] sm:$0xf0] }
 0x2c4   : > { %5202 = vmatpush.bf16.msrb.mxu3 %v8719_v28  ;;  %5164 = vmatpush.bf16.msrb.mxu0 %v8319_v33  ;;  %v9522_v7 = vld [vmem:[%s10325_s28 + $0xe24] sm:$0xf]  ;;  %v8668_v12 = vld [vmem:[%s10325_s28 + $0xf30] sm:$0xf0]  ;;  %v8415_v21 = vor.u32 %v9490_v63, %v8412_v2  ;;  %v9133_v33 = vld [vmem:[%s10325_s28 + $0x1f4] sm:$0xf0] }
 0x2c5   : > { %5177 = vmatpush.bf16.msrb.mxu1 %v8447_v34  ;;  %v9554_v11 = vld [vmem:[%s10325_s28 + $0xf24] sm:$0xf]  ;;  %v8268_v19 = vld [vmem:[%s10325_s28 + $0xc10] sm:$0xf0]  ;;  %v8543_v22 = vor.u32 %v9522_v7, %v8540_v9  ;;  %v7106_v34 = vld [vmem:[%s10325_s28 + $0x2e8] sm:$0xf]  ;;  %v6979_v43 = vor.u32 %v9133_v33, %v6978_v37 }
 0x2c6   : > { %5190 = vmatpush.bf16.msrb.mxu2 %v8575_v35  ;;  %v9454_v15 = vld [vmem:[%s10325_s28 + $0xc04] sm:$0xf]  ;;  %v8396_v55 = vld [vmem:[%s10325_s28 + $0xd10] sm:$0xf0]  ;;  %v8671_v25 = vor.u32 %v9554_v11, %v8668_v12  ;;  %v9165_v35 = vld [vmem:[%s10325_s28 + $0x2f4] sm:$0xf0] }
 0x2c7   : > { %v9486_v23 = vld [vmem:[%s10325_s28 + $0xd04] sm:$0xf]  ;;  %v8524_v26 = vld [vmem:[%s10325_s28 + $0xe10] sm:$0xf0]  ;;  %v8271_v32 = vor.u32 %v9454_v15, %v8268_v19  ;;  %v7107_v44 = vor.u32 %v9165_v35, %v7106_v34  ;;  %v9093_v2 = vld [vmem:[%s10325_s28 + $0xb4] sm:$0xf0] }
 0x2c8   : > { %5203 = vmatpush.bf16.msrb.mxu3 %v8703_v40  ;;  %5165 = vmatpush.bf16.msrb.mxu0 %v8303_v50  ;;  %v9518_v24 = vld [vmem:[%s10325_s28 + $0xe04] sm:$0xf]  ;;  %v8652_v28 = vld [vmem:[%s10325_s28 + $0xf10] sm:$0xf0]  ;;  %v8399_v36 = vor.u32 %v9486_v23, %v8396_v55  ;;  %v9197_v40 = vld [vmem:[%s10325_s28 + $0x3f4] sm:$0xf0] }
 0x2c9   : > { %5178 = vmatpush.bf16.msrb.mxu1 %v8431_v53  ;;  %v9550_v27 = vld [vmem:[%s10325_s28 + $0xf04] sm:$0xf]  ;;  %v8527_v38 = vor.u32 %v9518_v24, %v8524_v26  ;;  %v7235_v48 = vor.u32 %v9197_v40, %v7234_v39  ;;  %v7090_v50 = vld [vmem:[%s10325_s28 + $0x2c8] sm:$0xf]  ;;  %v9125_v11 = vld [vmem:[%s10325_s28 + $0x1b4] sm:$0xf0] }
 0x2ca   : > { %5191 = vmatpush.bf16.msrb.mxu2 %v8559_v54  ;;  %v8655_v41 = vor.u32 %v9550_v27, %v8652_v28  ;;  %v7218_v53 = vld [vmem:[%s10325_s28 + $0x3c8] sm:$0xf]  ;;  %v9193_v54 = vld [vmem:[%s10325_s28 + $0x3d4] sm:$0xf0]  ;;  %v7091_v63 = vor.u32 %v9161_v51, %v7090_v50 }
 0x2cb   : > { %v6946_v7 = vld [vmem:[%s10325_s28 + $0x1a8] sm:$0xf]  ;;  %v7219_v9 = vor.u32 %v9193_v54, %v7218_v53  ;;  %v9189_v19 = vld [vmem:[%s10325_s28 + $0x3b4] sm:$0xf0] }
 0x2cc   : > { %5204 = vmatpush.bf16.msrb.mxu3 %v8687_v1  ;;  %5166 = vmatpush.bf16.msrb.mxu0 %v8287_v14  ;;  %v6818_v1 = vld [vmem:[%s10325_s28 + $0xa8] sm:$0xf]  ;;  %v9157_v14 = vld [vmem:[%s10325_s28 + $0x2b4] sm:$0xf0] }
 0x2cd   : > { %5179 = vmatpush.bf16.msrb.mxu1 %v8415_v21  ;;  %v7074_v12 = vld [vmem:[%s10325_s28 + $0x2a8] sm:$0xf]  ;;  %v6819_v21 = vor.u32 %v9093_v2, %v6818_v1  ;;  %v9089_v24 = vld [vmem:[%s10325_s28 + $0x94] sm:$0xf0] }
 0x2ce   : > { %5192 = vmatpush.bf16.msrb.mxu2 %v8543_v22  ;;  %v7202_v15 = vld [vmem:[%s10325_s28 + $0x3a8] sm:$0xf]  ;;  %v6947_v22 = vor.u32 %v9125_v11, %v6946_v7  ;;  %v7075_v23 = vor.u32 %v9157_v14, %v7074_v12  ;;  %v9121_v27 = vld [vmem:[%s10325_s28 + $0x194] sm:$0xf0] }
 0x2cf   : > { %v6802_v55 = vld [vmem:[%s10325_s28 + $0x88] sm:$0xf]  ;;  %v7203_v26 = vor.u32 %v9189_v19, %v7202_v15  ;;  %v9185_v37 = vld [vmem:[%s10325_s28 + $0x394] sm:$0xf0] }
 0x2d0   : > { %5205 = vmatpush.bf16.msrb.mxu3 %v8671_v25  ;;  %5167 = vmatpush.bf16.msrb.mxu0 %v8271_v32  ;;  %v6930_v25 = vld [vmem:[%s10325_s28 + $0x188] sm:$0xf]  ;;  %v6803_v32 = vor.u32 %v9089_v24, %v6802_v55  ;;  %v9181_v45 = vld [vmem:[%s10325_s28 + $0x374] sm:$0xf0] }
 0x2d1   : > { %5180 = vmatpush.bf16.msrb.mxu1 %v8399_v36  ;;  %v7058_v28 = vld [vmem:[%s10325_s28 + $0x288] sm:$0xf]  ;;  %v6931_v34 = vor.u32 %v9121_v27, %v6930_v25  ;;  %v9081_v50 = vld [vmem:[%s10325_s28 + $0x54] sm:$0xf0] }
 0x2d2   : > { %5193 = vmatpush.bf16.msrb.mxu2 %v8527_v38  ;;  %v4961_v30 = vpop.f32.mrf.mxu0  ;;  %v7186_v31 = vld [vmem:[%s10325_s28 + $0x388] sm:$0xf]  ;;  %v7059_v35 = vor.u32 %v9153_v29, %v7058_v28  ;;  %v9085_v38 = vld [vmem:[%s10325_s28 + $0x74] sm:$0xf0] }
 0x2d3   : > { %5168 = vmatmul.bf16.vlgmr.msrb.gmra.mxu0 %v10667_v62  ;;  %v4962_v16 = vadd.f32 %v4961_v30, %v10927_v52  ;;  %v4974_v33 = vpop.f32.mrf.mxu1  ;;  %v6786_v36 = vld [vmem:[%s10325_s28 + $0x68] sm:$0xf]  ;;  %v7187_v40 = vor.u32 %v9185_v37, %v7186_v31  ;;  %v9149_v52 = vld [vmem:[%s10325_s28 + $0x274] sm:$0xf0] }
 0x2d4   : > { %5206 = vmatpush.bf16.msrb.mxu3 %v8655_v41  ;;  %5212 = vmatpush.bf16.msra.mxu0 %v6851_v42  ;;  %v6914_v39 = vld [vmem:[%s10325_s28 + $0x168] sm:$0xf]  ;;  %v9117_v42 = vld [vmem:[%s10325_s28 + $0x174] sm:$0xf0]  ;;  %v6787_v46 = vor.u32 %v9085_v38, %v6786_v36 }
 0x2d5   : > { %5225 = vmatpush.bf16.msra.mxu1 %v6979_v43  ;;  %5194 = vmatmul.bf16.vlgmr.msrb.gmra.mxu2 %v10672_v3  ;;  %v4975_v41 = vadd.f32 %v4974_v33, %v4962_v16  ;;  %v7042_v43 = vld [vmem:[%s10325_s28 + $0x268] sm:$0xf]  ;;  %v6915_v47 = vor.u32 %v9117_v42, %v6914_v39  ;;  %v9109_v25 = vld [vmem:[%s10325_s28 + $0x134] sm:$0xf0] }
 0x2d6   : > { %5238 = vmatpush.bf16.msra.mxu2 %v7107_v44  ;;  %5181 = vmatmul.bf16.vlgmr.msrb.gmra.mxu1 %v10674_v6  ;;  %v7170_v44 = vld [vmem:[%s10325_s28 + $0x368] sm:$0xf]  ;;  %v9141_v27 = vld [vmem:[%s10325_s28 + $0x234] sm:$0xf0] }
 0x2d7   : > { %5207 = vmatmul.bf16.vlgmr.msrb.gmra.mxu3 %v10678_v10  ;;  %v6770_v49 = vld [vmem:[%s10325_s28 + $0x48] sm:$0xf]  ;;  %v7171_v53 = vor.u32 %v9181_v45, %v7170_v44  ;;  %v9173_v29 = vld [vmem:[%s10325_s28 + $0x334] sm:$0xf0] }
 0x2d8   : > { %5251 = vmatpush.bf16.msra.mxu3 %v7235_v48  ;;  %5213 = vmatpush.bf16.msra.mxu0 %v6835_v56  ;;  %v7043_v48 = vor.u32 %v9149_v52, %v7042_v43  ;;  %v6898_v51 = vld [vmem:[%s10325_s28 + $0x148] sm:$0xf]  ;;  %v9113_v56 = vld [vmem:[%s10325_s28 + $0x154] sm:$0xf0]  ;;  %v6771_v12 = vor.u32 %v9081_v50, %v6770_v49 }
 0x2d9   : > { %5226 = vmatpush.bf16.msra.mxu1 %v6963_v60  ;;  %v7026_v60 = vld [vmem:[%s10325_s28 + $0x248] sm:$0xf]  ;;  %v6899_v19 = vor.u32 %v9113_v56, %v6898_v51  ;;  %v9073_v37 = vld [vmem:[%s10325_s28 + $0x14] sm:$0xf0] }
 0x2da   : > { %5239 = vmatpush.bf16.msra.mxu2 %v7091_v63  ;;  %v4987_v54 = vpop.f32.mrf.mxu2  ;;  %v9145_v63 = vld [vmem:[%s10325_s28 + $0x254] sm:$0xf0]  ;;  %v5000_v2 = vpop.f32.mrf.mxu3  ;;  %v7154_v7 = vld [vmem:[%s10325_s28 + $0x348] sm:$0xf] }
 0x2db   : > { %v4988_v1 = vadd.f32 %v4987_v54, %v4975_v41  ;;  %v4963_v11 = vpop.f32.mrf.mxu0  ;;  %v4976_v14 = vpop.f32.mrf.mxu1  ;;  %v6882_v55 = vld [vmem:[%s10325_s28 + $0x128] sm:$0xf]  ;;  %v9137_v38 = vld [vmem:[%s10325_s28 + $0x214] sm:$0xf0] }
 0x2dc   : > { %5252 = vmatpush.bf16.msra.mxu3 %v7219_v9  ;;  %5214 = vmatpush.bf16.msra.mxu0 %v6819_v21  ;;  %v9177_v9 = vld [vmem:[%s10325_s28 + $0x354] sm:$0xf0]  ;;  %v7027_v21 = vor.u32 %v9145_v63, %v7026_v60  ;;  %v7138_v28 = vld [vmem:[%s10325_s28 + $0x328] sm:$0xf]  ;;  %v6883_v16 = vor.u32 %v9109_v25, %v6882_v55 }
 0x2dd   : > { %5227 = vmatpush.bf16.msra.mxu1 %v6947_v22  ;;  %v10998_v15 = vadd.f32 %v5000_v2, %v4988_v1  ;;  %v6754_v22 = vld [vmem:[%s10325_s28 + $0x28] sm:$0xf]  ;;  %v7155_v24 = vor.u32 %v9177_v9, %v7154_v7  ;;  %v7139_v36 = vor.u32 %v9173_v29, %v7138_v28  ;;  %v9229_v43 = vld [vmem:[%s10325_s28 + $0x4f4] sm:$0xf0] }
 0x2de   : > { %5240 = vmatpush.bf16.msra.mxu2 %v7075_v23  ;;  %v9077_v23 = vld [vmem:[%s10325_s28 + $0x34] sm:$0xf0]  ;;  %v6738_v31 = vld [vmem:[%s10325_s28 + $0x8] sm:$0xf] }
 0x2df   : > { %v6755_v30 = vor.u32 %v9077_v23, %v6754_v22  ;;  %v6866_v33 = vld [vmem:[%s10325_s28 + $0x108] sm:$0xf]  ;;  %v6739_v45 = vor.u32 %v9073_v37, %v6738_v31  ;;  %v9225_v2 = vld [vmem:[%s10325_s28 + $0x4d4] sm:$0xf0] }
 0x2e0   : > { %5253 = vmatpush.bf16.msra.mxu3 %v7203_v26  ;;  %5215 = vmatpush.bf16.msra.mxu0 %v6803_v32  ;;  %v7010_v26 = vld [vmem:[%s10325_s28 + $0x228] sm:$0xf]  ;;  %v9257_v11 = vld [vmem:[%s10325_s28 + $0x5d4] sm:$0xf0] }
 0x2e1   : > { %5228 = vmatpush.bf16.msra.mxu1 %v6931_v34  ;;  %v7011_v32 = vor.u32 %v9141_v27, %v7010_v26  ;;  %v9105_v34 = vld [vmem:[%s10325_s28 + $0x114] sm:$0xf0]  ;;  %v7122_v39 = vld [vmem:[%s10325_s28 + $0x308] sm:$0xf] }
 0x2e2   : > { %5241 = vmatpush.bf16.msra.mxu2 %v7059_v35  ;;  %v6994_v35 = vld [vmem:[%s10325_s28 + $0x208] sm:$0xf]  ;;  %v4989_v41 = vpop.f32.mrf.mxu2  ;;  %v5002_v44 = vpop.f32.mrf.mxu3  ;;  %v6867_v49 = vor.u32 %v9105_v34, %v6866_v33  ;;  %v9289_v14 = vld [vmem:[%s10325_s28 + $0x6d4] sm:$0xf0] }
 0x2e3   : > { %v7362_v42 = vld [vmem:[%s10325_s28 + $0x4e8] sm:$0xf]  ;;  %v6995_v50 = vor.u32 %v9137_v38, %v6994_v35  ;;  %v9221_v25 = vld [vmem:[%s10325_s28 + $0x4b4] sm:$0xf0]  ;;  %v9739_v38 = vld [vmem:[%s10331_s3] sm:$0xf] }
 0x2e4   : > { %5254 = vmatpush.bf16.msra.mxu3 %v7187_v40  ;;  %5216 = vmatpush.bf16.msra.mxu0 %v6787_v46  ;;  %v9169_v40 = vld [vmem:[%s10325_s28 + $0x314] sm:$0xf0]  ;;  %v7490_v52 = vld [vmem:[%s10325_s28 + $0x5e8] sm:$0xf]  ;;  %v7363_v56 = vor.u32 %v9229_v43, %v7362_v42 }
 0x2e5   : > { %5229 = vmatpush.bf16.msra.mxu1 %v6915_v47  ;;  %v9261_v46 = vld [vmem:[%s10325_s28 + $0x5f4] sm:$0xf0]  ;;  %v7618_v47 = vld [vmem:[%s10325_s28 + $0x6e8] sm:$0xf]  ;;  %v7123_v54 = vor.u32 %v9169_v40, %v7122_v39  ;;  %v2173_v39 = vperm.slane %v9739_v38, 1 }
 0x2e6   : > { %5242 = vmatpush.bf16.msra.mxu2 %v7043_v48  ;;  %v9293_v48 = vld [vmem:[%s10325_s28 + $0x6f4] sm:$0xf0]  ;;  %v7746_v51 = vld [vmem:[%s10325_s28 + $0x7e8] sm:$0xf]  ;;  %v7491_v60 = vor.u32 %v9261_v46, %v7490_v52 }
 0x2e7   : > { %v7619_v63 = vor.u32 %v9293_v48, %v7618_v47  ;;  %v7346_v1 = vld [vmem:[%s10325_s28 + $0x4c8] sm:$0xf]  ;;  %v9253_v28 = vld [vmem:[%s10325_s28 + $0x5b4] sm:$0xf0] }
 0x2e8   : > { %5255 = vmatpush.bf16.msra.mxu3 %v7171_v53  ;;  %5217 = vmatpush.bf16.msra.mxu0 %v6771_v12  ;;  %v9325_v53 = vld [vmem:[%s10325_s28 + $0x7f4] sm:$0xf0]  ;;  %v7474_v7 = vld [vmem:[%s10325_s28 + $0x5c8] sm:$0xf]  ;;  %v7347_v22 = vor.u32 %v9225_v2, %v7346_v1 }
 0x2e9   : > { %5230 = vmatpush.bf16.msra.mxu1 %v6899_v19  ;;  %v7747_v9 = vor.u32 %v9325_v53, %v7746_v51  ;;  %v7602_v12 = vld [vmem:[%s10325_s28 + $0x6c8] sm:$0xf]  ;;  %v7475_v23 = vor.u32 %v9257_v11, %v7474_v7  ;;  %v9317_v37 = vld [vmem:[%s10325_s28 + $0x7b4] sm:$0xf0] }
 0x2ea   : > { %5243 = vmatpush.bf16.msra.mxu2 %v7027_v21  ;;  %v7730_v19 = vld [vmem:[%s10325_s28 + $0x7c8] sm:$0xf]  ;;  %v9321_v21 = vld [vmem:[%s10325_s28 + $0x7d4] sm:$0xf0]  ;;  %v7603_v55 = vor.u32 %v9289_v14, %v7602_v12 }
 0x2eb   : > { %v7458_v26 = vld [vmem:[%s10325_s28 + $0x5a8] sm:$0xf]  ;;  %v7731_v27 = vor.u32 %v9321_v21, %v7730_v19  ;;  %v9217_v35 = vld [vmem:[%s10325_s28 + $0x494] sm:$0xf0] }
 0x2ec   : > { %5256 = vmatpush.bf16.msra.mxu3 %v7155_v24  ;;  %5218 = vmatpush.bf16.msra.mxu0 %v6755_v30  ;;  %v7330_v24 = vld [vmem:[%s10325_s28 + $0x4a8] sm:$0xf]  ;;  %v9285_v30 = vld [vmem:[%s10325_s28 + $0x6b4] sm:$0xf0]  ;;  %v7459_v33 = vor.u32 %v9253_v28, %v7458_v26 }
 0x2ed   : > { %5231 = vmatpush.bf16.msra.mxu1 %v6883_v16  ;;  %v7586_v29 = vld [vmem:[%s10325_s28 + $0x6a8] sm:$0xf]  ;;  %v7331_v16 = vor.u32 %v9221_v25, %v7330_v24  ;;  %v9249_v41 = vld [vmem:[%s10325_s28 + $0x594] sm:$0xf0] }
 0x2ee   : > { %5244 = vmatpush.bf16.msra.mxu2 %v7011_v32  ;;  %v7714_v31 = vld [vmem:[%s10325_s28 + $0x7a8] sm:$0xf]  ;;  %v7587_v34 = vor.u32 %v9285_v30, %v7586_v29  ;;  %v9281_v43 = vld [vmem:[%s10325_s28 + $0x694] sm:$0xf0] }
 0x2ef   : > { %v7314_v32 = vld [vmem:[%s10325_s28 + $0x488] sm:$0xf]  ;;  %v7715_v40 = vor.u32 %v9317_v37, %v7714_v31  ;;  %v9313_v44 = vld [vmem:[%s10325_s28 + $0x794] sm:$0xf0] }
 0x2f0   : > { %5257 = vmatpush.bf16.msra.mxu3 %v7139_v36  ;;  %5219 = vmatpush.bf16.msra.mxu0 %v6739_v45  ;;  %v7442_v36 = vld [vmem:[%s10325_s28 + $0x588] sm:$0xf]  ;;  %v7315_v45 = vor.u32 %v9217_v35, %v7314_v32  ;;  %v5013_v46 = vpop.f32.mrf.mxu0  ;;  %v9277_v1 = vld [vmem:[%s10325_s28 + $0x674] sm:$0xf0] }
 0x2f1   : > { %5232 = vmatpush.bf16.msra.mxu1 %v6867_v49  ;;  %v7570_v42 = vld [vmem:[%s10325_s28 + $0x688] sm:$0xf]  ;;  %v7443_v47 = vor.u32 %v9249_v41, %v7442_v36  ;;  %v5014_v53 = vadd.f32 %v5013_v46, %v2173_v39  ;;  %v9309_v7 = vld [vmem:[%s10325_s28 + $0x774] sm:$0xf0] }
 0x2f2   : > { %5245 = vmatpush.bf16.msra.mxu2 %v6995_v50  ;;  %v7698_v52 = vld [vmem:[%s10325_s28 + $0x788] sm:$0xf]  ;;  %v7571_v48 = vor.u32 %v9281_v43, %v7570_v42  ;;  %v9213_v50 = vld [vmem:[%s10325_s28 + $0x474] sm:$0xf0] }
 0x2f3   : > { %5220 = vmatmul.bf16.vlgmr.msra.gmra.mxu0 %v10462_v58  ;;  %v7298_v49 = vld [vmem:[%s10325_s28 + $0x468] sm:$0xf]  ;;  %v9209_v21 = vld [vmem:[%s10325_s28 + $0x454] sm:$0xf0] }
 0x2f4   : > { %5258 = vmatpush.bf16.msra.mxu3 %v7123_v54  ;;  %5264 = vmatpush.bf16.msrb.mxu0 %v7363_v56  ;;  %v7426_v51 = vld [vmem:[%s10325_s28 + $0x568] sm:$0xf]  ;;  %v5026_v54 = vpop.f32.mrf.mxu1  ;;  %v7699_v56 = vor.u32 %v9313_v44, %v7698_v52  ;;  %v7299_v11 = vor.u32 %v9213_v50, %v7298_v49  ;;  %v9241_v24 = vld [vmem:[%s10325_s28 + $0x554] sm:$0xf0] }
 0x2f5   : > { %5277 = vmatpush.bf16.msrb.mxu1 %v7491_v60  ;;  %5246 = vmatmul.bf16.vlgmr.msra.gmra.mxu2 %v10460_v57  ;;  %v9245_v60 = vld [vmem:[%s10325_s28 + $0x574] sm:$0xf0]  ;;  %v7682_v2 = vld [vmem:[%s10325_s28 + $0x768] sm:$0xf] }
 0x2f6   : > { %5290 = vmatpush.bf16.msrb.mxu2 %v7619_v63  ;;  %5233 = vmatmul.bf16.vlgmr.msra.gmra.mxu1 %v10466_v61  ;;  %v7554_v63 = vld [vmem:[%s10325_s28 + $0x668] sm:$0xf]  ;;  %v7427_v12 = vor.u32 %v9245_v60, %v7426_v51  ;;  %v9273_v26 = vld [vmem:[%s10325_s28 + $0x654] sm:$0xf0] }
 0x2f7   : > { %5259 = vmatmul.bf16.vlgmr.msra.gmra.mxu3 %v10464_v59  ;;  %v7555_v14 = vor.u32 %v9277_v1, %v7554_v63  ;;  %v7282_v19 = vld [vmem:[%s10325_s28 + $0x448] sm:$0xf]  ;;  %v9305_v30 = vld [vmem:[%s10325_s28 + $0x754] sm:$0xf0] }
 0x2f8   : > { %5303 = vmatpush.bf16.msrb.mxu3 %v7747_v9  ;;  %5265 = vmatpush.bf16.msrb.mxu0 %v7347_v22  ;;  %v5027_v9 = vadd.f32 %v5026_v54, %v5014_v53  ;;  %v7410_v22 = vld [vmem:[%s10325_s28 + $0x548] sm:$0xf]  ;;  %v7283_v31 = vor.u32 %v9209_v21, %v7282_v19  ;;  %v9205_v35 = vld [vmem:[%s10325_s28 + $0x434] sm:$0xf0] }
 0x2f9   : > { %5278 = vmatpush.bf16.msrb.mxu1 %v7475_v23  ;;  %v5039_v23 = vpop.f32.mrf.mxu2  ;;  %v7538_v25 = vld [vmem:[%s10325_s28 + $0x648] sm:$0xf]  ;;  %v7411_v32 = vor.u32 %v9241_v24, %v7410_v22  ;;  %v9269_v42 = vld [vmem:[%s10325_s28 + $0x634] sm:$0xf0] }
 0x2fa   : > { %5291 = vmatpush.bf16.msrb.mxu2 %v7603_v55  ;;  %v7683_v55 = vor.u32 %v9309_v7, %v7682_v2  ;;  %v5052_v28 = vpop.f32.mrf.mxu3  ;;  %v7666_v29 = vld [vmem:[%s10325_s28 + $0x748] sm:$0xf]  ;;  %v9301_v52 = vld [vmem:[%s10325_s28 + $0x734] sm:$0xf0] }
 0x2fb   : > { %v7394_v36 = vld [vmem:[%s10325_s28 + $0x528] sm:$0xf]  ;;  %v7667_v39 = vor.u32 %v9305_v30, %v7666_v29  ;;  %v9201_v46 = vld [vmem:[%s10325_s28 + $0x414] sm:$0xf0] }
 0x2fc   : > { %5304 = vmatpush.bf16.msrb.mxu3 %v7731_v27  ;;  %5266 = vmatpush.bf16.msrb.mxu0 %v7331_v16  ;;  %v5040_v27 = vadd.f32 %v5039_v23, %v5027_v9  ;;  %v5015_v16 = vpop.f32.mrf.mxu0  ;;  %v5028_v38 = vpop.f32.mrf.mxu1  ;;  %v7522_v41 = vld [vmem:[%s10325_s28 + $0x628] sm:$0xf]  ;;  %v9233_v50 = vld [vmem:[%s10325_s28 + $0x514] sm:$0xf0] }
 0x2fd   : > { %5279 = vmatpush.bf16.msrb.mxu1 %v7459_v33  ;;  %v7539_v33 = vor.u32 %v9273_v26, %v7538_v25  ;;  %v7650_v43 = vld [vmem:[%s10325_s28 + $0x728] sm:$0xf]  ;;  %v9297_v63 = vld [vmem:[%s10325_s28 + $0x714] sm:$0xf0] }
 0x2fe   : > { %5292 = vmatpush.bf16.msrb.mxu2 %v7587_v34  ;;  %v11069_v37 = vadd.f32 %v5052_v28, %v5040_v27  ;;  %v7266_v34 = vld [vmem:[%s10325_s28 + $0x428] sm:$0xf]  ;;  %v7651_v54 = vor.u32 %v9301_v52, %v7650_v43  ;;  %v9357_v7 = vld [vmem:[%s10325_s28 + $0x8f4] sm:$0xf0] }
 0x2ff   : > { %v7267_v44 = vor.u32 %v9205_v35, %v7266_v34  ;;  %v7378_v49 = vld [vmem:[%s10325_s28 + $0x508] sm:$0xf]  ;;  %v9421_v19 = vld [vmem:[%s10325_s28 + $0xaf4] sm:$0xf0] }
 0x300   : > { %5305 = vmatpush.bf16.msrb.mxu3 %v7715_v40  ;;  %5267 = vmatpush.bf16.msrb.mxu0 %v7315_v45  ;;  %v9237_v40 = vld [vmem:[%s10325_s28 + $0x534] sm:$0xf0]  ;;  %v7250_v45 = vld [vmem:[%s10325_s28 + $0x408] sm:$0xf]  ;;  %v7379_v21 = vor.u32 %v9233_v50, %v7378_v49 }
 0x301   : > { %5280 = vmatpush.bf16.msrb.mxu1 %v7443_v47  ;;  %v7395_v47 = vor.u32 %v9237_v40, %v7394_v36  ;;  %v7506_v51 = vld [vmem:[%s10325_s28 + $0x608] sm:$0xf]  ;;  %v5041_v53 = vpop.f32.mrf.mxu2  ;;  %v9353_v29 = vld [vmem:[%s10325_s28 + $0x8d4] sm:$0xf0] }
 0x302   : > { %5293 = vmatpush.bf16.msrb.mxu2 %v7571_v48  ;;  %v7523_v48 = vor.u32 %v9269_v42, %v7522_v41  ;;  %v7634_v60 = vld [vmem:[%s10325_s28 + $0x708] sm:$0xf]  ;;  %v5054_v1 = vpop.f32.mrf.mxu3  ;;  %v9385_v16 = vld [vmem:[%s10325_s28 + $0x9d4] sm:$0xf0] }
 0x303   : > { %v7874_v2 = vld [vmem:[%s10325_s28 + $0x8e8] sm:$0xf]  ;;  %v7635_v24 = vor.u32 %v9297_v63, %v7634_v60  ;;  %v9449_v35 = vld [vmem:[%s10325_s28 + $0xbd4] sm:$0xf0] }
 0x304   : > { %5306 = vmatpush.bf16.msrb.mxu3 %v7699_v56  ;;  %5268 = vmatpush.bf16.msrb.mxu0 %v7299_v11  ;;  %v9265_v56 = vld [vmem:[%s10325_s28 + $0x614] sm:$0xf0]  ;;  %v8002_v9 = vld [vmem:[%s10325_s28 + $0x9e8] sm:$0xf]  ;;  %v7251_v11 = vor.u32 %v9201_v46, %v7250_v45  ;;  %v7875_v25 = vor.u32 %v9357_v7, %v7874_v2 }
 0x305   : > { %5281 = vmatpush.bf16.msrb.mxu1 %v7427_v12  ;;  %v9389_v12 = vld [vmem:[%s10325_s28 + $0x9f4] sm:$0xf0]  ;;  %v7507_v22 = vor.u32 %v9265_v56, %v7506_v51  ;;  %v8258_v23 = vld [vmem:[%s10325_s28 + $0xbe8] sm:$0xf] }
 0x306   : > { %5294 = vmatpush.bf16.msrb.mxu2 %v7555_v14  ;;  %v8130_v14 = vld [vmem:[%s10325_s28 + $0xae8] sm:$0xf]  ;;  %v8003_v26 = vor.u32 %v9389_v12, %v8002_v9  ;;  %v9349_v41 = vld [vmem:[%s10325_s28 + $0x8b4] sm:$0xf0] }
 0x307   : > { %v8131_v27 = vor.u32 %v9421_v19, %v8130_v14  ;;  %v7858_v28 = vld [vmem:[%s10325_s28 + $0x8c8] sm:$0xf]  ;;  %v9381_v52 = vld [vmem:[%s10325_s28 + $0x9b4] sm:$0xf0] }
 0x308   : > { %5307 = vmatpush.bf16.msrb.mxu3 %v7683_v55  ;;  %5269 = vmatpush.bf16.msrb.mxu0 %v7283_v31  ;;  %v9453_v55 = vld [vmem:[%s10325_s28 + $0xbf4] sm:$0xf0]  ;;  %v7986_v30 = vld [vmem:[%s10325_s28 + $0x9c8] sm:$0xf]  ;;  %v7859_v36 = vor.u32 %v9353_v29, %v7858_v28 }
 0x309   : > { %5282 = vmatpush.bf16.msrb.mxu1 %v7411_v32  ;;  %v8259_v31 = vor.u32 %v9453_v55, %v8258_v23  ;;  %v8114_v32 = vld [vmem:[%s10325_s28 + $0xac8] sm:$0xf]  ;;  %v7987_v38 = vor.u32 %v9385_v16, %v7986_v30  ;;  %v9413_v45 = vld [vmem:[%s10325_s28 + $0xab4] sm:$0xf0] }
 0x30a   : > { %5295 = vmatpush.bf16.msrb.mxu2 %v7539_v33  ;;  %v9417_v33 = vld [vmem:[%s10325_s28 + $0xad4] sm:$0xf0]  ;;  %v8242_v34 = vld [vmem:[%s10325_s28 + $0xbc8] sm:$0xf] }
 0x30b   : > { %v7842_v40 = vld [vmem:[%s10325_s28 + $0x8a8] sm:$0xf]  ;;  %v8243_v43 = vor.u32 %v9449_v35, %v8242_v34  ;;  %v9345_v53 = vld [vmem:[%s10325_s28 + $0x894] sm:$0xf0] }
 0x30c   : > { %5308 = vmatpush.bf16.msrb.mxu3 %v7667_v39  ;;  %5270 = vmatpush.bf16.msrb.mxu0 %v7267_v44  ;;  %v8115_v39 = vor.u32 %v9417_v33, %v8114_v32  ;;  %v7970_v42 = vld [vmem:[%s10325_s28 + $0x9a8] sm:$0xf]  ;;  %v9377_v60 = vld [vmem:[%s10325_s28 + $0x994] sm:$0xf0] }
 0x30d   : > { %5283 = vmatpush.bf16.msrb.mxu1 %v7395_v47  ;;  %v8098_v44 = vld [vmem:[%s10325_s28 + $0xaa8] sm:$0xf]  ;;  %v9445_v47 = vld [vmem:[%s10325_s28 + $0xbb4] sm:$0xf0]  ;;  %v7971_v49 = vor.u32 %v9381_v52, %v7970_v42 }
 0x30e   : > { %5296 = vmatpush.bf16.msrb.mxu2 %v7523_v48  ;;  %v8226_v46 = vld [vmem:[%s10325_s28 + $0xba8] sm:$0xf]  ;;  %v7843_v48 = vor.u32 %v9349_v41, %v7842_v40  ;;  %v8099_v50 = vor.u32 %v9413_v45, %v8098_v44  ;;  %v9409_v1 = vld [vmem:[%s10325_s28 + $0xa94] sm:$0xf0] }
 0x30f   : > { %v7826_v51 = vld [vmem:[%s10325_s28 + $0x888] sm:$0xf]  ;;  %v8227_v56 = vor.u32 %v9445_v47, %v8226_v46  ;;  %v9441_v7 = vld [vmem:[%s10325_s28 + $0xb94] sm:$0xf0] }
 0x310   : > { %5309 = vmatpush.bf16.msrb.mxu3 %v7651_v54  ;;  %5271 = vmatpush.bf16.msrb.mxu0 %v7251_v11  ;;  %v7954_v54 = vld [vmem:[%s10325_s28 + $0x988] sm:$0xf]  ;;  %v7827_v9 = vor.u32 %v9345_v53, %v7826_v51  ;;  %v5065_v11 = vpop.f32.mrf.mxu0  ;;  %v9437_v29 = vld [vmem:[%s10325_s28 + $0xb74] sm:$0xf0] }
 0x311   : > { %5284 = vmatpush.bf16.msrb.mxu1 %v7379_v21  ;;  %v8082_v63 = vld [vmem:[%s10325_s28 + $0xa88] sm:$0xf]  ;;  %v7955_v12 = vor.u32 %v9377_v60, %v7954_v54  ;;  %v9341_v21 = vld [vmem:[%s10325_s28 + $0x874] sm:$0xf0]  ;;  %v5066_v23 = vadd.f32 %v5065_v11, %v11069_v37 }
 0x312   : > { %5297 = vmatpush.bf16.msrb.mxu2 %v7507_v22  ;;  %v8210_v2 = vld [vmem:[%s10325_s28 + $0xb88] sm:$0xf]  ;;  %v8083_v14 = vor.u32 %v9409_v1, %v8082_v63  ;;  %v9337_v33 = vld [vmem:[%s10325_s28 + $0x854] sm:$0xf0] }
 0x313   : > { %5272 = vmatmul.bf16.vlgmr.msrb.gmra.mxu0 %v10522_v17  ;;  %v7810_v19 = vld [vmem:[%s10325_s28 + $0x868] sm:$0xf]  ;;  %v5078_v55 = vpop.f32.mrf.mxu1  ;;  %v9401_v40 = vld [vmem:[%s10325_s28 + $0xa54] sm:$0xf0] }
 0x314   : > { %5310 = vmatpush.bf16.msrb.mxu3 %v7635_v24  ;;  %5316 = vmatpush.bf16.msra.mxu0 %v7875_v25  ;;  %v7938_v22 = vld [vmem:[%s10325_s28 + $0x968] sm:$0xf]  ;;  %v8211_v24 = vor.u32 %v9441_v7, %v8210_v2  ;;  %v9373_v25 = vld [vmem:[%s10325_s28 + $0x974] sm:$0xf0]  ;;  %v5079_v30 = vadd.f32 %v5078_v55, %v5066_v23 }
 0x315   : > { %5329 = vmatpush.bf16.msra.mxu1 %v8003_v26  ;;  %5298 = vmatmul.bf16.vlgmr.msrb.gmra.mxu2 %v10518_v13  ;;  %v8066_v26 = vld [vmem:[%s10325_s28 + $0xa68] sm:$0xf]  ;;  %v7939_v37 = vor.u32 %v9373_v25, %v7938_v22  ;;  %v9433_v52 = vld [vmem:[%s10325_s28 + $0xb54] sm:$0xf0] }
 0x316   : > { %5342 = vmatpush.bf16.msra.mxu2 %v8131_v27  ;;  %5285 = vmatmul.bf16.vlgmr.msrb.gmra.mxu1 %v10526_v20  ;;  %v9405_v27 = vld [vmem:[%s10325_s28 + $0xa74] sm:$0xf0]  ;;  %v8194_v28 = vld [vmem:[%s10325_s28 + $0xb68] sm:$0xf] }
 0x317   : > { %5311 = vmatmul.bf16.vlgmr.msrb.gmra.mxu3 %v10524_v18  ;;  %v8067_v16 = vor.u32 %v9405_v27, %v8066_v26  ;;  %v7794_v32 = vld [vmem:[%s10325_s28 + $0x848] sm:$0xf]  ;;  %v9397_v63 = vld [vmem:[%s10325_s28 + $0xa34] sm:$0xf0] }
 0x318   : > { %5355 = vmatpush.bf16.msra.mxu3 %v8259_v31  ;;  %5317 = vmatpush.bf16.msra.mxu0 %v7859_v36  ;;  %v7811_v31 = vor.u32 %v9341_v21, %v7810_v19  ;;  %v7922_v34 = vld [vmem:[%s10325_s28 + $0x948] sm:$0xf]  ;;  %v5091_v35 = vpop.f32.mrf.mxu2  ;;  %v8195_v36 = vor.u32 %v9437_v29, %v8194_v28  ;;  %v7795_v44 = vor.u32 %v9337_v33, %v7794_v32  ;;  %v5067_v46 = vpop.f32.mrf.mxu0  ;;  %v9429_v2 = vld [vmem:[%s10325_s28 + $0xb34] sm:$0xf0] }
 0x319   : > { %5330 = vmatpush.bf16.msra.mxu1 %v7987_v38  ;;  %v9369_v38 = vld [vmem:[%s10325_s28 + $0x954] sm:$0xf0]  ;;  %v5092_v41 = vadd.f32 %v5091_v35, %v5079_v30  ;;  %v7906_v51 = vld [vmem:[%s10325_s28 + $0x928] sm:$0xf] }
 0x31a   : > { %5343 = vmatpush.bf16.msra.mxu2 %v8115_v39  ;;  %v8050_v39 = vld [vmem:[%s10325_s28 + $0xa48] sm:$0xf]  ;;  %v5104_v42 = vpop.f32.mrf.mxu3  ;;  %v7923_v47 = vor.u32 %v9369_v38, %v7922_v34  ;;  %v9329_v11 = vld [vmem:[%s10325_s28 + $0x814] sm:$0xf0] }
 0x31b   : > { %v11140_v45 = vadd.f32 %v5104_v42, %v5092_v41  ;;  %v5080_v53 = vpop.f32.mrf.mxu1  ;;  %v8034_v60 = vld [vmem:[%s10325_s28 + $0xa28] sm:$0xf]  ;;  %v9361_v21 = vld [vmem:[%s10325_s28 + $0x914] sm:$0xf0] }
 0x31c   : > { %5356 = vmatpush.bf16.msra.mxu3 %v8243_v43  ;;  %5318 = vmatpush.bf16.msra.mxu0 %v7843_v48  ;;  %v8178_v43 = vld [vmem:[%s10325_s28 + $0xb48] sm:$0xf]  ;;  %v8051_v48 = vor.u32 %v9401_v40, %v8050_v39  ;;  %v9425_v26 = vld [vmem:[%s10325_s28 + $0xb14] sm:$0xf0] }
 0x31d   : > { %5331 = vmatpush.bf16.msra.mxu1 %v7971_v49  ;;  %v7778_v49 = vld [vmem:[%s10325_s28 + $0x828] sm:$0xf]  ;;  %v8179_v54 = vor.u32 %v9433_v52, %v8178_v43  ;;  %v9485_v29 = vld [vmem:[%s10325_s28 + $0xcf4] sm:$0xf0] }
 0x31e   : > { %5344 = vmatpush.bf16.msra.mxu2 %v8099_v50  ;;  %v9333_v50 = vld [vmem:[%s10325_s28 + $0x834] sm:$0xf0]  ;;  %v8162_v1 = vld [vmem:[%s10325_s28 + $0xb28] sm:$0xf] }
 0x31f   : > { %v7779_v7 = vor.u32 %v9333_v50, %v7778_v49  ;;  %v7890_v19 = vld [vmem:[%s10325_s28 + $0x908] sm:$0xf]  ;;  %v8163_v55 = vor.u32 %v9429_v2, %v8162_v1  ;;  %v9549_v32 = vld [vmem:[%s10325_s28 + $0xef4] sm:$0xf0] }
 0x320   : > { %5357 = vmatpush.bf16.msra.mxu3 %v8227_v56  ;;  %5319 = vmatpush.bf16.msra.mxu0 %v7827_v9  ;;  %v9365_v56 = vld [vmem:[%s10325_s28 + $0x934] sm:$0xf0]  ;;  %v7762_v9 = vld [vmem:[%s10325_s28 + $0x808] sm:$0xf]  ;;  %v5093_v23 = vpop.f32.mrf.mxu2  ;;  %v7891_v33 = vor.u32 %v9361_v21, %v7890_v19 }
 0x321   : > { %5332 = vmatpush.bf16.msra.mxu1 %v7955_v12  ;;  %v7907_v12 = vor.u32 %v9365_v56, %v7906_v51  ;;  %v8018_v22 = vld [vmem:[%s10325_s28 + $0xa08] sm:$0xf]  ;;  %v9481_v43 = vld [vmem:[%s10325_s28 + $0xcd4] sm:$0xf0] }
 0x322   : > { %5345 = vmatpush.bf16.msra.mxu2 %v8083_v14  ;;  %v8035_v14 = vor.u32 %v9397_v63, %v8034_v60  ;;  %v8146_v25 = vld [vmem:[%s10325_s28 + $0xb08] sm:$0xf]  ;;  %v5106_v27 = vpop.f32.mrf.mxu3  ;;  %v9513_v46 = vld [vmem:[%s10325_s28 + $0xdd4] sm:$0xf0] }
 0x323   : > { %v8386_v28 = vld [vmem:[%s10325_s28 + $0xce8] sm:$0xf]  ;;  %v8147_v38 = vor.u32 %v9425_v26, %v8146_v25  ;;  %v9577_v50 = vld [vmem:[%s10325_s28 + $0xfd4] sm:$0xf0] }
 0x324   : > { %5358 = vmatpush.bf16.msra.mxu3 %v8211_v24  ;;  %5320 = vmatpush.bf16.msra.mxu0 %v7811_v31  ;;  %v9393_v24 = vld [vmem:[%s10325_s28 + $0xa14] sm:$0xf0]  ;;  %v8514_v30 = vld [vmem:[%s10325_s28 + $0xde8] sm:$0xf]  ;;  %v7763_v31 = vor.u32 %v9329_v11, %v7762_v9  ;;  %v8387_v39 = vor.u32 %v9485_v29, %v8386_v28 }
 0x325   : > { %5333 = vmatpush.bf16.msra.mxu1 %v7939_v37  ;;  %v9517_v37 = vld [vmem:[%s10325_s28 + $0xdf4] sm:$0xf0]  ;;  %v8019_v34 = vor.u32 %v9393_v24, %v8018_v22  ;;  %v8770_v35 = vld [vmem:[%s10325_s28 + $0xfe8] sm:$0xf] }
 0x326   : > { %5346 = vmatpush.bf16.msra.mxu2 %v8067_v16  ;;  %v8642_v16 = vld [vmem:[%s10325_s28 + $0xee8] sm:$0xf]  ;;  %v8515_v40 = vor.u32 %v9517_v37, %v8514_v30  ;;  %v9477_v60 = vld [vmem:[%s10325_s28 + $0xcb4] sm:$0xf0] }
 0x327   : > { %v8643_v41 = vor.u32 %v9549_v32, %v8642_v16  ;;  %v8370_v42 = vld [vmem:[%s10325_s28 + $0xcc8] sm:$0xf]  ;;  %v9509_v2 = vld [vmem:[%s10325_s28 + $0xdb4] sm:$0xf0] }
 0x328   : > { %5359 = vmatpush.bf16.msra.mxu3 %v8195_v36  ;;  %5321 = vmatpush.bf16.msra.mxu0 %v7795_v44  ;;  %v9581_v36 = vld [vmem:[%s10325_s28 + $0xff4] sm:$0xf0]  ;;  %v8498_v52 = vld [vmem:[%s10325_s28 + $0xdc8] sm:$0xf]  ;;  %v8371_v51 = vor.u32 %v9481_v43, %v8370_v42 }
 0x329   : > { %5334 = vmatpush.bf16.msra.mxu1 %v7923_v47  ;;  %v8771_v44 = vor.u32 %v9581_v36, %v8770_v35  ;;  %v8626_v47 = vld [vmem:[%s10325_s28 + $0xec8] sm:$0xf]  ;;  %v8499_v53 = vor.u32 %v9513_v46, %v8498_v52  ;;  %v9541_v9 = vld [vmem:[%s10325_s28 + $0xeb4] sm:$0xf0] }
 0x32a   : > { %5347 = vmatpush.bf16.msra.mxu2 %v8051_v48  ;;  %v9545_v48 = vld [vmem:[%s10325_s28 + $0xed4] sm:$0xf0]  ;;  %v8754_v49 = vld [vmem:[%s10325_s28 + $0xfc8] sm:$0xf] }
 0x32b   : > { %v8354_v56 = vld [vmem:[%s10325_s28 + $0xca8] sm:$0xf]  ;;  %v8755_v1 = vor.u32 %v9577_v50, %v8754_v49  ;;  %v9473_v23 = vld [vmem:[%s10325_s28 + $0xc94] sm:$0xf0] }
 0x32c   : > { %5360 = vmatpush.bf16.msra.mxu3 %v8179_v54  ;;  %5322 = vmatpush.bf16.msra.mxu0 %v7779_v7  ;;  %v8627_v54 = vor.u32 %v9545_v48, %v8626_v47  ;;  %v8482_v63 = vld [vmem:[%s10325_s28 + $0xda8] sm:$0xf]  ;;  %v9505_v25 = vld [vmem:[%s10325_s28 + $0xd94] sm:$0xf0] }
 0x32d   : > { %5335 = vmatpush.bf16.msra.mxu1 %v7907_v12  ;;  %v8610_v7 = vld [vmem:[%s10325_s28 + $0xea8] sm:$0xf]  ;;  %v9573_v12 = vld [vmem:[%s10325_s28 + $0xfb4] sm:$0xf0]  ;;  %v8483_v19 = vor.u32 %v9509_v2, %v8482_v63 }
 0x32e   : > { %5348 = vmatpush.bf16.msra.mxu2 %v8035_v14  ;;  %v8738_v11 = vld [vmem:[%s10325_s28 + $0xfa8] sm:$0xf]  ;;  %v8355_v14 = vor.u32 %v9477_v60, %v8354_v56  ;;  %v8611_v21 = vor.u32 %v9541_v9, %v8610_v7  ;;  %v9537_v27 = vld [vmem:[%s10325_s28 + $0xe94] sm:$0xf0] }
 0x32f   : > { %v8338_v22 = vld [vmem:[%s10325_s28 + $0xc88] sm:$0xf]  ;;  %v8739_v24 = vor.u32 %v9573_v12, %v8738_v11  ;;  %v9569_v30 = vld [vmem:[%s10325_s28 + $0xf94] sm:$0xf0] }
 0x330   : > { %5361 = vmatpush.bf16.msra.mxu3 %v8163_v55  ;;  %5323 = vmatpush.bf16.msra.mxu0 %v7763_v31  ;;  %v8466_v55 = vld [vmem:[%s10325_s28 + $0xd88] sm:$0xf]  ;;  %v5117_v28 = vpop.f32.mrf.mxu0  ;;  %v8339_v37 = vor.u32 %v9473_v23, %v8338_v22  ;;  %v9469_v35 = vld [vmem:[%s10325_s28 + $0xc74] sm:$0xf0] }
 0x331   : > { %5336 = vmatpush.bf16.msra.mxu1 %v7891_v33  ;;  %v8594_v26 = vld [vmem:[%s10325_s28 + $0xe88] sm:$0xf]  ;;  %v5118_v31 = vadd.f32 %v5117_v28, %v11140_v45  ;;  %v8467_v32 = vor.u32 %v9505_v25, %v8466_v55  ;;  %v9533_v45 = vld [vmem:[%s10325_s28 + $0xe74] sm:$0xf0] }
 0x332   : > { %5349 = vmatpush.bf16.msra.mxu2 %v8019_v34  ;;  %v8722_v29 = vld [vmem:[%s10325_s28 + $0xf88] sm:$0xf]  ;;  %v8595_v33 = vor.u32 %v9537_v27, %v8594_v26  ;;  %v9565_v43 = vld [vmem:[%s10325_s28 + $0xf74] sm:$0xf0] }
 0x333   : > { %5324 = vmatmul.bf16.vlgmr.msra.gmra.mxu0 %v10591_v0  ;;  %v5130_v16 = vpop.f32.mrf.mxu1  ;;  %v8322_v34 = vld [vmem:[%s10325_s28 + $0xc68] sm:$0xf]  ;;  %v9465_v48 = vld [vmem:[%s10325_s28 + $0xc54] sm:$0xf0] }
 0x334   : > { %5362 = vmatpush.bf16.msra.mxu3 %v8147_v38  ;;  %5368 = vmatpush.bf16.msrb.mxu0 %v8387_v39  ;;  %v8450_v36 = vld [vmem:[%s10325_s28 + $0xd68] sm:$0xf]  ;;  %v8723_v38 = vor.u32 %v9569_v30, %v8722_v29  ;;  %v5131_v39 = vadd.f32 %v5130_v16, %v5118_v31  ;;  %v8323_v52 = vor.u32 %v9469_v35, %v8322_v34  ;;  %v9529_v56 = vld [vmem:[%s10325_s28 + $0xe54] sm:$0xf0] }
 0x335   : > { %5381 = vmatpush.bf16.msrb.mxu1 %v8515_v40  ;;  %5350 = vmatmul.bf16.vlgmr.msra.gmra.mxu2 %v10596_v4  ;;  %v9501_v40 = vld [vmem:[%s10325_s28 + $0xd74] sm:$0xf0]  ;;  %v8706_v42 = vld [vmem:[%s10325_s28 + $0xf68] sm:$0xf] }
 0x336   : > { %5394 = vmatpush.bf16.msrb.mxu2 %v8643_v41  ;;  %5337 = vmatmul.bf16.vlgmr.msra.gmra.mxu1 %v10598_v5  ;;  %v8578_v41 = vld [vmem:[%s10325_s28 + $0xe68] sm:$0xf]  ;;  %v8707_v50 = vor.u32 %v9565_v43, %v8706_v42  ;;  %v9561_v2 = vld [vmem:[%s10325_s28 + $0xf54] sm:$0xf0]  ;;  %v9131_v42 = vld [vmem:[%s10325_s28 + $0x1ec] sm:$0xf] }
 0x337   : > { %5363 = vmatmul.bf16.vlgmr.msra.gmra.mxu3 %v10602_v8  ;;  %v8579_v46 = vor.u32 %v9533_v45, %v8578_v41  ;;  %v8306_v47 = vld [vmem:[%s10325_s28 + $0xc48] sm:$0xf]  ;;  %v9461_v22 = vld [vmem:[%s10325_s28 + $0xc34] sm:$0xf0]  ;;  %v9099_v41 = vld [vmem:[%s10325_s28 + $0xec] sm:$0xf] }
 0x338   : > { %5407 = vmatpush.bf16.msrb.mxu3 %v8771_v44  ;;  %5369 = vmatpush.bf16.msrb.mxu0 %v8371_v51  ;;  %v8451_v44 = vor.u32 %v9501_v40, %v8450_v36  ;;  %v8434_v49 = vld [vmem:[%s10325_s28 + $0xd48] sm:$0xf]  ;;  %v5143_v51 = vpop.f32.mrf.mxu2  ;;  %v5119_v7 = vpop.f32.mrf.mxu0  ;;  %v8307_v9 = vor.u32 %v9465_v48, %v8306_v47  ;;  %v9525_v26 = vld [vmem:[%s10325_s28 + $0xe34] sm:$0xf0]  ;;  %v6852_v45 = vld [vmem:[%s10325_s28 + $0xf8] sm:$0xf0] }
 0x339   : > { %5382 = vmatpush.bf16.msrb.mxu1 %v8499_v53  ;;  %v9497_v53 = vld [vmem:[%s10325_s28 + $0xd54] sm:$0xf0]  ;;  %v5144_v60 = vadd.f32 %v5143_v51, %v5131_v39  ;;  %v8418_v23 = vld [vmem:[%s10325_s28 + $0xd28] sm:$0xf]  ;;  %v7108_v47 = vld [vmem:[%s10325_s28 + $0x2f8] sm:$0xf0] }
 0x33a   : > { %5395 = vmatpush.bf16.msrb.mxu2 %v8627_v54  ;;  %v8562_v54 = vld [vmem:[%s10325_s28 + $0xe48] sm:$0xf]  ;;  %v5156_v63 = vpop.f32.mrf.mxu3  ;;  %v9557_v28 = vld [vmem:[%s10325_s28 + $0xf34] sm:$0xf0]  ;;  %v7236_v51 = vld [vmem:[%s10325_s28 + $0x3f8] sm:$0xf0] }
 0x33b   : > { %v5132_v11 = vpop.f32.mrf.mxu1  ;;  %v11211_v12 = vadd.f32 %v5156_v63, %v5144_v60  ;;  %v8546_v25 = vld [vmem:[%s10325_s28 + $0xe28] sm:$0xf]  ;;  %v9457_v31 = vld [vmem:[%s10325_s28 + $0xc14] sm:$0xf0]  ;;  %v9095_v63 = vld [vmem:[%s10325_s28 + $0xcc] sm:$0xf] }
 0x33c   : > { %5408 = vmatpush.bf16.msrb.mxu3 %v8755_v1  ;;  %5370 = vmatpush.bf16.msrb.mxu0 %v8355_v14  ;;  %v8690_v1 = vld [vmem:[%s10325_s28 + $0xf48] sm:$0xf]  ;;  %v8435_v14 = vor.u32 %v9497_v53, %v8434_v49  ;;  %v8547_v16 = vor.u32 %v9525_v26, %v8546_v25  ;;  %v9521_v36 = vld [vmem:[%s10325_s28 + $0xe14] sm:$0xf0]  ;;  %v9159_v11 = vld [vmem:[%s10325_s28 + $0x2cc] sm:$0xf] }
 0x33d   : > { %5383 = vmatpush.bf16.msrb.mxu1 %v8483_v19  ;;  %v8563_v19 = vor.u32 %v9529_v56, %v8562_v54  ;;  %v8691_v55 = vor.u32 %v9561_v2, %v8690_v1  ;;  %v8674_v27 = vld [vmem:[%s10325_s28 + $0xf28] sm:$0xf]  ;;  %v9553_v39 = vld [vmem:[%s10325_s28 + $0xf14] sm:$0xf0]  ;;  %v6855_v54 = vor.u32 %v9099_v41, %v6852_v45  ;;  %v6836_v1 = vld [vmem:[%s10325_s28 + $0xd8] sm:$0xf0] }
 0x33e   : > { %5396 = vmatpush.bf16.msrb.mxu2 %v8611_v21  ;;  %v8290_v21 = vld [vmem:[%s10325_s28 + $0xc28] sm:$0xf]  ;;  %v8675_v35 = vor.u32 %v9557_v28, %v8674_v27  ;;  %v9127_v2 = vld [vmem:[%s10325_s28 + $0x1cc] sm:$0xf]  ;;  %v6820_v25 = vld [vmem:[%s10325_s28 + $0xb8] sm:$0xf0] }
 0x33f   : > { %v8291_v29 = vor.u32 %v9461_v22, %v8290_v21  ;;  %v8274_v30 = vld [vmem:[%s10325_s28 + $0xc08] sm:$0xf]  ;;  %v7220_v21 = vld [vmem:[%s10325_s28 + $0x3d8] sm:$0xf0]  ;;  %v6839_v22 = vor.u32 %v9095_v63, %v6836_v1  ;;  %v9123_v26 = vld [vmem:[%s10325_s28 + $0x1ac] sm:$0xf] }
 0x340   : > { %5409 = vmatpush.bf16.msrb.mxu3 %v8739_v24  ;;  %5371 = vmatpush.bf16.msrb.mxu0 %v8339_v37  ;;  %v9493_v24 = vld [vmem:[%s10325_s28 + $0xd34] sm:$0xf0]  ;;  %v8530_v34 = vld [vmem:[%s10325_s28 + $0xe08] sm:$0xf]  ;;  %v5145_v40 = vpop.f32.mrf.mxu2  ;;  %v6948_v28 = vld [vmem:[%s10325_s28 + $0x1b8] sm:$0xf0] }
 0x341   : > { %5384 = vmatpush.bf16.msrb.mxu1 %v8467_v32  ;;  %v8419_v37 = vor.u32 %v9493_v24, %v8418_v23  ;;  %v8402_v32 = vld [vmem:[%s10325_s28 + $0xd08] sm:$0xf]  ;;  %v8531_v49 = vor.u32 %v9521_v36, %v8530_v34  ;;  %v9091_v24 = vld [vmem:[%s10325_s28 + $0xac] sm:$0xf]  ;;  %v7060_v41 = vld [vmem:[%s10325_s28 + $0x298] sm:$0xf0] }
 0x342   : > { %5397 = vmatpush.bf16.msrb.mxu2 %v8595_v33  ;;  %v9489_v33 = vld [vmem:[%s10325_s28 + $0xd14] sm:$0xf0]  ;;  %v5158_v43 = vpop.f32.mrf.mxu3  ;;  %v9087_v34 = vld [vmem:[%s10325_s28 + $0x8c] sm:$0xf]  ;;  %v7172_v1 = vld [vmem:[%s10325_s28 + $0x378] sm:$0xf0] }
 0x343   : > { %v8403_v48 = vor.u32 %v9489_v33, %v8402_v32  ;;  %v6951_v32 = vor.u32 %v9123_v26, %v6948_v28  ;;  %v9119_v36 = vld [vmem:[%s10325_s28 + $0x18c] sm:$0xf]  ;;  %v7188_v43 = vld [vmem:[%s10325_s28 + $0x398] sm:$0xf0] }
 0x344   : > { %5410 = vmatpush.bf16.msrb.mxu3 %v8723_v38  ;;  %5372 = vmatpush.bf16.msrb.mxu0 %v8323_v52  ;;  %v8658_v38 = vld [vmem:[%s10325_s28 + $0xf08] sm:$0xf]  ;;  %v8275_v52 = vor.u32 %v9457_v31, %v8274_v30  ;;  %v7076_v30 = vld [vmem:[%s10325_s28 + $0x2b8] sm:$0xf0]  ;;  %v9187_v31 = vld [vmem:[%s10325_s28 + $0x3ac] sm:$0xf] }
 0x345   : > { %5385 = vmatpush.bf16.msrb.mxu1 %v8451_v44  ;;  %v6980_v44 = vld [vmem:[%s10325_s28 + $0x1f8] sm:$0xf0]  ;;  %v8659_v53 = vor.u32 %v9553_v39, %v8658_v38  ;;  %v9151_v40 = vld [vmem:[%s10325_s28 + $0x28c] sm:$0xf] }
 0x346   : > { %5398 = vmatpush.bf16.msrb.mxu2 %v8579_v46  ;;  %v9163_v46 = vld [vmem:[%s10325_s28 + $0x2ec] sm:$0xf]  ;;  %v6983_v56 = vor.u32 %v9131_v42, %v6980_v44  ;;  %v6932_v39 = vld [vmem:[%s10325_s28 + $0x198] sm:$0xf0] }
 0x347   : > { %v7111_v60 = vor.u32 %v9163_v46, %v7108_v47  ;;  %v9183_v42 = vld [vmem:[%s10325_s28 + $0x38c] sm:$0xf]  ;;  %v6935_v47 = vor.u32 %v9119_v36, %v6932_v39  ;;  %v7156_v28 = vld [vmem:[%s10325_s28 + $0x358] sm:$0xf0] }
 0x348   : > { %5411 = vmatpush.bf16.msrb.mxu3 %v8707_v50  ;;  %5373 = vmatpush.bf16.msrb.mxu0 %v8307_v9  ;;  %v9195_v50 = vld [vmem:[%s10325_s28 + $0x3ec] sm:$0xf]  ;;  %v6964_v9 = vld [vmem:[%s10325_s28 + $0x1d8] sm:$0xf0] }
 0x349   : > { %5386 = vmatpush.bf16.msrb.mxu1 %v8435_v14  ;;  %v7239_v7 = vor.u32 %v9195_v50, %v7236_v51  ;;  %v7092_v14 = vld [vmem:[%s10325_s28 + $0x2d8] sm:$0xf0]  ;;  %v6967_v23 = vor.u32 %v9127_v2, %v6964_v9  ;;  %v9115_v51 = vld [vmem:[%s10325_s28 + $0x16c] sm:$0xf] }
 0x34a   : > { %5399 = vmatpush.bf16.msrb.mxu2 %v8563_v19  ;;  %v9191_v19 = vld [vmem:[%s10325_s28 + $0x3cc] sm:$0xf]  ;;  %v6788_v50 = vld [vmem:[%s10325_s28 + $0x78] sm:$0xf0] }
 0x34b   : > { %v7223_v27 = vor.u32 %v9191_v19, %v7220_v21  ;;  %v9179_v63 = vld [vmem:[%s10325_s28 + $0x36c] sm:$0xf] }
 0x34c   : > { %5412 = vmatpush.bf16.msrb.mxu3 %v8691_v55  ;;  %5374 = vmatpush.bf16.msrb.mxu0 %v8291_v29  ;;  %v7095_v55 = vor.u32 %v9159_v11, %v7092_v14  ;;  %v9155_v29 = vld [vmem:[%s10325_s28 + $0x2ac] sm:$0xf]  ;;  %v6772_v14 = vld [vmem:[%s10325_s28 + $0x58] sm:$0xf0]  ;;  %v7175_v21 = vor.u32 %v9179_v63, %v7172_v1 }
 0x34d   : > { %5387 = vmatpush.bf16.msrb.mxu1 %v8419_v37  ;;  %v7204_v37 = vld [vmem:[%s10325_s28 + $0x3b8] sm:$0xf0]  ;;  %v7079_v33 = vor.u32 %v9155_v29, %v7076_v30  ;;  %v9079_v11 = vld [vmem:[%s10325_s28 + $0x4c] sm:$0xf] }
 0x34e   : > { %5400 = vmatpush.bf16.msrb.mxu2 %v8547_v16  ;;  %v6823_v16 = vor.u32 %v9091_v24, %v6820_v25  ;;  %v7207_v38 = vor.u32 %v9187_v31, %v7204_v37  ;;  %v9111_v19 = vld [vmem:[%s10325_s28 + $0x14c] sm:$0xf]  ;;  %v7028_v24 = vld [vmem:[%s10325_s28 + $0x258] sm:$0xf0]  ;;  %v6775_v30 = vor.u32 %v9079_v11, %v6772_v14 }
 0x34f   : > { %v9139_v39 = vld [vmem:[%s10325_s28 + $0x22c] sm:$0xf]  ;;  %v7620_v11 = vld [vmem:[%s10325_s28 + $0x6f8] sm:$0xf0] }
 0x350   : > { %5413 = vmatpush.bf16.msrb.mxu3 %v8675_v35  ;;  %5375 = vmatpush.bf16.msrb.mxu0 %v8275_v52  ;;  %v6804_v35 = vld [vmem:[%s10325_s28 + $0x98] sm:$0xf0]  ;;  %v5169_v45 = vpop.f32.mrf.mxu0  ;;  %v9259_v63 = vld [vmem:[%s10325_s28 + $0x5ec] sm:$0xf] }
 0x351   : > { %5388 = vmatpush.bf16.msrb.mxu1 %v8403_v48  ;;  %v5170_v52 = vadd.f32 %v5169_v45, %v11211_v12  ;;  %v6807_v44 = vor.u32 %v9087_v34, %v6804_v35  ;;  %v7063_v48 = vor.u32 %v9151_v40, %v7060_v41  ;;  %v7044_v12 = vld [vmem:[%s10325_s28 + $0x278] sm:$0xf0]  ;;  %v9107_v35 = vld [vmem:[%s10325_s28 + $0x12c] sm:$0xf] }
 0x352   : > { %5401 = vmatpush.bf16.msrb.mxu2 %v8531_v49  ;;  %v9083_v49 = vld [vmem:[%s10325_s28 + $0x6c] sm:$0xf]  ;;  %v6756_v34 = vld [vmem:[%s10325_s28 + $0x38] sm:$0xf0] }
 0x353   : > { %5376 = vmatmul.bf16.vlgmr.msrb.gmra.mxu0 %v10667_v62  ;;  %v5182_v46 = vpop.f32.mrf.mxu1  ;;  %v6791_v2 = vor.u32 %v9083_v49, %v6788_v50  ;;  %v7012_v40 = vld [vmem:[%s10325_s28 + $0x238] sm:$0xf0]  ;;  %v9171_v41 = vld [vmem:[%s10325_s28 + $0x32c] sm:$0xf] }
 0x354   : > { %5414 = vmatpush.bf16.msrb.mxu3 %v8659_v53  ;;  %5420 = vmatpush.bf16.msra.mxu0 %v6855_v54  ;;  %v7191_v53 = vor.u32 %v9183_v42, %v7188_v43  ;;  %v5183_v54 = vadd.f32 %v5182_v46, %v5170_v52  ;;  %v7140_v45 = vld [vmem:[%s10325_s28 + $0x338] sm:$0xf0]  ;;  %v9071_v43 = vld [vmem:[%s10325_s28 + $0xc] sm:$0xf]  ;;  %v7015_v46 = vor.u32 %v9139_v39, %v7012_v40 }
 0x355   : > { %5433 = vmatpush.bf16.msra.mxu1 %v6983_v56  ;;  %5402 = vmatmul.bf16.vlgmr.msrb.gmra.mxu2 %v10672_v3  ;;  %v6916_v56 = vld [vmem:[%s10325_s28 + $0x178] sm:$0xf0]  ;;  %v9135_v49 = vld [vmem:[%s10325_s28 + $0x20c] sm:$0xf]  ;;  %v7143_v50 = vor.u32 %v9171_v41, %v7140_v45 }
 0x356   : > { %5446 = vmatpush.bf16.msra.mxu2 %v7111_v60  ;;  %5389 = vmatmul.bf16.vlgmr.msrb.gmra.mxu1 %v10674_v6  ;;  %v9147_v60 = vld [vmem:[%s10325_s28 + $0x26c] sm:$0xf]  ;;  %v6740_v52 = vld [vmem:[%s10325_s28 + $0x18] sm:$0xf0] }
 0x357   : > { %5415 = vmatmul.bf16.vlgmr.msrb.gmra.mxu3 %v10678_v10  ;;  %v7047_v9 = vor.u32 %v9147_v60, %v7044_v12  ;;  %v9227_v60 = vld [vmem:[%s10325_s28 + $0x4ec] sm:$0xf]  ;;  %v7364_v12 = vld [vmem:[%s10325_s28 + $0x4f8] sm:$0xf0] }
 0x358   : > { %5459 = vmatpush.bf16.msra.mxu3 %v7239_v7  ;;  %5421 = vmatpush.bf16.msra.mxu0 %v6839_v22  ;;  %v6919_v7 = vor.u32 %v9115_v51, %v6916_v56  ;;  %v5195_v22 = vpop.f32.mrf.mxu2  ;;  %v5171_v29 = vpop.f32.mrf.mxu0  ;;  %v6996_v51 = vld [vmem:[%s10325_s28 + $0x218] sm:$0xf0]  ;;  %v9251_v40 = vld [vmem:[%s10325_s28 + $0x5ac] sm:$0xf] }
 0x359   : > { %5434 = vmatpush.bf16.msra.mxu1 %v6967_v23  ;;  %v6900_v23 = vld [vmem:[%s10325_s28 + $0x158] sm:$0xf0]  ;;  %v5196_v25 = vadd.f32 %v5195_v22, %v5183_v54 }
 0x35a   : > { %5447 = vmatpush.bf16.msra.mxu2 %v7095_v55  ;;  %v9143_v55 = vld [vmem:[%s10325_s28 + $0x24c] sm:$0xf]  ;;  %v5208_v26 = vpop.f32.mrf.mxu3  ;;  %v7124_v54 = vld [vmem:[%s10325_s28 + $0x318] sm:$0xf0] }
 0x35b   : > { %v5184_v31 = vpop.f32.mrf.mxu1  ;;  %v11282_v37 = vadd.f32 %v5208_v26, %v5196_v25  ;;  %v7748_v22 = vld [vmem:[%s10325_s28 + $0x7f8] sm:$0xf0]  ;;  %v9223_v26 = vld [vmem:[%s10325_s28 + $0x4cc] sm:$0xf] }
 0x35c   : > { %5460 = vmatpush.bf16.msra.mxu3 %v7223_v27  ;;  %5422 = vmatpush.bf16.msra.mxu0 %v6823_v16  ;;  %v9175_v27 = vld [vmem:[%s10325_s28 + $0x34c] sm:$0xf]  ;;  %v6903_v16 = vor.u32 %v9111_v19, %v6900_v23  ;;  %v6999_v19 = vor.u32 %v9135_v49, %v6996_v51  ;;  %v7332_v39 = vld [vmem:[%s10325_s28 + $0x4b8] sm:$0xf0]  ;;  %v11332_v51 = vld [vmem:[%s10331_s3] sm:$0xf] }
 0x35d   : > { %5435 = vmatpush.bf16.msra.mxu1 %v6951_v32  ;;  %v7031_v32 = vor.u32 %v9143_v55, %v7028_v24  ;;  %v7159_v36 = vor.u32 %v9175_v27, %v7156_v28  ;;  %v7367_v55 = vor.u32 %v9227_v60, %v7364_v12  ;;  %v7348_v27 = vld [vmem:[%s10325_s28 + $0x4d8] sm:$0xf0]  ;;  %v9255_v28 = vld [vmem:[%s10325_s28 + $0x5cc] sm:$0xf] }
 0x35e   : > { %5448 = vmatpush.bf16.msra.mxu2 %v7079_v33  ;;  %v9075_v33 = vld [vmem:[%s10325_s28 + $0x2c] sm:$0xf]  ;;  %v7460_v45 = vld [vmem:[%s10325_s28 + $0x5b8] sm:$0xf0] }
 0x35f   : > { %v6759_v42 = vor.u32 %v9075_v33, %v6756_v34  ;;  %v9287_v31 = vld [vmem:[%s10325_s28 + $0x6cc] sm:$0xf]  ;;  %v7732_v33 = vld [vmem:[%s10325_s28 + $0x7d8] sm:$0xf0]  ;;  %v7351_v34 = vor.u32 %v9223_v26, %v7348_v27 }
 0x360   : > { %5461 = vmatpush.bf16.msra.mxu3 %v7207_v38  ;;  %5423 = vmatpush.bf16.msra.mxu0 %v6807_v44  ;;  %v6884_v38 = vld [vmem:[%s10325_s28 + $0x138] sm:$0xf0]  ;;  %v5197_v56 = vpop.f32.mrf.mxu2  ;;  %v9311_v60 = vld [vmem:[%s10325_s28 + $0x78c] sm:$0xf] }
 0x361   : > { %5436 = vmatpush.bf16.msra.mxu1 %v6935_v47  ;;  %v6887_v44 = vor.u32 %v9107_v35, %v6884_v38  ;;  %v9103_v47 = vld [vmem:[%s10325_s28 + $0x10c] sm:$0xf]  ;;  %v7316_v49 = vld [vmem:[%s10325_s28 + $0x498] sm:$0xf0] }
 0x362   : > { %5449 = vmatpush.bf16.msra.mxu2 %v7063_v48  ;;  %v6868_v48 = vld [vmem:[%s10325_s28 + $0x118] sm:$0xf0]  ;;  %v5210_v1 = vpop.f32.mrf.mxu3  ;;  %v9219_v38 = vld [vmem:[%s10325_s28 + $0x4ac] sm:$0xf] }
 0x363   : > { %v6871_v14 = vor.u32 %v9103_v47, %v6868_v48  ;;  %v9215_v47 = vld [vmem:[%s10325_s28 + $0x48c] sm:$0xf]  ;;  %v7463_v48 = vor.u32 %v9251_v40, %v7460_v45  ;;  %v7572_v56 = vld [vmem:[%s10325_s28 + $0x698] sm:$0xf0] }
 0x364   : > { %5462 = vmatpush.bf16.msra.mxu3 %v7191_v53  ;;  %5424 = vmatpush.bf16.msra.mxu0 %v6791_v2  ;;  %v9167_v53 = vld [vmem:[%s10325_s28 + $0x30c] sm:$0xf]  ;;  %v6743_v2 = vor.u32 %v9071_v43, %v6740_v52  ;;  %v7588_v43 = vld [vmem:[%s10325_s28 + $0x6b8] sm:$0xf0]  ;;  %v7319_v12 = vor.u32 %v9215_v47, %v7316_v49 }
 0x365   : > { %5437 = vmatpush.bf16.msra.mxu1 %v6919_v7  ;;  %v7492_v7 = vld [vmem:[%s10325_s28 + $0x5f8] sm:$0xf0]  ;;  %v7127_v23 = vor.u32 %v9167_v53, %v7124_v54  ;;  %v9315_v52 = vld [vmem:[%s10325_s28 + $0x7ac] sm:$0xf] }
 0x366   : > { %5450 = vmatpush.bf16.msra.mxu2 %v7047_v9  ;;  %v9291_v9 = vld [vmem:[%s10325_s28 + $0x6ec] sm:$0xf]  ;;  %v7495_v24 = vor.u32 %v9259_v63, %v7492_v7  ;;  %v7444_v53 = vld [vmem:[%s10325_s28 + $0x598] sm:$0xf0] }
 0x367   : > { %v7623_v25 = vor.u32 %v9291_v9, %v7620_v11  ;;  %v9279_v54 = vld [vmem:[%s10325_s28 + $0x68c] sm:$0xf]  ;;  %v7300_v9 = vld [vmem:[%s10325_s28 + $0x478] sm:$0xf0] }
 0x368   : > { %5463 = vmatpush.bf16.msra.mxu3 %v7175_v21  ;;  %5425 = vmatpush.bf16.msra.mxu0 %v6775_v30  ;;  %v9323_v21 = vld [vmem:[%s10325_s28 + $0x7ec] sm:$0xf]  ;;  %v7476_v30 = vld [vmem:[%s10325_s28 + $0x5d8] sm:$0xf0] }
 0x369   : > { %5438 = vmatpush.bf16.msra.mxu1 %v6903_v16  ;;  %v7751_v29 = vor.u32 %v9323_v21, %v7748_v22  ;;  %v7604_v16 = vld [vmem:[%s10325_s28 + $0x6d8] sm:$0xf0]  ;;  %v7479_v35 = vor.u32 %v9255_v28, %v7476_v30  ;;  %v9211_v7 = vld [vmem:[%s10325_s28 + $0x46c] sm:$0xf] }
 0x36a   : > { %5451 = vmatpush.bf16.msra.mxu2 %v7031_v32  ;;  %v9319_v32 = vld [vmem:[%s10325_s28 + $0x7cc] sm:$0xf]  ;;  %v7428_v22 = vld [vmem:[%s10325_s28 + $0x578] sm:$0xf0]  ;;  %v7303_v27 = vor.u32 %v9211_v7, %v7300_v9 }
 0x36b   : > { %v7735_v41 = vor.u32 %v9319_v32, %v7732_v33  ;;  %v9243_v11 = vld [vmem:[%s10325_s28 + $0x56c] sm:$0xf]  ;;  %v7268_v47 = vld [vmem:[%s10325_s28 + $0x438] sm:$0xf0] }
 0x36c   : > { %5464 = vmatpush.bf16.msra.mxu3 %v7159_v36  ;;  %5426 = vmatpush.bf16.msra.mxu0 %v6759_v42  ;;  %v7607_v36 = vor.u32 %v9287_v31, %v7604_v16  ;;  %v9283_v42 = vld [vmem:[%s10325_s28 + $0x6ac] sm:$0xf]  ;;  %v7431_v28 = vor.u32 %v9243_v11, %v7428_v22  ;;  %v7284_v31 = vld [vmem:[%s10325_s28 + $0x458] sm:$0xf0] }
 0x36d   : > { %5439 = vmatpush.bf16.msra.mxu1 %v6887_v44  ;;  %v7716_v44 = vld [vmem:[%s10325_s28 + $0x7b8] sm:$0xf0]  ;;  %v9207_v30 = vld [vmem:[%s10325_s28 + $0x44c] sm:$0xf] }
 0x36e   : > { %5452 = vmatpush.bf16.msra.mxu2 %v7015_v46  ;;  %v7335_v46 = vor.u32 %v9219_v38, %v7332_v39  ;;  %v9239_v16 = vld [vmem:[%s10325_s28 + $0x54c] sm:$0xf]  ;;  %v7287_v45 = vor.u32 %v9207_v30, %v7284_v31 }
 0x36f   : > { %v9303_v40 = vld [vmem:[%s10325_s28 + $0x74c] sm:$0xf] }
 0x370   : > { %5465 = vmatpush.bf16.msra.mxu3 %v7143_v50  ;;  %5427 = vmatpush.bf16.msra.mxu0 %v6743_v2  ;;  %v9247_v50 = vld [vmem:[%s10325_s28 + $0x58c] sm:$0xf]  ;;  %v5221_v63 = vpop.f32.mrf.mxu0  ;;  %v7575_v2 = vor.u32 %v9279_v54, %v7572_v56  ;;  %v7652_v54 = vld [vmem:[%s10325_s28 + $0x738] sm:$0xf0] }
 0x371   : > { %5440 = vmatpush.bf16.msra.mxu1 %v6871_v14  ;;  %v7447_v1 = vor.u32 %v9247_v50, %v7444_v53  ;;  %v7396_v50 = vld [vmem:[%s10325_s28 + $0x538] sm:$0xf0]  ;;  %v9299_v53 = vld [vmem:[%s10325_s28 + $0x72c] sm:$0xf] }
 0x372   : > { %5453 = vmatpush.bf16.msra.mxu2 %v6999_v19  ;;  %v9263_v7 = vld [vmem:[%s10325_s28 + $0x60c] sm:$0xf]  ;;  %v7655_v11 = vor.u32 %v9299_v53, %v7652_v54  ;;  %v8100_v54 = vld [vmem:[%s10325_s28 + $0xab8] sm:$0xf0] }
 0x373   : > { %5428 = vmatmul.bf16.vlgmr.msra.gmra.mxu0 %v10462_v58  ;;  %v2174_v58 = vperm.slane %v11332_v51, 2  ;;  %v5234_v19 = vpop.f32.mrf.mxu1  ;;  %v9451_v31 = vld [vmem:[%s10325_s28 + $0xbec] sm:$0xf] }
 0x374   : > { %5466 = vmatpush.bf16.msra.mxu3 %v7127_v23  ;;  %5472 = vmatpush.bf16.msrb.mxu0 %v7367_v55  ;;  %v9275_v23 = vld [vmem:[%s10325_s28 + $0x66c] sm:$0xf]  ;;  %v7556_v55 = vld [vmem:[%s10325_s28 + $0x678] sm:$0xf0] }
 0x375   : > { %5485 = vmatpush.bf16.msrb.mxu1 %v7495_v24  ;;  %5454 = vmatmul.bf16.vlgmr.msra.gmra.mxu2 %v10460_v57  ;;  %v7591_v57 = vor.u32 %v9283_v42, %v7588_v43  ;;  %v5222_v14 = vadd.f32 %v5221_v63, %v2174_v58  ;;  %v9307_v24 = vld [vmem:[%s10325_s28 + $0x76c] sm:$0xf] }
 0x376   : > { %5498 = vmatpush.bf16.msrb.mxu2 %v7623_v25  ;;  %5441 = vmatmul.bf16.vlgmr.msra.gmra.mxu1 %v10466_v61  ;;  %v7700_v61 = vld [vmem:[%s10325_s28 + $0x798] sm:$0xf0]  ;;  %v9267_v58 = vld [vmem:[%s10325_s28 + $0x62c] sm:$0xf] }
 0x377   : > { %5467 = vmatmul.bf16.vlgmr.msra.gmra.mxu3 %v10464_v59  ;;  %v7719_v59 = vor.u32 %v9315_v52, %v7716_v44  ;;  %v7703_v21 = vor.u32 %v9311_v60, %v7700_v61  ;;  %v7684_v25 = vld [vmem:[%s10325_s28 + $0x778] sm:$0xf0]  ;;  %v5235_v26 = vadd.f32 %v5234_v19, %v5222_v14  ;;  %v9199_v60 = vld [vmem:[%s10325_s28 + $0x40c] sm:$0xf] }
 0x378   : > { %5511 = vmatpush.bf16.msrb.mxu3 %v7751_v29  ;;  %5473 = vmatpush.bf16.msrb.mxu0 %v7351_v34  ;;  %v7559_v29 = vor.u32 %v9275_v23, %v7556_v55  ;;  %v5247_v32 = vpop.f32.mrf.mxu2  ;;  %v7687_v33 = vor.u32 %v9307_v24, %v7684_v25  ;;  %v7412_v34 = vld [vmem:[%s10325_s28 + $0x558] sm:$0xf0]  ;;  %v5223_v43 = vpop.f32.mrf.mxu0  ;;  %v9295_v19 = vld [vmem:[%s10325_s28 + $0x70c] sm:$0xf] }
 0x379   : > { %5486 = vmatpush.bf16.msrb.mxu1 %v7479_v35  ;;  %v9271_v35 = vld [vmem:[%s10325_s28 + $0x64c] sm:$0xf]  ;;  %v5248_v38 = vadd.f32 %v5247_v32, %v5235_v26  ;;  %v7415_v52 = vor.u32 %v9239_v16, %v7412_v34  ;;  %v7252_v61 = vld [vmem:[%s10325_s28 + $0x418] sm:$0xf0] }
 0x37a   : > { %5499 = vmatpush.bf16.msrb.mxu2 %v7607_v36  ;;  %v7540_v36 = vld [vmem:[%s10325_s28 + $0x658] sm:$0xf0]  ;;  %v5260_v39 = vpop.f32.mrf.mxu3  ;;  %v9355_v23 = vld [vmem:[%s10325_s28 + $0x8ec] sm:$0xf]  ;;  %v7255_v25 = vor.u32 %v9199_v60, %v7252_v61 }
 0x37b   : > { %v11356_v42 = vadd.f32 %v5260_v39, %v5248_v38  ;;  %v7543_v44 = vor.u32 %v9271_v35, %v7540_v36  ;;  %v7508_v14 = vld [vmem:[%s10325_s28 + $0x618] sm:$0xf0]  ;;  %v9387_v24 = vld [vmem:[%s10325_s28 + $0x9ec] sm:$0xf] }
 0x37c   : > { %5512 = vmatpush.bf16.msrb.mxu3 %v7735_v41  ;;  %5474 = vmatpush.bf16.msrb.mxu0 %v7335_v46  ;;  %v7668_v41 = vld [vmem:[%s10325_s28 + $0x758] sm:$0xf0]  ;;  %v9203_v46 = vld [vmem:[%s10325_s28 + $0x42c] sm:$0xf]  ;;  %v7511_v30 = vor.u32 %v9263_v7, %v7508_v14 }
 0x37d   : > { %5487 = vmatpush.bf16.msrb.mxu1 %v7463_v48  ;;  %v9235_v48 = vld [vmem:[%s10325_s28 + $0x52c] sm:$0xf]  ;;  %v7671_v49 = vor.u32 %v9303_v40, %v7668_v41  ;;  %v7271_v56 = vor.u32 %v9203_v46, %v7268_v47  ;;  %v7876_v55 = vld [vmem:[%s10325_s28 + $0x8f8] sm:$0xf0] }
 0x37e   : > { %5500 = vmatpush.bf16.msrb.mxu2 %v7591_v57  ;;  %v5236_v57 = vpop.f32.mrf.mxu1  ;;  %v8004_v26 = vld [vmem:[%s10325_s28 + $0x9f8] sm:$0xf0]  ;;  %v9351_v36 = vld [vmem:[%s10325_s28 + $0x8cc] sm:$0xf] }
 0x37f   : > { %v8260_v16 = vld [vmem:[%s10325_s28 + $0xbf8] sm:$0xf0]  ;;  %v8007_v34 = vor.u32 %v9387_v24, %v8004_v26  ;;  %v9383_v39 = vld [vmem:[%s10325_s28 + $0x9cc] sm:$0xf] }
 0x380   : > { %5513 = vmatpush.bf16.msrb.mxu3 %v7719_v59  ;;  %5475 = vmatpush.bf16.msrb.mxu0 %v7319_v12  ;;  %v7524_v59 = vld [vmem:[%s10325_s28 + $0x638] sm:$0xf0]  ;;  %v7399_v12 = vor.u32 %v9235_v48, %v7396_v50  ;;  %v5249_v9 = vpop.f32.mrf.mxu2  ;;  %v8263_v40 = vor.u32 %v9451_v31, %v8260_v16  ;;  %v9347_v57 = vld [vmem:[%s10325_s28 + $0x8ac] sm:$0xf] }
 0x381   : > { %5488 = vmatpush.bf16.msrb.mxu1 %v7447_v1  ;;  %v7527_v63 = vor.u32 %v9267_v58, %v7524_v59  ;;  %v9231_v1 = vld [vmem:[%s10325_s28 + $0x50c] sm:$0xf]  ;;  %v7860_v38 = vld [vmem:[%s10325_s28 + $0x8d8] sm:$0xf0] }
 0x382   : > { %5501 = vmatpush.bf16.msrb.mxu2 %v7575_v2  ;;  %v7380_v2 = vld [vmem:[%s10325_s28 + $0x518] sm:$0xf0]  ;;  %v5262_v22 = vpop.f32.mrf.mxu3  ;;  %v7863_v46 = vor.u32 %v9351_v36, %v7860_v38  ;;  %v9379_v50 = vld [vmem:[%s10325_s28 + $0x9ac] sm:$0xf] }
 0x383   : > { %v7988_v41 = vld [vmem:[%s10325_s28 + $0x9d8] sm:$0xf0]  ;;  %v9411_v53 = vld [vmem:[%s10325_s28 + $0xaac] sm:$0xf] }
 0x384   : > { %5514 = vmatpush.bf16.msrb.mxu3 %v7703_v21  ;;  %5476 = vmatpush.bf16.msrb.mxu0 %v7303_v27  ;;  %v7636_v21 = vld [vmem:[%s10325_s28 + $0x718] sm:$0xf0]  ;;  %v9419_v27 = vld [vmem:[%s10325_s28 + $0xaec] sm:$0xf]  ;;  %v7991_v47 = vor.u32 %v9383_v39, %v7988_v41 }
 0x385   : > { %5489 = vmatpush.bf16.msrb.mxu1 %v7431_v28  ;;  %v8132_v28 = vld [vmem:[%s10325_s28 + $0xaf8] sm:$0xf0]  ;;  %v7639_v32 = vor.u32 %v9295_v19, %v7636_v21  ;;  %v9371_v24 = vld [vmem:[%s10325_s28 + $0x96c] sm:$0xf] }
 0x386   : > { %5502 = vmatpush.bf16.msrb.mxu2 %v7559_v29  ;;  %v7383_v29 = vor.u32 %v9231_v1, %v7380_v2  ;;  %v8135_v35 = vor.u32 %v9419_v27, %v8132_v28  ;;  %v8116_v43 = vld [vmem:[%s10325_s28 + $0xad8] sm:$0xf0]  ;;  %v9375_v2 = vld [vmem:[%s10325_s28 + $0x98c] sm:$0xf] }
 0x387   : > { %v7972_v59 = vld [vmem:[%s10325_s28 + $0x9b8] sm:$0xf0]  ;;  %v9403_v28 = vld [vmem:[%s10325_s28 + $0xa6c] sm:$0xf] }
 0x388   : > { %5515 = vmatpush.bf16.msrb.mxu3 %v7687_v33  ;;  %5477 = vmatpush.bf16.msrb.mxu0 %v7287_v45  ;;  %v7879_v33 = vor.u32 %v9355_v23, %v7876_v55  ;;  %v9415_v45 = vld [vmem:[%s10325_s28 + $0xacc] sm:$0xf]  ;;  %v8228_v60 = vld [vmem:[%s10325_s28 + $0xbb8] sm:$0xf0] }
 0x389   : > { %5490 = vmatpush.bf16.msrb.mxu1 %v7415_v52  ;;  %v9447_v52 = vld [vmem:[%s10325_s28 + $0xbcc] sm:$0xf]  ;;  %v8119_v48 = vor.u32 %v9415_v45, %v8116_v43  ;;  %v7828_v1 = vld [vmem:[%s10325_s28 + $0x898] sm:$0xf0] }
 0x38a   : > { %5503 = vmatpush.bf16.msrb.mxu2 %v7543_v44  ;;  %v8244_v44 = vld [vmem:[%s10325_s28 + $0xbd8] sm:$0xf0]  ;;  %v9339_v23 = vld [vmem:[%s10325_s28 + $0x86c] sm:$0xf] }
 0x38b   : > { %v8247_v58 = vor.u32 %v9447_v52, %v8244_v44  ;;  %v7956_v7 = vld [vmem:[%s10325_s28 + $0x998] sm:$0xf0]  ;;  %v9367_v36 = vld [vmem:[%s10325_s28 + $0x94c] sm:$0xf] }
 0x38c   : > { %5516 = vmatpush.bf16.msrb.mxu3 %v7671_v49  ;;  %5478 = vmatpush.bf16.msrb.mxu0 %v7271_v56  ;;  %v7844_v49 = vld [vmem:[%s10325_s28 + $0x8b8] sm:$0xf0]  ;;  %v9443_v56 = vld [vmem:[%s10325_s28 + $0xbac] sm:$0xf]  ;;  %v7959_v21 = vor.u32 %v9375_v2, %v7956_v7 }
 0x38d   : > { %5491 = vmatpush.bf16.msrb.mxu1 %v7399_v12  ;;  %v7847_v61 = vor.u32 %v9347_v57, %v7844_v49  ;;  %v8103_v12 = vor.u32 %v9411_v53, %v8100_v54  ;;  %v8084_v9 = vld [vmem:[%s10325_s28 + $0xa98] sm:$0xf0]  ;;  %v9399_v41 = vld [vmem:[%s10325_s28 + $0xa4c] sm:$0xf] }
 0x38e   : > { %5504 = vmatpush.bf16.msrb.mxu2 %v7527_v63  ;;  %v9343_v63 = vld [vmem:[%s10325_s28 + $0x88c] sm:$0xf]  ;;  %v8212_v14 = vld [vmem:[%s10325_s28 + $0xb98] sm:$0xf0] }
 0x38f   : > { %v7812_v55 = vld [vmem:[%s10325_s28 + $0x878] sm:$0xf0]  ;;  %v9431_v52 = vld [vmem:[%s10325_s28 + $0xb4c] sm:$0xf] }
 0x390   : > { %5517 = vmatpush.bf16.msrb.mxu3 %v7655_v11  ;;  %5479 = vmatpush.bf16.msrb.mxu0 %v7255_v25  ;;  %v9439_v11 = vld [vmem:[%s10325_s28 + $0xb8c] sm:$0xf]  ;;  %v11410_v19 = vpop.f32.mrf.mxu0  ;;  %v7940_v27 = vld [vmem:[%s10325_s28 + $0x978] sm:$0xf0]  ;;  %v7815_v16 = vor.u32 %v9339_v23, %v7812_v55 }
 0x391   : > { %5492 = vmatpush.bf16.msrb.mxu1 %v7383_v29  ;;  %v8215_v26 = vor.u32 %v9439_v11, %v8212_v14  ;;  %v8068_v29 = vld [vmem:[%s10325_s28 + $0xa78] sm:$0xf0]  ;;  %v9331_v49 = vld [vmem:[%s10325_s28 + $0x82c] sm:$0xf] }
 0x392   : > { %5505 = vmatpush.bf16.msrb.mxu2 %v7511_v30  ;;  %v9435_v30 = vld [vmem:[%s10325_s28 + $0xb6c] sm:$0xf]  ;;  %v8196_v31 = vld [vmem:[%s10325_s28 + $0xb78] sm:$0xf0] }
 0x393   : > { %5480 = vmatmul.bf16.vlgmr.msrb.gmra.mxu0 %v10522_v17  ;;  %v8231_v17 = vor.u32 %v9443_v56, %v8228_v60  ;;  %v11415_v25 = vpop.f32.mrf.mxu1  ;;  %v8199_v39 = vor.u32 %v9435_v30, %v8196_v31  ;;  %v8052_v45 = vld [vmem:[%s10325_s28 + $0xa58] sm:$0xf0]  ;;  %v9395_v56 = vld [vmem:[%s10325_s28 + $0xa2c] sm:$0xf] }
 0x394   : > { %5518 = vmatpush.bf16.msrb.mxu3 %v7639_v32  ;;  %5524 = vmatpush.bf16.msra.mxu0 %v7879_v33  ;;  %v7943_v32 = vor.u32 %v9371_v24, %v7940_v27  ;;  %v8071_v33 = vor.u32 %v9403_v28, %v8068_v29  ;;  %v8180_v44 = vld [vmem:[%s10325_s28 + $0xb58] sm:$0xf0]  ;;  %v8055_v57 = vor.u32 %v9399_v41, %v8052_v45  ;;  %v9359_v7 = vld [vmem:[%s10325_s28 + $0x90c] sm:$0xf] }
 0x395   : > { %5537 = vmatpush.bf16.msra.mxu1 %v8007_v34  ;;  %5506 = vmatmul.bf16.vlgmr.msrb.gmra.mxu2 %v10518_v13  ;;  %v7975_v13 = vor.u32 %v9379_v50, %v7972_v59  ;;  %v9335_v34 = vld [vmem:[%s10325_s28 + $0x84c] sm:$0xf]  ;;  %v7780_v50 = vld [vmem:[%s10325_s28 + $0x838] sm:$0xf0]  ;;  %v8183_v53 = vor.u32 %v9431_v52, %v8180_v44 }
 0x396   : > { %5550 = vmatpush.bf16.msra.mxu2 %v8135_v35  ;;  %5493 = vmatmul.bf16.vlgmr.msrb.gmra.mxu1 %v10526_v20  ;;  %v7831_v20 = vor.u32 %v9343_v63, %v7828_v1  ;;  %v7796_v35 = vld [vmem:[%s10325_s28 + $0x858] sm:$0xf0]  ;;  %v9327_v63 = vld [vmem:[%s10325_s28 + $0x80c] sm:$0xf] }
 0x397   : > { %5519 = vmatmul.bf16.vlgmr.msrb.gmra.mxu3 %v10524_v18  ;;  %v9407_v18 = vld [vmem:[%s10325_s28 + $0xa8c] sm:$0xf]  ;;  %v7908_v54 = vld [vmem:[%s10325_s28 + $0x938] sm:$0xf0] }
 0x398   : > { %5563 = vmatpush.bf16.msra.mxu3 %v8263_v40  ;;  %5525 = vmatpush.bf16.msra.mxu0 %v7863_v46  ;;  %v8087_v22 = vor.u32 %v9407_v18, %v8084_v9  ;;  %v11425_v38 = vpop.f32.mrf.mxu2  ;;  %v7924_v40 = vld [vmem:[%s10325_s28 + $0x958] sm:$0xf0]  ;;  %v7799_v46 = vor.u32 %v9335_v34, %v7796_v35  ;;  %v9391_v9 = vld [vmem:[%s10325_s28 + $0xa0c] sm:$0xf] }
 0x399   : > { %5538 = vmatpush.bf16.msra.mxu1 %v7991_v47  ;;  %v5275_v47 = vpop.f32.mrf.mxu0  ;;  %v8036_v60 = vld [vmem:[%s10325_s28 + $0xa38] sm:$0xf0]  ;;  %v9483_v55 = vld [vmem:[%s10325_s28 + $0xcec] sm:$0xf] }
 0x39a   : > { %5551 = vmatpush.bf16.msra.mxu2 %v8119_v48  ;;  %v11430_v43 = vpop.f32.mrf.mxu3  ;;  %v7927_v48 = vor.u32 %v9367_v36, %v7924_v40  ;;  %v7764_v1 = vld [vmem:[%s10325_s28 + $0x818] sm:$0xf0]  ;;  %v9547_v29 = vld [vmem:[%s10325_s28 + $0xeec] sm:$0xf] }
 0x39b   : > { %v5288_v59 = vpop.f32.mrf.mxu1  ;;  %v7892_v18 = vld [vmem:[%s10325_s28 + $0x918] sm:$0xf0]  ;;  %v7767_v27 = vor.u32 %v9327_v63, %v7764_v1  ;;  %v9479_v40 = vld [vmem:[%s10325_s28 + $0xccc] sm:$0xf] }
 0x39c   : > { %5564 = vmatpush.bf16.msra.mxu3 %v8247_v58  ;;  %5526 = vmatpush.bf16.msra.mxu0 %v7847_v61  ;;  %v9363_v58 = vld [vmem:[%s10325_s28 + $0x92c] sm:$0xf]  ;;  %v8388_v24 = vld [vmem:[%s10325_s28 + $0xcf8] sm:$0xf0]  ;;  %v7895_v31 = vor.u32 %v9359_v7, %v7892_v18 }
 0x39d   : > { %5539 = vmatpush.bf16.msra.mxu1 %v7975_v13  ;;  %v9427_v61 = vld [vmem:[%s10325_s28 + $0xb2c] sm:$0xf]  ;;  %v8164_v13 = vld [vmem:[%s10325_s28 + $0xb38] sm:$0xf0]  ;;  %v7911_v2 = vor.u32 %v9363_v58, %v7908_v54  ;;  %v8391_v35 = vor.u32 %v9483_v55, %v8388_v24 }
 0x39e   : > { %5552 = vmatpush.bf16.msra.mxu2 %v8103_v12  ;;  %v7783_v12 = vor.u32 %v9331_v49, %v7780_v50  ;;  %v8167_v14 = vor.u32 %v9427_v61, %v8164_v13  ;;  %v8516_v28 = vld [vmem:[%s10325_s28 + $0xdf8] sm:$0xf0]  ;;  %v9511_v45 = vld [vmem:[%s10325_s28 + $0xdcc] sm:$0xf] }
 0x39f   : > { %v8644_v30 = vld [vmem:[%s10325_s28 + $0xef8] sm:$0xf0]  ;;  %v9475_v59 = vld [vmem:[%s10325_s28 + $0xcac] sm:$0xf] }
 0x3a0   : > { %5565 = vmatpush.bf16.msra.mxu3 %v8231_v17  ;;  %5527 = vmatpush.bf16.msra.mxu0 %v7831_v20  ;;  %v8039_v17 = vor.u32 %v9395_v56, %v8036_v60  ;;  %v5301_v11 = vpop.f32.mrf.mxu2  ;;  %v8020_v20 = vld [vmem:[%s10325_s28 + $0xa18] sm:$0xf0]  ;;  %v9507_v54 = vld [vmem:[%s10325_s28 + $0xdac] sm:$0xf] }
 0x3a1   : > { %5540 = vmatpush.bf16.msra.mxu1 %v7959_v21  ;;  %v9423_v21 = vld [vmem:[%s10325_s28 + $0xb0c] sm:$0xf]  ;;  %v8372_v41 = vld [vmem:[%s10325_s28 + $0xcd8] sm:$0xf0] }
 0x3a2   : > { %5553 = vmatpush.bf16.msra.mxu2 %v8087_v22  ;;  %v8148_v22 = vld [vmem:[%s10325_s28 + $0xb18] sm:$0xf0]  ;;  %v5314_v23 = vpop.f32.mrf.mxu3  ;;  %v8375_v49 = vor.u32 %v9479_v40, %v8372_v41  ;;  %v9539_v61 = vld [vmem:[%s10325_s28 + $0xeac] sm:$0xf] }
 0x3a3   : > { %v8151_v34 = vor.u32 %v9423_v21, %v8148_v22  ;;  %v8500_v44 = vld [vmem:[%s10325_s28 + $0xdd8] sm:$0xf0]  ;;  %v9467_v24 = vld [vmem:[%s10325_s28 + $0xc6c] sm:$0xf] }
 0x3a4   : > { %5566 = vmatpush.bf16.msra.mxu3 %v8215_v26  ;;  %5528 = vmatpush.bf16.msra.mxu0 %v7815_v16  ;;  %v9515_v26 = vld [vmem:[%s10325_s28 + $0xdec] sm:$0xf]  ;;  %v8023_v16 = vor.u32 %v9391_v9, %v8020_v20  ;;  %v8628_v47 = vld [vmem:[%s10325_s28 + $0xed8] sm:$0xf0]  ;;  %v8503_v50 = vor.u32 %v9511_v45, %v8500_v44 }
 0x3a5   : > { %5541 = vmatpush.bf16.msra.mxu1 %v7943_v32  ;;  %v9579_v32 = vld [vmem:[%s10325_s28 + $0xfec] sm:$0xf]  ;;  %v8519_v36 = vor.u32 %v9515_v26, %v8516_v28  ;;  %v8484_v60 = vld [vmem:[%s10325_s28 + $0xdb8] sm:$0xf0] }
 0x3a6   : > { %5554 = vmatpush.bf16.msra.mxu2 %v8071_v33  ;;  %v8772_v33 = vld [vmem:[%s10325_s28 + $0xff8] sm:$0xf0]  ;;  %v8487_v1 = vor.u32 %v9507_v54, %v8484_v60  ;;  %v9535_v9 = vld [vmem:[%s10325_s28 + $0xe8c] sm:$0xf] }
 0x3a7   : > { %v8775_v52 = vor.u32 %v9579_v32, %v8772_v33  ;;  %v8612_v13 = vld [vmem:[%s10325_s28 + $0xeb8] sm:$0xf0]  ;;  %v9495_v40 = vld [vmem:[%s10325_s28 + $0xd4c] sm:$0xf] }
 0x3a8   : > { %5567 = vmatpush.bf16.msra.mxu3 %v8199_v39  ;;  %5529 = vmatpush.bf16.msra.mxu0 %v7799_v46  ;;  %v8647_v39 = vor.u32 %v9547_v29, %v8644_v30  ;;  %v9543_v46 = vld [vmem:[%s10325_s28 + $0xecc] sm:$0xf]  ;;  %v8740_v63 = vld [vmem:[%s10325_s28 + $0xfb8] sm:$0xf0] }
 0x3a9   : > { %5542 = vmatpush.bf16.msra.mxu1 %v7927_v48  ;;  %v9575_v48 = vld [vmem:[%s10325_s28 + $0xfcc] sm:$0xf]  ;;  %v8631_v58 = vor.u32 %v9543_v46, %v8628_v47  ;;  %v8340_v7 = vld [vmem:[%s10325_s28 + $0xc98] sm:$0xf0] }
 0x3aa   : > { %5555 = vmatpush.bf16.msra.mxu2 %v8055_v57  ;;  %v8756_v57 = vld [vmem:[%s10325_s28 + $0xfd8] sm:$0xf0]  ;;  %v9531_v30 = vld [vmem:[%s10325_s28 + $0xe6c] sm:$0xf] }
 0x3ab   : > { %v8759_v56 = vor.u32 %v9575_v48, %v8756_v57  ;;  %v8468_v18 = vld [vmem:[%s10325_s28 + $0xd98] sm:$0xf0]  ;;  %v9527_v44 = vld [vmem:[%s10325_s28 + $0xe4c] sm:$0xf] }
 0x3ac   : > { %5568 = vmatpush.bf16.msra.mxu3 %v8183_v53  ;;  %5530 = vmatpush.bf16.msra.mxu0 %v7783_v12  ;;  %v8356_v53 = vld [vmem:[%s10325_s28 + $0xcb8] sm:$0xf0]  ;;  %v9571_v12 = vld [vmem:[%s10325_s28 + $0xfac] sm:$0xf] }
 0x3ad   : > { %5543 = vmatpush.bf16.msra.mxu1 %v7911_v2  ;;  %v8615_v2 = vor.u32 %v9539_v61, %v8612_v13  ;;  %v8596_v11 = vld [vmem:[%s10325_s28 + $0xe98] sm:$0xf0]  ;;  %v9559_v48 = vld [vmem:[%s10325_s28 + $0xf4c] sm:$0xf] }
 0x3ae   : > { %5556 = vmatpush.bf16.msra.mxu2 %v8039_v17  ;;  %v9471_v17 = vld [vmem:[%s10325_s28 + $0xc8c] sm:$0xf]  ;;  %v8724_v20 = vld [vmem:[%s10325_s28 + $0xf98] sm:$0xf0]  ;;  %v8599_v55 = vor.u32 %v9535_v9, %v8596_v11 }
 0x3af   : > { %v8343_v21 = vor.u32 %v9471_v17, %v8340_v7  ;;  %v8324_v26 = vld [vmem:[%s10325_s28 + $0xc78] sm:$0xf0]  ;;  %v9491_v61 = vld [vmem:[%s10325_s28 + $0xd2c] sm:$0xf] }
 0x3b0   : > { %5569 = vmatpush.bf16.msra.mxu3 %v8167_v14  ;;  %5531 = vmatpush.bf16.msra.mxu0 %v7767_v27  ;;  %v9567_v14 = vld [vmem:[%s10325_s28 + $0xf8c] sm:$0xf]  ;;  %v8452_v29 = vld [vmem:[%s10325_s28 + $0xd78] sm:$0xf0]  ;;  %v8327_v33 = vor.u32 %v9467_v24, %v8324_v26 }
 0x3b1   : > { %5544 = vmatpush.bf16.msra.mxu1 %v7895_v31  ;;  %v9499_v27 = vld [vmem:[%s10325_s28 + $0xd6c] sm:$0xf]  ;;  %v8727_v28 = vor.u32 %v9567_v14, %v8724_v20  ;;  %v8580_v31 = vld [vmem:[%s10325_s28 + $0xe78] sm:$0xf0] }
 0x3b2   : > { %5557 = vmatpush.bf16.msra.mxu2 %v8023_v16  ;;  %v9563_v16 = vld [vmem:[%s10325_s28 + $0xf6c] sm:$0xf]  ;;  %v8708_v32 = vld [vmem:[%s10325_s28 + $0xf78] sm:$0xf0] }
 0x3b3   : > { %5532 = vmatmul.bf16.vlgmr.msra.gmra.mxu0 %v10591_v0  ;;  %v8359_v0 = vor.u32 %v9475_v59, %v8356_v53  ;;  %v11488_v22 = vpop.f32.mrf.mxu1  ;;  %v8711_v41 = vor.u32 %v9563_v16, %v8708_v32  ;;  %v8564_v46 = vld [vmem:[%s10325_s28 + $0xe58] sm:$0xf0]  ;;  %v9519_v14 = vld [vmem:[%s10325_s28 + $0xe0c] sm:$0xf]  ;;  %v9605_v16 = vld [vmem:[%s10333_s8 + $0xb8] sm:$0xff] }
 0x3b4   : > { %5570 = vmatpush.bf16.msra.mxu3 %v8151_v34  ;;  %5576 = vmatpush.bf16.msrb.mxu0 %v8391_v35  ;;  %v8455_v34 = vor.u32 %v9499_v27, %v8452_v29  ;;  %v8583_v35 = vor.u32 %v9531_v30, %v8580_v31  ;;  %v8692_v57 = vld [vmem:[%s10325_s28 + $0xf58] sm:$0xf0]  ;;  %v8567_v54 = vor.u32 %v9527_v44, %v8564_v46  ;;  %v9589_v30 = vld [vmem:[%s10333_s8 + $0x38] sm:$0xff] }
 0x3b5   : > { %5589 = vmatpush.bf16.msrb.mxu1 %v8519_v36  ;;  %5558 = vmatmul.bf16.vlgmr.msra.gmra.mxu2 %v10596_v4  ;;  %v9503_v4 = vld [vmem:[%s10325_s28 + $0xd8c] sm:$0xf]  ;;  %v8292_v60 = vld [vmem:[%s10325_s28 + $0xc38] sm:$0xf0]  ;;  %v8695_v13 = vor.u32 %v9559_v48, %v8692_v57  ;;  %v9597_v31 = vld [vmem:[%s10333_s8 + $0x78] sm:$0xff] }
 0x3b6   : > { %5602 = vmatpush.bf16.msrb.mxu2 %v8647_v39  ;;  %5545 = vmatmul.bf16.vlgmr.msra.gmra.mxu1 %v10598_v5  ;;  %v8743_v5 = vor.u32 %v9571_v12, %v8740_v63  ;;  %v8471_v23 = vor.u32 %v9503_v4, %v8468_v18  ;;  %v9463_v36 = vld [vmem:[%s10325_s28 + $0xc4c] sm:$0xf]  ;;  %v8308_v39 = vld [vmem:[%s10325_s28 + $0xc58] sm:$0xf0]  ;;  %v9585_v44 = vld [vmem:[%s10333_s8 + $0x18] sm:$0xff] }
 0x3b7   : > { %5571 = vmatmul.bf16.vlgmr.msra.gmra.mxu3 %v10602_v8  ;;  %v11484_v8 = vpop.f32.mrf.mxu0  ;;  %v8420_v12 = vld [vmem:[%s10325_s28 + $0xd38] sm:$0xf0]  ;;  %v9523_v63 = vld [vmem:[%s10325_s28 + $0xe2c] sm:$0xf]  ;;  %v9601_v46 = vld [vmem:[%s10333_s8 + $0x98] sm:$0xff] }
 0x3b8   : > { %5615 = vmatpush.bf16.msrb.mxu3 %v8775_v52  ;;  %5577 = vmatpush.bf16.msrb.mxu0 %v8375_v49  ;;  %v11501_v45 = vpop.f32.mrf.mxu2  ;;  %v8436_v52 = vld [vmem:[%s10325_s28 + $0xd58] sm:$0xf0]  ;;  %v8423_v17 = vor.u32 %v9491_v61, %v8420_v12  ;;  %v9455_v4 = vld [vmem:[%s10325_s28 + $0xc0c] sm:$0xf]  ;;  %v9599_v61 = vld [vmem:[%s10333_s8 + $0x88] sm:$0xff] }
 0x3b9   : > { %5590 = vmatpush.bf16.msrb.mxu1 %v8503_v50  ;;  %v5274_v50 = vadd.f32 %v11410_v19, %v11356_v42  ;;  %v8439_v53 = vor.u32 %v9495_v40, %v8436_v52  ;;  %v8548_v42 = vld [vmem:[%s10325_s28 + $0xe38] sm:$0xf0]  ;;  %v9555_v19 = vld [vmem:[%s10325_s28 + $0xf2c] sm:$0xf] }
 0x3ba   : > { %5603 = vmatpush.bf16.msrb.mxu2 %v8631_v58  ;;  %v11506_v47 = vpop.f32.mrf.mxu3  ;;  %v8311_v58 = vor.u32 %v9463_v36, %v8308_v39  ;;  %v8551_v7 = vor.u32 %v9523_v63, %v8548_v42  ;;  %v9487_v18 = vld [vmem:[%s10325_s28 + $0xd0c] sm:$0xf]  ;;  %v8404_v11 = vld [vmem:[%s10325_s28 + $0xd18] sm:$0xf0]  ;;  %v9595_v36 = vld [vmem:[%s10333_s8 + $0x68] sm:$0xff] }
 0x3bb   : > { %v5340_v59 = vpop.f32.mrf.mxu1  ;;  %v8532_v20 = vld [vmem:[%s10325_s28 + $0xe18] sm:$0xf0]  ;;  %v8407_v27 = vor.u32 %v9487_v18, %v8404_v11  ;;  %v9603_v39 = vld [vmem:[%s10333_s8 + $0xa8] sm:$0xff]  ;;  %v9582_v42 = vld [vmem:[%s10333_s8] sm:$0xff]  ;;  %v2175_v18 = vperm.slane %v11332_v51, 3 }
 0x3bc   : > { %5616 = vmatpush.bf16.msrb.mxu3 %v8759_v56  ;;  %5578 = vmatpush.bf16.msrb.mxu0 %v8359_v0  ;;  %v9459_v56 = vld [vmem:[%s10325_s28 + $0xc2c] sm:$0xf]  ;;  %v8676_v0 = vld [vmem:[%s10325_s28 + $0xf38] sm:$0xf0] }
 0x3bd   : > { %5591 = vmatpush.bf16.msrb.mxu1 %v8487_v1  ;;  %v5287_v1 = vadd.f32 %v11415_v25, %v5274_v50  ;;  %v8679_v9 = vor.u32 %v9555_v19, %v8676_v0  ;;  %v5628_v19 = vmax.f32 %v10998_v15, 0.0  ;;  %v9590_v0 = vld [vmem:[%s10333_s8 + $0x40] sm:$0xff] }
 0x3be   : > { %5604 = vmatpush.bf16.msrb.mxu2 %v8615_v2  ;;  %v8295_v2 = vor.u32 %v9459_v56, %v8292_v60  ;;  %v9583_v56 = vld [vmem:[%s10333_s8 + $0x8] sm:$0xff] }
 0x3bf   : > { %v5327_v49 = vpop.f32.mrf.mxu0  ;;  %v5300_v24 = vadd.f32 %v11425_v38, %v5287_v1  ;;  %v9591_v60 = vld [vmem:[%s10333_s8 + $0x48] sm:$0xff]  ;;  %v9598_v1 = vld [vmem:[%s10333_s8 + $0x80] sm:$0xff] }
 0x3c0   : > { %5617 = vmatpush.bf16.msrb.mxu3 %v8743_v5  ;;  %5579 = vmatpush.bf16.msrb.mxu0 %v8343_v21  ;;  %v8276_v5 = vld [vmem:[%s10325_s28 + $0xc18] sm:$0xf0]  ;;  %v5353_v25 = vpop.f32.mrf.mxu2  ;;  %v9551_v21 = vld [vmem:[%s10325_s28 + $0xf0c] sm:$0xf] }
 0x3c1   : > { %5592 = vmatpush.bf16.msrb.mxu1 %v8471_v23  ;;  %v8660_v23 = vld [vmem:[%s10325_s28 + $0xf18] sm:$0xf0]  ;;  %v8279_v26 = vor.u32 %v9455_v4, %v8276_v5  ;;  %v5313_v32 = vadd.f32 %v11430_v43, %v5300_v24 }
 0x3c2   : > { %5605 = vmatpush.bf16.msrb.mxu2 %v8599_v55  ;;  %v5366_v55 = vpop.f32.mrf.mxu3  ;;  %v8663_v29 = vor.u32 %v9551_v21, %v8660_v23 }
 0x3c3   : > { %v5326_v38 = vadd.f32 %v11484_v8, %v5313_v32  ;;  %v9587_v8 = vld [vmem:[%s10333_s8 + $0x28] sm:$0xff]  ;;  %v9612_v32 = vld [vmem:[%s10333_s8 + $0xf0] sm:$0xff] }
 0x3c4   : > { %5618 = vmatpush.bf16.msrb.mxu3 %v8727_v28  ;;  %5580 = vmatpush.bf16.msrb.mxu0 %v8327_v33  ;;  %v8535_v28 = vor.u32 %v9519_v14, %v8532_v20  ;;  %v9588_v33 = vld [vmem:[%s10333_s8 + $0x30] sm:$0xff] }
 0x3c5   : > { %5593 = vmatpush.bf16.msrb.mxu1 %v8455_v34  ;;  %v9596_v34 = vld [vmem:[%s10333_s8 + $0x70] sm:$0xff]  ;;  %v5339_v43 = vadd.f32 %v11488_v22, %v5326_v38  ;;  %v9602_v22 = vld [vmem:[%s10333_s8 + $0xa0] sm:$0xff] }
 0x3c6   : > { %5606 = vmatpush.bf16.msrb.mxu2 %v8583_v35  ;;  %v9604_v35 = vld [vmem:[%s10333_s8 + $0xb0] sm:$0xff] }
 0x3c8   : > { %5619 = vmatpush.bf16.msrb.mxu3 %v8711_v41  ;;  %5581 = vmatpush.bf16.msrb.mxu0 %v8311_v58  ;;  %v9584_v58 = vld [vmem:[%s10333_s8 + $0x10] sm:$0xff] }
 0x3c9   : > { %5594 = vmatpush.bf16.msrb.mxu1 %v8439_v53  ;;  %v9600_v53 = vld [vmem:[%s10333_s8 + $0x90] sm:$0xff] }
 0x3ca   : > { %5607 = vmatpush.bf16.msrb.mxu2 %v8567_v54 }
 0x3cc   : > { %5620 = vmatpush.bf16.msrb.mxu3 %v8695_v13  ;;  %5582 = vmatpush.bf16.msrb.mxu0 %v8295_v2  ;;  %v5629_v2 = vmax.f32 %v11282_v37, 0.0 }
 0x3cd   : > { %5595 = vmatpush.bf16.msrb.mxu1 %v8423_v17 }
 0x3ce   : > { %5608 = vmatpush.bf16.msrb.mxu2 %v8551_v7  ;;  %v5633_v7 = vpack.c.bf16 %v5628_v19, %v5628_v19  ;;  %v5634_v4 = vpack.c.bf16 %v5629_v2, %v5629_v2 }
 0x3d0   : > { %5621 = vmatpush.bf16.msrb.mxu3 %v8679_v9  ;;  %5583 = vmatpush.bf16.msrb.mxu0 %v8279_v26 }
 0x3d1   : > { %5596 = vmatpush.bf16.msrb.mxu1 %v8407_v27 }
 0x3d2   : > { %5609 = vmatpush.bf16.msrb.mxu2 %v8535_v28 }
 0x3d3   : > { %5584 = vmatmul.bf16.vlgmr.msrb.gmra.mxu0 %v10667_v62  ;;  %v5352_v62 = vadd.f32 %v11501_v45, %v5339_v43  ;;  %v5390_v40 = vpop.f32.mrf.mxu1  ;;  %v9593_v45 = vld [vmem:[%s10333_s8 + $0x58] sm:$0xff] }
 0x3d4   : > { %5622 = vmatpush.bf16.msrb.mxu3 %v8663_v29  ;;  %5893 = vmatpush.bf16.msra.mxu0 %v9589_v30  ;;  %v9613_v30 = vld [vmem:[%s10333_s8 + $0xf8] sm:$0xff] }
 0x3d5   : > { %5906 = vmatpush.bf16.msra.mxu1 %v9597_v31  ;;  %5610 = vmatmul.bf16.vlgmr.msrb.gmra.mxu2 %v10672_v3  ;;  %v9586_v3 = vld [vmem:[%s10333_s8 + $0x20] sm:$0xff]  ;;  %v5365_v41 = vadd.f32 %v11506_v47, %v5352_v62  ;;  %v9592_v47 = vld [vmem:[%s10333_s8 + $0x50] sm:$0xff]  ;;  %v9609_v43 = vld [vmem:[%s10333_s8 + $0xd8] sm:$0xff] }
 0x3d6   : > { %5919 = vmatpush.bf16.msra.mxu2 %v9605_v16  ;;  %5597 = vmatmul.bf16.vlgmr.msrb.gmra.mxu1 %v10674_v6  ;;  %v5377_v6 = vpop.f32.mrf.mxu0  ;;  %v9607_v62 = vld [vmem:[%s10333_s8 + $0xc8] sm:$0xff] }
 0x3d7   : > { %5623 = vmatmul.bf16.vlgmr.msrb.gmra.mxu3 %v10678_v10  ;;  %v9594_v10 = vld [vmem:[%s10333_s8 + $0x60] sm:$0xff]  ;;  %v5378_v52 = vadd.f32 %v5377_v6, %v5365_v41 }
 0x3d8   : > { %5894 = vmatpush.bf16.msra.mxu0 %v9588_v33  ;;  %v5403_v48 = vpop.f32.mrf.mxu2  ;;  %5932 = vmatpush.bf16.msra.mxu3 %v9613_v30  ;;  %v9611_v33 = vld [vmem:[%s10333_s8 + $0xe8] sm:$0xff]  ;;  %v9606_v41 = vld [vmem:[%s10333_s8 + $0xc0] sm:$0xff] }
 0x3d9   : > { %5907 = vmatpush.bf16.msra.mxu1 %v9596_v34  ;;  %v5391_v50 = vadd.f32 %v5390_v40, %v5378_v52 }
 0x3da   : > { %5920 = vmatpush.bf16.msra.mxu2 %v9604_v35  ;;  %v5416_v57 = vpop.f32.mrf.mxu3  ;;  %v9610_v35 = vld [vmem:[%s10333_s8 + $0xe0] sm:$0xff] }
 0x3db   : > { %v5392_v59 = vpop.f32.mrf.mxu1  ;;  %v5404_v54 = vadd.f32 %v5403_v48, %v5391_v50 }
 0x3dc   : > { %5895 = vmatpush.bf16.msra.mxu0 %v9587_v8  ;;  %5933 = vmatpush.bf16.msra.mxu3 %v9612_v32 }
 0x3dd   : > { %5908 = vmatpush.bf16.msra.mxu1 %v9595_v36  ;;  %v5417_v13 = vadd.f32 %v5416_v57, %v5404_v54 }
 0x3de   : > { %5921 = vmatpush.bf16.msra.mxu2 %v9603_v39  ;;  %v5379_v49 = vpop.f32.mrf.mxu0  ;;  %v9608_v39 = vld [vmem:[%s10333_s8 + $0xd0] sm:$0xff] }
 0x3df   : > { %v5630_v17 = vmax.f32 %v5417_v13, 0.0 }
 0x3e0   : > { %5896 = vmatpush.bf16.msra.mxu0 %v9586_v3  ;;  %v5405_v12 = vpop.f32.mrf.mxu2  ;;  %5934 = vmatpush.bf16.msra.mxu3 %v9611_v33 }
 0x3e1   : > { %5909 = vmatpush.bf16.msra.mxu1 %v9594_v10  ;;  %v5635_v5 = vpack.c.bf16 %v5630_v17, %v5630_v17 }
 0x3e2   : > { %5922 = vmatpush.bf16.msra.mxu2 %v9602_v22  ;;  %v5418_v63 = vpop.f32.mrf.mxu3 }
 0x3e4   : > { %5897 = vmatpush.bf16.msra.mxu0 %v9585_v44  ;;  %5935 = vmatpush.bf16.msra.mxu3 %v9610_v35 }
 0x3e5   : > { %5910 = vmatpush.bf16.msra.mxu1 %v9593_v45 }
 0x3e6   : > { %5923 = vmatpush.bf16.msra.mxu2 %v9601_v46 }
 0x3e8   : > { %5898 = vmatpush.bf16.msra.mxu0 %v9584_v58  ;;  %5936 = vmatpush.bf16.msra.mxu3 %v9609_v43 }
 0x3e9   : > { %5911 = vmatpush.bf16.msra.mxu1 %v9592_v47 }
 0x3ea   : > { %5924 = vmatpush.bf16.msra.mxu2 %v9600_v53 }
 0x3ec   : > { %5899 = vmatpush.bf16.msra.mxu0 %v9583_v56  ;;  %5937 = vmatpush.bf16.msra.mxu3 %v9608_v39 }
 0x3ed   : > { %5912 = vmatpush.bf16.msra.mxu1 %v9591_v60 }
 0x3ee   : > { %5925 = vmatpush.bf16.msra.mxu2 %v9599_v61 }
 0x3f0   : > { %5900 = vmatpush.bf16.msra.mxu0 %v9582_v42  ;;  %v5429_v9 = vpop.f32.mrf.mxu0  ;;  %5938 = vmatpush.bf16.msra.mxu3 %v9607_v62 }
 0x3f1   : > { %5913 = vmatpush.bf16.msra.mxu1 %v9590_v0  ;;  %v5430_v15 = vadd.f32 %v5429_v9, %v2175_v18 }
 0x3f2   : > { %5926 = vmatpush.bf16.msra.mxu2 %v9598_v1 }
 0x3f3   : > { %5901 = vmatmul.bf16.vlgmr.msra.gmra.mxu0 %v5633_v7  ;;  %v5442_v11 = vpop.f32.mrf.mxu1 }
 0x3f4   : > { %5914 = vmatmul.bf16.vlgmr.msra.gmra.mxu1 %v5634_v4  ;;  %v5443_v14 = vadd.f32 %v5442_v11, %v5430_v15  ;;  %5939 = vmatpush.bf16.msra.mxu3 %v9606_v41  ;;  %v5632_v11 = vld [vmem:[#allocation3] sm:$0xff] }
 0x3f5   : > { %5927 = vmatmul.bf16.vlgmr.msra.gmra.mxu2 %v5635_v5 }
 0x3f8   : > { %v5455_v20 = vpop.f32.mrf.mxu2  ;;  %v5431_v23 = vpop.f32.mrf.mxu0 }
 0x3f9   : > { %v5456_v37 = vadd.f32 %v5455_v20, %v5443_v14 }
 0x3fa   : > { %v5468_v25 = vpop.f32.mrf.mxu3 }
 0x3fb   : > { %v5469_v21 = vadd.f32 %v5468_v25, %v5456_v37  ;;  %v5444_v55 = vpop.f32.mrf.mxu1 }
 0x400   : > { %v5457_v24 = vpop.f32.mrf.mxu2 }
 0x402   : > { %v5470_v26 = vpop.f32.mrf.mxu3 }
 0x410   : > { %v5481_v27 = vpop.f32.mrf.mxu0 }
 0x411   : > { %v5482_v6 = vadd.f32 %v5481_v27, %v5469_v21 }
 0x413   : > { %v5494_v28 = vpop.f32.mrf.mxu1 }
 0x414   : > { %v5495_v52 = vadd.f32 %v5494_v28, %v5482_v6 }
 0x418   : > { %v5507_v51 = vpop.f32.mrf.mxu2  ;;  %v5483_v31 = vpop.f32.mrf.mxu0 }
 0x419   : > { %v5508_v44 = vadd.f32 %v5507_v51, %v5495_v52 }
 0x41a   : > { %v5520_v29 = vpop.f32.mrf.mxu3 }
 0x41b   : > { %v5496_v16 = vpop.f32.mrf.mxu1  ;;  %v5521_v48 = vadd.f32 %v5520_v29, %v5508_v44 }
 0x420   : > { %v5509_v38 = vpop.f32.mrf.mxu2 }
 0x422   : > { %v5522_v34 = vpop.f32.mrf.mxu3 }
 0x430   : > { %v5533_v8 = vpop.f32.mrf.mxu0 }
 0x431   : > { %v5534_v57 = vadd.f32 %v5533_v8, %v5521_v48 }
 0x433   : > { %v5546_v36 = vpop.f32.mrf.mxu1 }
 0x434   : > { %v5547_v49 = vadd.f32 %v5546_v36, %v5534_v57 }
 0x438   : > { %v5559_v3 = vpop.f32.mrf.mxu2  ;;  %v5535_v10 = vpop.f32.mrf.mxu0 }
 0x439   : > { %v5560_v50 = vadd.f32 %v5559_v3, %v5547_v49 }
 0x43a   : > { %v5572_v40 = vpop.f32.mrf.mxu3 }
 0x43b   : > { %v5548_v22 = vpop.f32.mrf.mxu1  ;;  %v5573_v58 = vadd.f32 %v5572_v40, %v5560_v50 }
 0x440   : > { %v5561_v45 = vpop.f32.mrf.mxu2 }
 0x442   : > { %v5574_v46 = vpop.f32.mrf.mxu3 }
 0x450   : > { %v5585_v59 = vpop.f32.mrf.mxu0 }
 0x451   : > { %v5586_v53 = vadd.f32 %v5585_v59, %v5573_v58 }
 0x453   : > { %v5598_v47 = vpop.f32.mrf.mxu1 }
 0x454   : > { %v5599_v54 = vadd.f32 %v5598_v47, %v5586_v53 }
 0x458   : > { %v5611_v56 = vpop.f32.mrf.mxu2  ;;  %v5587_v13 = vpop.f32.mrf.mxu0 }
 0x459   : > { %v5612_v61 = vadd.f32 %v5611_v56, %v5599_v54 }
 0x45a   : > { %v5624_v60 = vpop.f32.mrf.mxu3 }
 0x45b   : > { %v5600_v12 = vpop.f32.mrf.mxu1  ;;  %v5625_v63 = vadd.f32 %v5624_v60, %v5612_v61 }
 0x45d   : > { %v5631_v42 = vmax.f32 %v5625_v63, 0.0 }
 0x45f   : > { %v5636_v19 = vpack.c.bf16 %v5631_v42, %v5631_v42 }
 0x460   : > { %v5613_v0 = vpop.f32.mrf.mxu2 }
 0x461   : > { %5940 = vmatmul.bf16.vlgmr.msra.gmra.mxu3 %v5636_v19 }
 0x462   : > { %v5626_v1 = vpop.f32.mrf.mxu3 }
 0x470   : > { %v5902_v2 = vpop.f32.mrf.mxu0 }
 0x471   : > { %v5915_v17 = vpop.f32.mrf.mxu1 }
 0x472   : > { %v5916_v7 = vadd.f32 %v5915_v17, %v5902_v2 }
 0x478   : > { %v5928_v4 = vpop.f32.mrf.mxu2  ;;  %v5904_v18 = vpop.f32.mrf.mxu0 }
 0x479   : > { %v5929_v5 = vadd.f32 %v5928_v4, %v5916_v7  ;;  %v5917_v9 = vpop.f32.mrf.mxu1 }
 0x480   : > { %v5930_v15 = vpop.f32.mrf.mxu2 }
 0x4e4   : > { %v5941_v14 = vpop.f32.mrf.mxu3 }
 0x4e5   : > { %v5942_v20 = vadd.f32 %v5941_v14, %v5929_v5 }
 0x4e7   : > { %v5945_v37 = vadd.f32 %v5942_v20, %v5632_v11 }
 0x4e8   : > { %5950 = sbr.rel (%p8904_p1) target bundleno = 1427 (0x593), region = 108 }
 0x4e9   : > { %5946 = vst [vmem:[#allocation3] sm:$0xff] %v5945_v37 }
 0x4ec   : > { %v5943_v25 = vpop.f32.mrf.mxu3 }
 0x4ed   : > { %v9621_v21 = vld [vmem:[%s11624_s9 + $0x38] sm:$0xff]  ;;  %v9620_v23 = vld [vmem:[%s11624_s9 + $0x30] sm:$0xff]  ;;  %v9619_v55 = vld [vmem:[%s11624_s9 + $0x28] sm:$0xff]  ;;  %vm6040_vm1 = vcmask 7168  }
 0x4ee   : > { %6027 = vmatpush.bf16.msra.mxu0 %v9621_v21  ;;  %v9618_v24 = vld [vmem:[%s11624_s9 + $0x20] sm:$0xff]  ;;  %v9617_v26 = vld [vmem:[%s11624_s9 + $0x18] sm:$0xff]  ;;  %v9741_v27 = vld [vmem:[#allocation18] ss:$0 sm:$0xff] }
 0x4ef   : > { %v9616_v28 = vld [vmem:[%s11624_s9 + $0x10] sm:$0xff]  ;;  %v9615_v30 = vld [vmem:[%s11624_s9 + $0x8] sm:$0xff]  ;;  %v9614_v16 = vld [vmem:[%s11624_s9] sm:$0xff] }
 0x4f0   : > { %v5951_v51 = vld [vmem:[#allocation3] sm:$0xff]  ;;  %v9742_v38 = vld [vmem:[#allocation4] ss:$0 sm:$0xff] }
 0x4f1   : > { %v5956_v29 = vadd.f32 %v9741_v27, %v5951_v51 }
 0x4f2   : > { %6028 = vmatpush.bf16.msra.mxu0 %v9620_v23 }
 0x4f3   : > { %v5957_v31 = vmax.f32 %v5956_v29, 0.0 }
 0x4f5   : > { %v5958_v32 = vpack.c.bf16 %v5957_v31, %v5957_v31 }
 0x4f6   : > { %6029 = vmatpush.bf16.msra.mxu0 %v9619_v55 }
 0x4fa   : > { %6030 = vmatpush.bf16.msra.mxu0 %v9618_v24 }
 0x4fe   : > { %6031 = vmatpush.bf16.msra.mxu0 %v9617_v26 }
 0x502   : > { %6032 = vmatpush.bf16.msra.mxu0 %v9616_v28 }
 0x506   : > { %6033 = vmatpush.bf16.msra.mxu0 %v9615_v30 }
 0x50a   : > { %6034 = vmatpush.bf16.msra.mxu0 %v9614_v16 }
 0x50d   : > { %6035 = vmatmul.bf16.vlgmr.msra.gmra.mxu0 %v5958_v32 }
 0x58a   : > { %v6036_v33 = vpop.f32.mrf.mxu0 }
 0x58b   : > { %v6037_v34 = vadd.f32 %v9742_v38, %v6036_v33 }
 0x58d   : > { %6041 = vst.msk [vmem:[%s11626_s11] sm:$0xff] %vm6040_vm1, %v6037_v34 }
 0x592   : > { %v6038_v35 = vpop.f32.mrf.mxu0 }
 0x593 PF: > { %s11650_s30 = sld [smem:[#allocation25_spill]]  ;;  %p29_p3 = scmp.ge.s32.totalorder %s10203_s24, 6  }
 0x594   : > { %s11651_s21 = sld [smem:[#allocation26_spill]]  ;;  %s11652_s19 = smov %s10059_s20 }
 0x595   : > { %s11654_s22 = smov %s10203_s24  ;;  %31 = sbr.rel (!%p29_p3) target bundleno = 14 (0xe), region = 157 }
 0x599   : > { %s11653_s20 = smov %s11650_s30 }
 0x59a   :  { %6053 = vsyncpa [#allocation6], 1 }
 0x59b   :  { %6055 = vsyncpa [#allocation6 + $0x1], 1 }
 0x59c   :  { %6056 = vsyncpa [#allocation8], 1 }
 0x59d   :  { %6057 = vsyncpa [#allocation11], 1 }
 0x59e   :  { %6058 = vsyncpa [#allocation14], 1 }
 0x59f   :  { %6060 = vsyncpa [#allocation14 + $0x1], 1 }
 0x5a0   :  { %6061 = vsyncpa [#allocation17], 1 }
 0x5a1   :  { %6063 = vsyncpa [#allocation17 + $0x1], 1 }

</bundles_post_ra>
